<compile_context>
chip_gen: v6e
topology: v6e:2x2x1
jax: 0.10.0
libtpu: 0.0.40
codegen_flags: <defaults>
</compile_context>

<pallas_src>
import functools

import jax
import jax.numpy as jnp
from jax.experimental import pallas as pl
from jax.experimental.pallas import tpu as pltpu

_MIB = 1024 * 1024


def _round_up(v: int, m: int) -> int:
    return ((v + m - 1) // m) * m


def _pad2d(x, rows, cols):
    r, c = x.shape
    if (r, c) == (rows, cols):
        return x
    return jnp.pad(x, ((0, rows - r), (0, cols - c)))


def _vmem_limit(nbytes: int) -> int:
    # Generation-safe scoped-VMEM request: floor 16 MiB, cap 40 MiB so it also
    # fits comfortably inside v7x's 64 MiB/TC (v5e/v6e have 128 MiB).
    return int(min(max(2 * nbytes, 16 * _MIB), 40 * _MIB))


# ---------------------------------------------------------------------------
# Kernel 1: fused (3x chained MLP predictor + BYOL loss), both views merged.
#   MLP = Linear(D,H) -> BatchNorm1d(H) (per-view training stats) -> ReLU
#         -> Linear(H,H) -> ReLU -> Linear(H,D)
# ---------------------------------------------------------------------------
def _fused_predictor_byol_kernel(x_ref, t_ref,
                                 w1_ref, b1_ref, g_ref, bt_ref,
                                 w2_ref, b2_ref, w3_ref, b3_ref,
                                 o_ref, *, n_valid, b_pad):
    m_rows = x_ref.shape[0]                               # 2 * b_pad
    t = t_ref[...]                                        # (M, D_pad) f32

    r = jax.lax.broadcasted_iota(jnp.int32, (m_rows, 1), 0)
    in_view1 = r >= b_pad
    local = jnp.where(in_view1, r - b_pad, r)
    valid_f = (local < n_valid).astype(jnp.float32)       # zero out pad rows
    half1 = in_view1.astype(jnp.float32)                  # row belongs to view1
    half0 = 1.0 - half1
    m0 = valid_f * half0                                  # valid rows of view 0
    m1 = valid_f * half1                                  # valid rows of view 1
    inv_n = jnp.float32(1.0 / n_valid)

    x = x_ref[...]                                        # bf16 (M, D_pad)
    for i in range(3):                                    # chained predictors
        xb = x if x.dtype == jnp.bfloat16 else x.astype(jnp.bfloat16)
        h = jnp.dot(xb, w1_ref[i],
                    preferred_element_type=jnp.float32) + b1_ref[i]

        # BatchNorm1d training stats (biased), computed per view in one pass.
        def _stats(mask, h=h):
            hm = h * mask
            mean = jnp.sum(hm, axis=0, keepdims=True) * inv_n
            ex2 = jnp.sum(hm * h, axis=0, keepdims=True) * inv_n
            var = ex2 - mean * mean
            return mean, jax.lax.rsqrt(var + 1e-5)

        mean0, istd0 = _stats(m0)
        mean1, istd1 = _stats(m1)
        mean = half0 * mean0 + half1 * mean1               # (M,1)*(1,H)->(M,H)
        istd = half0 * istd0 + half1 * istd1
        h = (h - mean) * istd * g_ref[i] + bt_ref[i]
        h = jnp.maximum(h, 0.0)
        h = jnp.maximum(
            jnp.dot(h.astype(jnp.bfloat16), w2_ref[i],
                    preferred_element_type=jnp.float32) + b2_ref[i], 0.0)
        x = jnp.dot(h.astype(jnp.bfloat16), w3_ref[i],
                    preferred_element_type=jnp.float32) + b3_ref[i]

    # BYOL loss_fn(x, t) = 2 - 2 * <normalize(x), normalize(t)>, summed over
    # valid rows of both views; the /B mean is taken in the wrapper.
    eps_sq = jnp.float32(1e-24)                            # F.normalize eps**2
    xn = x * jax.lax.rsqrt(
        jnp.maximum(jnp.sum(x * x, axis=-1, keepdims=True), eps_sq))
    tn = t * jax.lax.rsqrt(
        jnp.maximum(jnp.sum(t * t, axis=-1, keepdims=True), eps_sq))
    per_row = 2.0 - 2.0 * jnp.sum(xn * tn, axis=-1, keepdims=True)   # (M, 1)
    total = jnp.sum(per_row * valid_f, axis=0, keepdims=True)        # (1, 1)
    o_ref[...] = jnp.broadcast_to(total, o_ref.shape)


def fused_predictor_byol_loss(rep_one, rep_two, target_one, target_two, packed):
    n, _ = rep_one.shape
    b_pad = _round_up(n, 8)
    d_pad = packed[0].shape[1]
    h_pad = packed[4].shape[1]

    def pad_bf16(e):
        return _pad2d(e.astype(jnp.bfloat16), b_pad, d_pad)

    def pad_f32(e):
        return _pad2d(e.astype(jnp.float32), b_pad, d_pad)

    # Views merged along the row axis -> a single program, weights DMA'd once.
    x = jnp.concatenate([pad_bf16(rep_one), pad_bf16(rep_two)], axis=0)
    # View 0 (online_pred_one) pairs with target_proj_two, view 1 with _one.
    t = jnp.concatenate([pad_f32(target_two), pad_f32(target_one)], axis=0)

    operands = (x, t) + tuple(packed)
    nbytes = sum(int(a.size) * a.dtype.itemsize for a in operands)
    nbytes += 8 * (2 * b_pad) * h_pad * 4 + 8 * 128 * 4    # activation temps

    vmem = pl.BlockSpec(memory_space=pltpu.MemorySpace.VMEM)
    out = pl.pallas_call(
        functools.partial(_fused_predictor_byol_kernel, n_valid=n, b_pad=b_pad),
        out_shape=jax.ShapeDtypeStruct((8, 128), jnp.float32),
        in_specs=[vmem] * len(operands),
        out_specs=vmem,
        compiler_params=pltpu.CompilerParams(
            vmem_limit_bytes=_vmem_limit(nbytes)),
    )(*operands)
    # loss = mean over B rows of (loss_one + loss_two)
    return out[0, 0] / n


# ---------------------------------------------------------------------------
# Kernel 2: llm_features branch (contrastive distillation loss, "loss2"),
# row-block tiled over strips of the similarity matrix.
# ---------------------------------------------------------------------------
def _contrastive_kernel(t_ref, on_ref, mask_ref, o_ref,
                        tn_scr, on_scr, num_scr, den_scr, *, n_valid, tr):
    i = pl.program_id(0)
    n_pad = t_ref.shape[0]
    eps_sq = jnp.float32(1e-24)

    @pl.when(i == 0)
    def _():
        te = t_ref[...]
        oe = on_ref[...]
        tn_scr[...] = te * jax.lax.rsqrt(
            jnp.maximum(jnp.sum(te * te, axis=-1, keepdims=True), eps_sq))
        on_scr[...] = oe * jax.lax.rsqrt(
            jnp.maximum(jnp.sum(oe * oe, axis=-1, keepdims=True), eps_sq))
        num_scr[...] = jnp.zeros_like(num_scr)
        den_scr[...] = jnp.zeros_like(den_scr)

    start = pl.multiple_of(i * tr, tr)
    row_g = jax.lax.broadcasted_iota(jnp.int32, (tr, n_pad), 0) + start
    col = jax.lax.broadcasted_iota(jnp.int32, (tr, n_pad), 1)
    kill = (row_g == col) | (col >= n_valid)               # diag + padded cols
    msk1 = mask_ref[...] != 0                              # cos_sim[mask==1]=1
    row_valid = ((jax.lax.broadcasted_iota(jnp.int32, (tr, 1), 0) + start)
                 < n_valid).astype(jnp.float32)
    neg_inf = jnp.float32(-jnp.inf)

    t_full = tn_scr[...]
    o_full = on_scr[...]
    t_strip = tn_scr[pl.ds(start, tr), :]
    o_strip = on_scr[pl.ds(start, tr), :]
    dims = (((1,), (1,)), ((), ()))                        # A @ B.T

    # target branch (temp = 1/20) -> softmax
    st = jax.lax.dot_general(t_strip, t_full, dims,
                             preferred_element_type=jnp.float32)
    st = jnp.where(kill, neg_inf, jnp.where(msk1, 1.0, st) * 20.0)
    mt = jnp.max(st, axis=-1, keepdims=True)
    et = jnp.exp(st - mt)
    rs = jnp.sum(et, axis=-1, keepdims=True)
    inv_rs = pl.reciprocal(rs, approx=True)
    t_sm = et * inv_rs

    # online branch (temp = 1/10) -> log_softmax
    so = jax.lax.dot_general(o_strip, o_full, dims,
                             preferred_element_type=jnp.float32)
    so = jnp.where(kill, neg_inf, jnp.where(msk1, 1.0, so) * 10.0)
    mo = jnp.max(so, axis=-1, keepdims=True)
    lse = jnp.log(jnp.sum(jnp.exp(so - mo), axis=-1, keepdims=True)) + mo
    o_lsm = jnp.where(kill, 0.0, so - lse)                 # NaN-free product

    per_row_num = jnp.sum(t_sm * o_lsm, axis=-1, keepdims=True) * row_valid
    num_scr[...] += jnp.sum(per_row_num, axis=0, keepdims=True)
    # den = sum of t_sm over valid rows; per-row column sums are rs * inv_rs.
    per_row_den = rs * inv_rs * row_valid
    den_scr[...] += jnp.sum(per_row_den, axis=0, keepdims=True)

    @pl.when(i == pl.num_programs(0) - 1)
    def _():
        o_ref[...] = jnp.broadcast_to(-(num_scr[...] / den_scr[...]),
                                      o_ref.shape)


def contrastive_loss(target_embeddings, online_embeddings, mask):
    n, d = target_embeddings.shape
    d_pad = _round_up(d, 128)
    tr = min(256, _round_up(n, 8))                         # v7x-friendly strip
    n_pad = _round_up(n, tr)

    te = _pad2d(target_embeddings.astype(jnp.float32), n_pad, d_pad)
    oe = _pad2d(online_embeddings.astype(jnp.float32), n_pad, d_pad)
    mk = _pad2d(mask.astype(jnp.int8), n_pad, n_pad)       # int8: 4x less DMA

    grid = (n_pad // tr,)
    full_spec = pl.BlockSpec((n_pad, d_pad), lambda i: (0, 0))   # resident
    mask_spec = pl.BlockSpec((tr, n_pad), lambda i: (i, 0))      # pipelined

    nbytes = (4 * n_pad * d_pad * 4            # te/oe inputs + norm scratch
              + 2 * tr * n_pad * 1             # double-buffered mask strips
              + 8 * tr * n_pad * 4             # sim / exp temporaries
              + 8 * 128 * 4)

    out = pl.pallas_call(
        functools.partial(_contrastive_kernel, n_valid=n, tr=tr),
        grid=grid,
        in_specs=[full_spec, full_spec, mask_spec],
        out_specs=pl.BlockSpec((8, 128), lambda i: (0, 0)),
        out_shape=jax.ShapeDtypeStruct((8, 128), jnp.float32),
        scratch_shapes=[
            pltpu.VMEM((n_pad, d_pad), jnp.float32),       # normalized target
            pltpu.VMEM((n_pad, d_pad), jnp.float32),       # normalized online
            pltpu.VMEM((1, 1), jnp.float32),               # num accumulator
            pltpu.VMEM((1, 1), jnp.float32),               # den accumulator
        ],
        compiler_params=pltpu.CompilerParams(
            dimension_semantics=("arbitrary",),
            vmem_limit_bytes=_vmem_limit(nbytes)),
    )(te, oe, mk)
    return out[0, 0]


# ---------------------------------------------------------------------------
# BYOLoss2 wrapper (forward-pass semantics)
# ---------------------------------------------------------------------------
def init_mlp_params(key, dim, hidden, proj):
    ks = jax.random.split(key, 6)
    scale = 0.05
    w1 = (scale * jax.random.normal(ks[0], (dim, hidden))).astype(jnp.float32)
    b1 = (scale * jax.random.normal(ks[1], (1, hidden))).astype(jnp.float32)
    gamma = jnp.ones((1, hidden), jnp.float32)
    beta = jnp.zeros((1, hidden), jnp.float32)
    w2 = (scale * jax.random.normal(ks[2], (hidden, hidden))).astype(jnp.float32)
    b2 = (scale * jax.random.normal(ks[3], (1, hidden))).astype(jnp.float32)
    w3 = (scale * jax.random.normal(ks[4], (hidden, proj))).astype(jnp.float32)
    b3 = (scale * jax.random.normal(ks[5], (1, proj))).astype(jnp.float32)
    return (w1, b1, gamma, beta, w2, b2, w3, b3)


class BYOLoss2Pallas:
    """Forward pass of BYOLoss2 with precomputed sentence embeddings."""

    def __init__(self, sentence_embedding_dimension, key):
        d = sentence_embedding_dimension
        h = 10 * d
        d_pad = _round_up(d, 128)
        h_pad = _round_up(h, 128)
        raw = [init_mlp_params(k, d, h, d) for k in jax.random.split(key, 3)]

        def stack(idx, rows, cols, dtype):
            return jnp.stack([_pad2d(p[idx], rows, cols) for p in raw]).astype(dtype)

        # Weights bf16 (MXU native, half the HBM bytes); biases / BN params
        # f32.  Zero padding keeps padded feature columns identically zero.
        self.packed = (
            stack(0, d_pad, h_pad, jnp.bfloat16),   # W1    (3, D_pad, H_pad)
            stack(1, 1, h_pad, jnp.float32),        # b1    (3, 1, H_pad)
            stack(2, 1, h_pad, jnp.float32),        # gamma
            stack(3, 1, h_pad, jnp.float32),        # beta
            stack(4, h_pad, h_pad, jnp.bfloat16),   # W2    (3, H_pad, H_pad)
            stack(5, 1, h_pad, jnp.float32),        # b2
            stack(6, h_pad, d_pad, jnp.bfloat16),   # W3    (3, H_pad, D_pad)
            stack(7, 1, d_pad, jnp.float32),        # b3
        )

    def __call__(self, rep_one, rep_two, target_proj_one, target_proj_two,
                 labels=None, llm_features=None, mask=None):
        if llm_features is not None:
            # Reference returns only loss2 here; the predictor/BYOL outputs
            # would be discarded, so skip those kernels entirely.
            target_embeddings = jnp.concatenate(
                [target_proj_one, target_proj_two], axis=0)
            online_embeddings = jnp.concatenate([rep_one, rep_two], axis=0)
            return contrastive_loss(target_embeddings, online_embeddings, mask)
        return fused_predictor_byol_loss(rep_one, rep_two,
                                         target_proj_one, target_proj_two,
                                         self.packed)


if __name__ == "__main__":
    B = 8          # batch size
    D = 32         # sentence_embedding_dimension
    key = jax.random.PRNGKey(0)
    k_mod, k1, k2, k3, k4, k5 = jax.random.split(key, 6)

    # Precomputed encoder outputs (stand-ins for SentenceTransformer outputs).
    rep_one = jax.random.normal(k1, (B, D), jnp.float32)
    rep_two = jax.random.normal(k2, (B, D), jnp.float32)
    target_proj_one = jax.random.normal(k3, (B, D), jnp.float32)
    target_proj_two = jax.random.normal(k4, (B, D), jnp.float32)
    labels = jnp.zeros((B,), jnp.int32)
    mask = jax.random.bernoulli(k5, 0.1, (2 * B, 2 * B)).astype(jnp.int32)

    module = BYOLoss2Pallas(D, k_mod)

    # Path 1: llm_features is None -> BYOL loss (scalar mean)
    loss = module(rep_one, rep_two, target_proj_one, target_proj_two,
                  labels=labels, llm_features=None)
    loss = jax.block_until_ready(loss)

    # Path 2: llm_features is not None -> contrastive distillation loss2
    loss2 = module(rep_one, rep_two, target_proj_one, target_proj_two,
                   labels=labels, llm_features=object(), mask=mask)
    loss2 = jax.block_until_ready(loss2)

    assert jnp.isfinite(loss) and jnp.isfinite(loss2)
    print("KERNEL_OK")
</pallas_src>

<mosaic_0001>
module attributes {stable_mosaic.version = 11 : i64} {
  func.func @_fused_predictor_byol_kernel(%arg0: memref<16x128xbf16, #tpu.memory_space<vmem>>, %arg1: memref<16x128xf32, #tpu.memory_space<vmem>>, %arg2: memref<3x128x384xbf16, #tpu.memory_space<vmem>>, %arg3: memref<3x1x384xf32, #tpu.memory_space<vmem>>, %arg4: memref<3x1x384xf32, #tpu.memory_space<vmem>>, %arg5: memref<3x1x384xf32, #tpu.memory_space<vmem>>, %arg6: memref<3x384x384xbf16, #tpu.memory_space<vmem>>, %arg7: memref<3x1x384xf32, #tpu.memory_space<vmem>>, %arg8: memref<3x384x128xbf16, #tpu.memory_space<vmem>>, %arg9: memref<3x1x128xf32, #tpu.memory_space<vmem>>, %arg10: memref<8x128xf32, #tpu.memory_space<vmem>>) attributes {dimension_semantics = [], scalar_prefetch = 0 : i64, scratch_operands = 0 : i64, tpu.core_type = #tpu.core_type<tc>} {
    %c0 = arith.constant 0 : index
    %c0_0 = arith.constant 0 : index
    %0 = vector.load %arg1[%c0, %c0_0] : memref<16x128xf32, #tpu.memory_space<vmem>>, vector<16x128xf32>
    %1 = tpu.iota {dimensions = array<i32: 0>} : vector<16x1xi32>
    %c8_i32 = arith.constant 8 : i32
    %2 = vector.broadcast %c8_i32 : i32 to vector<16x1xi32>
    %3 = arith.cmpi sge, %1, %2 : vector<16x1xi32>
    %c8_i32_1 = arith.constant 8 : i32
    %4 = vector.broadcast %c8_i32_1 : i32 to vector<16x1xi32>
    %5 = arith.subi %1, %4 : vector<16x1xi32>
    %6 = arith.select %3, %5, %1 : vector<16x1xi1>, vector<16x1xi32>
    %c8_i32_2 = arith.constant 8 : i32
    %7 = vector.broadcast %c8_i32_2 : i32 to vector<16x1xi32>
    %8 = arith.cmpi slt, %6, %7 : vector<16x1xi32>
    %9 = arith.extui %8 : vector<16x1xi1> to vector<16x1xi32>
    %10 = arith.sitofp %9 : vector<16x1xi32> to vector<16x1xf32>
    %11 = arith.extui %3 : vector<16x1xi1> to vector<16x1xi32>
    %12 = arith.sitofp %11 : vector<16x1xi32> to vector<16x1xf32>
    %cst = arith.constant 1.000000e+00 : f32
    %13 = vector.broadcast %cst : f32 to vector<16x1xf32>
    %14 = arith.subf %13, %12 : vector<16x1xf32>
    %15 = arith.mulf %10, %14 : vector<16x1xf32>
    %16 = arith.mulf %10, %12 : vector<16x1xf32>
    %c0_3 = arith.constant 0 : index
    %c0_4 = arith.constant 0 : index
    %17 = vector.load %arg0[%c0_3, %c0_4] : memref<16x128xbf16, #tpu.memory_space<vmem>>, vector<16x128xbf16>
    %c0_5 = arith.constant 0 : index
    %c0_6 = arith.constant 0 : index
    %c0_7 = arith.constant 0 : index
    %18 = vector.load %arg2[%c0_5, %c0_6, %c0_7] : memref<3x128x384xbf16, #tpu.memory_space<vmem>>, vector<1x128x384xbf16>
    %19 = vector.shape_cast %18 : vector<1x128x384xbf16> to vector<128x384xbf16>
    %cst_8 = arith.constant dense<0.000000e+00> : vector<16x384xf32>
    %20 = tpu.matmul %17, %19, %cst_8 {dimension_numbers = #tpu.dot_dimension_numbers<[1], [0], [0], [1], [0, 0, 1, 1], [], []>} : vector<16x128xbf16>, vector<128x384xbf16>, vector<16x384xf32> -> vector<16x384xf32>
    %c0_9 = arith.constant 0 : index
    %c0_10 = arith.constant 0 : index
    %c0_11 = arith.constant 0 : index
    %21 = vector.load %arg3[%c0_9, %c0_10, %c0_11] : memref<3x1x384xf32, #tpu.memory_space<vmem>>, vector<1x1x384xf32>
    %22 = vector.shape_cast %21 : vector<1x1x384xf32> to vector<1x384xf32>
    %23 = vector.broadcast %22 : vector<1x384xf32> to vector<16x384xf32>
    %24 = arith.addf %20, %23 : vector<16x384xf32>
    %25 = vector.broadcast %15 : vector<16x1xf32> to vector<16x384xf32>
    %26 = arith.mulf %24, %25 : vector<16x384xf32>
    %cst_12 = arith.constant dense<0.000000e+00> : vector<384xf32>
    %27 = vector.multi_reduction <add>, %26, %cst_12 [0] : vector<16x384xf32> to vector<384xf32>
    %28 = vector.shape_cast %27 : vector<384xf32> to vector<1x384xf32>
    %cst_13 = arith.constant 1.250000e-01 : f32
    %29 = vector.broadcast %cst_13 : f32 to vector<1x384xf32>
    %30 = arith.mulf %28, %29 : vector<1x384xf32>
    %31 = arith.mulf %26, %24 : vector<16x384xf32>
    %cst_14 = arith.constant dense<0.000000e+00> : vector<384xf32>
    %32 = vector.multi_reduction <add>, %31, %cst_14 [0] : vector<16x384xf32> to vector<384xf32>
    %33 = vector.shape_cast %32 : vector<384xf32> to vector<1x384xf32>
    %cst_15 = arith.constant 1.250000e-01 : f32
    %34 = vector.broadcast %cst_15 : f32 to vector<1x384xf32>
    %35 = arith.mulf %33, %34 : vector<1x384xf32>
    %36 = arith.mulf %30, %30 : vector<1x384xf32>
    %37 = arith.subf %35, %36 : vector<1x384xf32>
    %cst_16 = arith.constant 9.99999974E-6 : f32
    %38 = vector.broadcast %cst_16 : f32 to vector<1x384xf32>
    %39 = arith.addf %37, %38 : vector<1x384xf32>
    %40 = math.rsqrt %39 : vector<1x384xf32>
    %41 = vector.broadcast %16 : vector<16x1xf32> to vector<16x384xf32>
    %42 = arith.mulf %24, %41 : vector<16x384xf32>
    %cst_17 = arith.constant dense<0.000000e+00> : vector<384xf32>
    %43 = vector.multi_reduction <add>, %42, %cst_17 [0] : vector<16x384xf32> to vector<384xf32>
    %44 = vector.shape_cast %43 : vector<384xf32> to vector<1x384xf32>
    %cst_18 = arith.constant 1.250000e-01 : f32
    %45 = vector.broadcast %cst_18 : f32 to vector<1x384xf32>
    %46 = arith.mulf %44, %45 : vector<1x384xf32>
    %47 = arith.mulf %42, %24 : vector<16x384xf32>
    %cst_19 = arith.constant dense<0.000000e+00> : vector<384xf32>
    %48 = vector.multi_reduction <add>, %47, %cst_19 [0] : vector<16x384xf32> to vector<384xf32>
    %49 = vector.shape_cast %48 : vector<384xf32> to vector<1x384xf32>
    %cst_20 = arith.constant 1.250000e-01 : f32
    %50 = vector.broadcast %cst_20 : f32 to vector<1x384xf32>
    %51 = arith.mulf %49, %50 : vector<1x384xf32>
    %52 = arith.mulf %46, %46 : vector<1x384xf32>
    %53 = arith.subf %51, %52 : vector<1x384xf32>
    %cst_21 = arith.constant 9.99999974E-6 : f32
    %54 = vector.broadcast %cst_21 : f32 to vector<1x384xf32>
    %55 = arith.addf %53, %54 : vector<1x384xf32>
    %56 = math.rsqrt %55 : vector<1x384xf32>
    %57 = vector.broadcast %14 : vector<16x1xf32> to vector<16x384xf32>
    %58 = vector.broadcast %30 : vector<1x384xf32> to vector<16x384xf32>
    %59 = arith.mulf %57, %58 : vector<16x384xf32>
    %60 = vector.broadcast %12 : vector<16x1xf32> to vector<16x384xf32>
    %61 = vector.broadcast %46 : vector<1x384xf32> to vector<16x384xf32>
    %62 = arith.mulf %60, %61 : vector<16x384xf32>
    %63 = arith.addf %59, %62 : vector<16x384xf32>
    %64 = vector.broadcast %14 : vector<16x1xf32> to vector<16x384xf32>
    %65 = vector.broadcast %40 : vector<1x384xf32> to vector<16x384xf32>
    %66 = arith.mulf %64, %65 : vector<16x384xf32>
    %67 = vector.broadcast %12 : vector<16x1xf32> to vector<16x384xf32>
    %68 = vector.broadcast %56 : vector<1x384xf32> to vector<16x384xf32>
    %69 = arith.mulf %67, %68 : vector<16x384xf32>
    %70 = arith.addf %66, %69 : vector<16x384xf32>
    %71 = arith.subf %24, %63 : vector<16x384xf32>
    %72 = arith.mulf %71, %70 : vector<16x384xf32>
    %c0_22 = arith.constant 0 : index
    %c0_23 = arith.constant 0 : index
    %c0_24 = arith.constant 0 : index
    %73 = vector.load %arg4[%c0_22, %c0_23, %c0_24] : memref<3x1x384xf32, #tpu.memory_space<vmem>>, vector<1x1x384xf32>
    %74 = vector.shape_cast %73 : vector<1x1x384xf32> to vector<1x384xf32>
    %75 = vector.broadcast %74 : vector<1x384xf32> to vector<16x384xf32>
    %76 = arith.mulf %72, %75 : vector<16x384xf32>
    %c0_25 = arith.constant 0 : index
    %c0_26 = arith.constant 0 : index
    %c0_27 = arith.constant 0 : index
    %77 = vector.load %arg5[%c0_25, %c0_26, %c0_27] : memref<3x1x384xf32, #tpu.memory_space<vmem>>, vector<1x1x384xf32>
    %78 = vector.shape_cast %77 : vector<1x1x384xf32> to vector<1x384xf32>
    %79 = vector.broadcast %78 : vector<1x384xf32> to vector<16x384xf32>
    %80 = arith.addf %76, %79 : vector<16x384xf32>
    %cst_28 = arith.constant 0.000000e+00 : f32
    %81 = vector.broadcast %cst_28 : f32 to vector<16x384xf32>
    %82 = arith.maximumf %80, %81 : vector<16x384xf32>
    %83 = arith.truncf %82 : vector<16x384xf32> to vector<16x384xbf16>
    %c0_29 = arith.constant 0 : index
    %c0_30 = arith.constant 0 : index
    %c0_31 = arith.constant 0 : index
    %84 = vector.load %arg6[%c0_29, %c0_30, %c0_31] : memref<3x384x384xbf16, #tpu.memory_space<vmem>>, vector<1x384x384xbf16>
    %85 = vector.shape_cast %84 : vector<1x384x384xbf16> to vector<384x384xbf16>
    %cst_32 = arith.constant dense<0.000000e+00> : vector<16x384xf32>
    %86 = tpu.matmul %83, %85, %cst_32 {dimension_numbers = #tpu.dot_dimension_numbers<[1], [0], [0], [1], [0, 0, 1, 1], [], []>} : vector<16x384xbf16>, vector<384x384xbf16>, vector<16x384xf32> -> vector<16x384xf32>
    %c0_33 = arith.constant 0 : index
    %c0_34 = arith.constant 0 : index
    %c0_35 = arith.constant 0 : index
    %87 = vector.load %arg7[%c0_33, %c0_34, %c0_35] : memref<3x1x384xf32, #tpu.memory_space<vmem>>, vector<1x1x384xf32>
    %88 = vector.shape_cast %87 : vector<1x1x384xf32> to vector<1x384xf32>
    %89 = vector.broadcast %88 : vector<1x384xf32> to vector<16x384xf32>
    %90 = arith.addf %86, %89 : vector<16x384xf32>
    %cst_36 = arith.constant 0.000000e+00 : f32
    %91 = vector.broadcast %cst_36 : f32 to vector<16x384xf32>
    %92 = arith.maximumf %90, %91 : vector<16x384xf32>
    %93 = arith.truncf %92 : vector<16x384xf32> to vector<16x384xbf16>
    %c0_37 = arith.constant 0 : index
    %c0_38 = arith.constant 0 : index
    %c0_39 = arith.constant 0 : index
    %94 = vector.load %arg8[%c0_37, %c0_38, %c0_39] : memref<3x384x128xbf16, #tpu.memory_space<vmem>>, vector<1x384x128xbf16>
    %95 = vector.shape_cast %94 : vector<1x384x128xbf16> to vector<384x128xbf16>
    %cst_40 = arith.constant dense<0.000000e+00> : vector<16x128xf32>
    %96 = tpu.matmul %93, %95, %cst_40 {dimension_numbers = #tpu.dot_dimension_numbers<[1], [0], [0], [1], [0, 0, 1, 1], [], []>} : vector<16x384xbf16>, vector<384x128xbf16>, vector<16x128xf32> -> vector<16x128xf32>
    %c0_41 = arith.constant 0 : index
    %c0_42 = arith.constant 0 : index
    %c0_43 = arith.constant 0 : index
    %97 = vector.load %arg9[%c0_41, %c0_42, %c0_43] : memref<3x1x128xf32, #tpu.memory_space<vmem>>, vector<1x1x128xf32>
    %98 = vector.shape_cast %97 : vector<1x1x128xf32> to vector<1x128xf32>
    %99 = vector.broadcast %98 : vector<1x128xf32> to vector<16x128xf32>
    %100 = arith.addf %96, %99 : vector<16x128xf32>
    %101 = arith.truncf %100 : vector<16x128xf32> to vector<16x128xbf16>
    %c1 = arith.constant 1 : index
    %c0_44 = arith.constant 0 : index
    %c0_45 = arith.constant 0 : index
    %102 = vector.load %arg2[%c1, %c0_44, %c0_45] : memref<3x128x384xbf16, #tpu.memory_space<vmem>>, vector<1x128x384xbf16>
    %103 = vector.shape_cast %102 : vector<1x128x384xbf16> to vector<128x384xbf16>
    %cst_46 = arith.constant dense<0.000000e+00> : vector<16x384xf32>
    %104 = tpu.matmul %101, %103, %cst_46 {dimension_numbers = #tpu.dot_dimension_numbers<[1], [0], [0], [1], [0, 0, 1, 1], [], []>} : vector<16x128xbf16>, vector<128x384xbf16>, vector<16x384xf32> -> vector<16x384xf32>
    %c1_47 = arith.constant 1 : index
    %c0_48 = arith.constant 0 : index
    %c0_49 = arith.constant 0 : index
    %105 = vector.load %arg3[%c1_47, %c0_48, %c0_49] : memref<3x1x384xf32, #tpu.memory_space<vmem>>, vector<1x1x384xf32>
    %106 = vector.shape_cast %105 : vector<1x1x384xf32> to vector<1x384xf32>
    %107 = vector.broadcast %106 : vector<1x384xf32> to vector<16x384xf32>
    %108 = arith.addf %104, %107 : vector<16x384xf32>
    %109 = vector.broadcast %15 : vector<16x1xf32> to vector<16x384xf32>
    %110 = arith.mulf %108, %109 : vector<16x384xf32>
    %cst_50 = arith.constant dense<0.000000e+00> : vector<384xf32>
    %111 = vector.multi_reduction <add>, %110, %cst_50 [0] : vector<16x384xf32> to vector<384xf32>
    %112 = vector.shape_cast %111 : vector<384xf32> to vector<1x384xf32>
    %cst_51 = arith.constant 1.250000e-01 : f32
    %113 = vector.broadcast %cst_51 : f32 to vector<1x384xf32>
    %114 = arith.mulf %112, %113 : vector<1x384xf32>
    %115 = arith.mulf %110, %108 : vector<16x384xf32>
    %cst_52 = arith.constant dense<0.000000e+00> : vector<384xf32>
    %116 = vector.multi_reduction <add>, %115, %cst_52 [0] : vector<16x384xf32> to vector<384xf32>
    %117 = vector.shape_cast %116 : vector<384xf32> to vector<1x384xf32>
    %cst_53 = arith.constant 1.250000e-01 : f32
    %118 = vector.broadcast %cst_53 : f32 to vector<1x384xf32>
    %119 = arith.mulf %117, %118 : vector<1x384xf32>
    %120 = arith.mulf %114, %114 : vector<1x384xf32>
    %121 = arith.subf %119, %120 : vector<1x384xf32>
    %cst_54 = arith.constant 9.99999974E-6 : f32
    %122 = vector.broadcast %cst_54 : f32 to vector<1x384xf32>
    %123 = arith.addf %121, %122 : vector<1x384xf32>
    %124 = math.rsqrt %123 : vector<1x384xf32>
    %125 = vector.broadcast %16 : vector<16x1xf32> to vector<16x384xf32>
    %126 = arith.mulf %108, %125 : vector<16x384xf32>
    %cst_55 = arith.constant dense<0.000000e+00> : vector<384xf32>
    %127 = vector.multi_reduction <add>, %126, %cst_55 [0] : vector<16x384xf32> to vector<384xf32>
    %128 = vector.shape_cast %127 : vector<384xf32> to vector<1x384xf32>
    %cst_56 = arith.constant 1.250000e-01 : f32
    %129 = vector.broadcast %cst_56 : f32 to vector<1x384xf32>
    %130 = arith.mulf %128, %129 : vector<1x384xf32>
    %131 = arith.mulf %126, %108 : vector<16x384xf32>
    %cst_57 = arith.constant dense<0.000000e+00> : vector<384xf32>
    %132 = vector.multi_reduction <add>, %131, %cst_57 [0] : vector<16x384xf32> to vector<384xf32>
    %133 = vector.shape_cast %132 : vector<384xf32> to vector<1x384xf32>
    %cst_58 = arith.constant 1.250000e-01 : f32
    %134 = vector.broadcast %cst_58 : f32 to vector<1x384xf32>
    %135 = arith.mulf %133, %134 : vector<1x384xf32>
    %136 = arith.mulf %130, %130 : vector<1x384xf32>
    %137 = arith.subf %135, %136 : vector<1x384xf32>
    %cst_59 = arith.constant 9.99999974E-6 : f32
    %138 = vector.broadcast %cst_59 : f32 to vector<1x384xf32>
    %139 = arith.addf %137, %138 : vector<1x384xf32>
    %140 = math.rsqrt %139 : vector<1x384xf32>
    %141 = vector.broadcast %14 : vector<16x1xf32> to vector<16x384xf32>
    %142 = vector.broadcast %114 : vector<1x384xf32> to vector<16x384xf32>
    %143 = arith.mulf %141, %142 : vector<16x384xf32>
    %144 = vector.broadcast %12 : vector<16x1xf32> to vector<16x384xf32>
    %145 = vector.broadcast %130 : vector<1x384xf32> to vector<16x384xf32>
    %146 = arith.mulf %144, %145 : vector<16x384xf32>
    %147 = arith.addf %143, %146 : vector<16x384xf32>
    %148 = vector.broadcast %14 : vector<16x1xf32> to vector<16x384xf32>
    %149 = vector.broadcast %124 : vector<1x384xf32> to vector<16x384xf32>
    %150 = arith.mulf %148, %149 : vector<16x384xf32>
    %151 = vector.broadcast %12 : vector<16x1xf32> to vector<16x384xf32>
    %152 = vector.broadcast %140 : vector<1x384xf32> to vector<16x384xf32>
    %153 = arith.mulf %151, %152 : vector<16x384xf32>
    %154 = arith.addf %150, %153 : vector<16x384xf32>
    %155 = arith.subf %108, %147 : vector<16x384xf32>
    %156 = arith.mulf %155, %154 : vector<16x384xf32>
    %c1_60 = arith.constant 1 : index
    %c0_61 = arith.constant 0 : index
    %c0_62 = arith.constant 0 : index
    %157 = vector.load %arg4[%c1_60, %c0_61, %c0_62] : memref<3x1x384xf32, #tpu.memory_space<vmem>>, vector<1x1x384xf32>
    %158 = vector.shape_cast %157 : vector<1x1x384xf32> to vector<1x384xf32>
    %159 = vector.broadcast %158 : vector<1x384xf32> to vector<16x384xf32>
    %160 = arith.mulf %156, %159 : vector<16x384xf32>
    %c1_63 = arith.constant 1 : index
    %c0_64 = arith.constant 0 : index
    %c0_65 = arith.constant 0 : index
    %161 = vector.load %arg5[%c1_63, %c0_64, %c0_65] : memref<3x1x384xf32, #tpu.memory_space<vmem>>, vector<1x1x384xf32>
    %162 = vector.shape_cast %161 : vector<1x1x384xf32> to vector<1x384xf32>
    %163 = vector.broadcast %162 : vector<1x384xf32> to vector<16x384xf32>
    %164 = arith.addf %160, %163 : vector<16x384xf32>
    %cst_66 = arith.constant 0.000000e+00 : f32
    %165 = vector.broadcast %cst_66 : f32 to vector<16x384xf32>
    %166 = arith.maximumf %164, %165 : vector<16x384xf32>
    %167 = arith.truncf %166 : vector<16x384xf32> to vector<16x384xbf16>
    %c1_67 = arith.constant 1 : index
    %c0_68 = arith.constant 0 : index
    %c0_69 = arith.constant 0 : index
    %168 = vector.load %arg6[%c1_67, %c0_68, %c0_69] : memref<3x384x384xbf16, #tpu.memory_space<vmem>>, vector<1x384x384xbf16>
    %169 = vector.shape_cast %168 : vector<1x384x384xbf16> to vector<384x384xbf16>
    %cst_70 = arith.constant dense<0.000000e+00> : vector<16x384xf32>
    %170 = tpu.matmul %167, %169, %cst_70 {dimension_numbers = #tpu.dot_dimension_numbers<[1], [0], [0], [1], [0, 0, 1, 1], [], []>} : vector<16x384xbf16>, vector<384x384xbf16>, vector<16x384xf32> -> vector<16x384xf32>
    %c1_71 = arith.constant 1 : index
    %c0_72 = arith.constant 0 : index
    %c0_73 = arith.constant 0 : index
    %171 = vector.load %arg7[%c1_71, %c0_72, %c0_73] : memref<3x1x384xf32, #tpu.memory_space<vmem>>, vector<1x1x384xf32>
    %172 = vector.shape_cast %171 : vector<1x1x384xf32> to vector<1x384xf32>
    %173 = vector.broadcast %172 : vector<1x384xf32> to vector<16x384xf32>
    %174 = arith.addf %170, %173 : vector<16x384xf32>
    %cst_74 = arith.constant 0.000000e+00 : f32
    %175 = vector.broadcast %cst_74 : f32 to vector<16x384xf32>
    %176 = arith.maximumf %174, %175 : vector<16x384xf32>
    %177 = arith.truncf %176 : vector<16x384xf32> to vector<16x384xbf16>
    %c1_75 = arith.constant 1 : index
    %c0_76 = arith.constant 0 : index
    %c0_77 = arith.constant 0 : index
    %178 = vector.load %arg8[%c1_75, %c0_76, %c0_77] : memref<3x384x128xbf16, #tpu.memory_space<vmem>>, vector<1x384x128xbf16>
    %179 = vector.shape_cast %178 : vector<1x384x128xbf16> to vector<384x128xbf16>
    %cst_78 = arith.constant dense<0.000000e+00> : vector<16x128xf32>
    %180 = tpu.matmul %177, %179, %cst_78 {dimension_numbers = #tpu.dot_dimension_numbers<[1], [0], [0], [1], [0, 0, 1, 1], [], []>} : vector<16x384xbf16>, vector<384x128xbf16>, vector<16x128xf32> -> vector<16x128xf32>
    %c1_79 = arith.constant 1 : index
    %c0_80 = arith.constant 0 : index
    %c0_81 = arith.constant 0 : index
    %181 = vector.load %arg9[%c1_79, %c0_80, %c0_81] : memref<3x1x128xf32, #tpu.memory_space<vmem>>, vector<1x1x128xf32>
    %182 = vector.shape_cast %181 : vector<1x1x128xf32> to vector<1x128xf32>
    %183 = vector.broadcast %182 : vector<1x128xf32> to vector<16x128xf32>
    %184 = arith.addf %180, %183 : vector<16x128xf32>
    %185 = arith.truncf %184 : vector<16x128xf32> to vector<16x128xbf16>
    %c2 = arith.constant 2 : index
    %c0_82 = arith.constant 0 : index
    %c0_83 = arith.constant 0 : index
    %186 = vector.load %arg2[%c2, %c0_82, %c0_83] : memref<3x128x384xbf16, #tpu.memory_space<vmem>>, vector<1x128x384xbf16>
    %187 = vector.shape_cast %186 : vector<1x128x384xbf16> to vector<128x384xbf16>
    %cst_84 = arith.constant dense<0.000000e+00> : vector<16x384xf32>
    %188 = tpu.matmul %185, %187, %cst_84 {dimension_numbers = #tpu.dot_dimension_numbers<[1], [0], [0], [1], [0, 0, 1, 1], [], []>} : vector<16x128xbf16>, vector<128x384xbf16>, vector<16x384xf32> -> vector<16x384xf32>
    %c2_85 = arith.constant 2 : index
    %c0_86 = arith.constant 0 : index
    %c0_87 = arith.constant 0 : index
    %189 = vector.load %arg3[%c2_85, %c0_86, %c0_87] : memref<3x1x384xf32, #tpu.memory_space<vmem>>, vector<1x1x384xf32>
    %190 = vector.shape_cast %189 : vector<1x1x384xf32> to vector<1x384xf32>
    %191 = vector.broadcast %190 : vector<1x384xf32> to vector<16x384xf32>
    %192 = arith.addf %188, %191 : vector<16x384xf32>
    %193 = vector.broadcast %15 : vector<16x1xf32> to vector<16x384xf32>
    %194 = arith.mulf %192, %193 : vector<16x384xf32>
    %cst_88 = arith.constant dense<0.000000e+00> : vector<384xf32>
    %195 = vector.multi_reduction <add>, %194, %cst_88 [0] : vector<16x384xf32> to vector<384xf32>
    %196 = vector.shape_cast %195 : vector<384xf32> to vector<1x384xf32>
    %cst_89 = arith.constant 1.250000e-01 : f32
    %197 = vector.broadcast %cst_89 : f32 to vector<1x384xf32>
    %198 = arith.mulf %196, %197 : vector<1x384xf32>
    %199 = arith.mulf %194, %192 : vector<16x384xf32>
    %cst_90 = arith.constant dense<0.000000e+00> : vector<384xf32>
    %200 = vector.multi_reduction <add>, %199, %cst_90 [0] : vector<16x384xf32> to vector<384xf32>
    %201 = vector.shape_cast %200 : vector<384xf32> to vector<1x384xf32>
    %cst_91 = arith.constant 1.250000e-01 : f32
    %202 = vector.broadcast %cst_91 : f32 to vector<1x384xf32>
    %203 = arith.mulf %201, %202 : vector<1x384xf32>
    %204 = arith.mulf %198, %198 : vector<1x384xf32>
    %205 = arith.subf %203, %204 : vector<1x384xf32>
    %cst_92 = arith.constant 9.99999974E-6 : f32
    %206 = vector.broadcast %cst_92 : f32 to vector<1x384xf32>
    %207 = arith.addf %205, %206 : vector<1x384xf32>
    %208 = math.rsqrt %207 : vector<1x384xf32>
    %209 = vector.broadcast %16 : vector<16x1xf32> to vector<16x384xf32>
    %210 = arith.mulf %192, %209 : vector<16x384xf32>
    %cst_93 = arith.constant dense<0.000000e+00> : vector<384xf32>
    %211 = vector.multi_reduction <add>, %210, %cst_93 [0] : vector<16x384xf32> to vector<384xf32>
    %212 = vector.shape_cast %211 : vector<384xf32> to vector<1x384xf32>
    %cst_94 = arith.constant 1.250000e-01 : f32
    %213 = vector.broadcast %cst_94 : f32 to vector<1x384xf32>
    %214 = arith.mulf %212, %213 : vector<1x384xf32>
    %215 = arith.mulf %210, %192 : vector<16x384xf32>
    %cst_95 = arith.constant dense<0.000000e+00> : vector<384xf32>
    %216 = vector.multi_reduction <add>, %215, %cst_95 [0] : vector<16x384xf32> to vector<384xf32>
    %217 = vector.shape_cast %216 : vector<384xf32> to vector<1x384xf32>
    %cst_96 = arith.constant 1.250000e-01 : f32
    %218 = vector.broadcast %cst_96 : f32 to vector<1x384xf32>
    %219 = arith.mulf %217, %218 : vector<1x384xf32>
    %220 = arith.mulf %214, %214 : vector<1x384xf32>
    %221 = arith.subf %219, %220 : vector<1x384xf32>
    %cst_97 = arith.constant 9.99999974E-6 : f32
    %222 = vector.broadcast %cst_97 : f32 to vector<1x384xf32>
    %223 = arith.addf %221, %222 : vector<1x384xf32>
    %224 = math.rsqrt %223 : vector<1x384xf32>
    %225 = vector.broadcast %14 : vector<16x1xf32> to vector<16x384xf32>
    %226 = vector.broadcast %198 : vector<1x384xf32> to vector<16x384xf32>
    %227 = arith.mulf %225, %226 : vector<16x384xf32>
    %228 = vector.broadcast %12 : vector<16x1xf32> to vector<16x384xf32>
    %229 = vector.broadcast %214 : vector<1x384xf32> to vector<16x384xf32>
    %230 = arith.mulf %228, %229 : vector<16x384xf32>
    %231 = arith.addf %227, %230 : vector<16x384xf32>
    %232 = vector.broadcast %14 : vector<16x1xf32> to vector<16x384xf32>
    %233 = vector.broadcast %208 : vector<1x384xf32> to vector<16x384xf32>
    %234 = arith.mulf %232, %233 : vector<16x384xf32>
    %235 = vector.broadcast %12 : vector<16x1xf32> to vector<16x384xf32>
    %236 = vector.broadcast %224 : vector<1x384xf32> to vector<16x384xf32>
    %237 = arith.mulf %235, %236 : vector<16x384xf32>
    %238 = arith.addf %234, %237 : vector<16x384xf32>
    %239 = arith.subf %192, %231 : vector<16x384xf32>
    %240 = arith.mulf %239, %238 : vector<16x384xf32>
    %c2_98 = arith.constant 2 : index
    %c0_99 = arith.constant 0 : index
    %c0_100 = arith.constant 0 : index
    %241 = vector.load %arg4[%c2_98, %c0_99, %c0_100] : memref<3x1x384xf32, #tpu.memory_space<vmem>>, vector<1x1x384xf32>
    %242 = vector.shape_cast %241 : vector<1x1x384xf32> to vector<1x384xf32>
    %243 = vector.broadcast %242 : vector<1x384xf32> to vector<16x384xf32>
    %244 = arith.mulf %240, %243 : vector<16x384xf32>
    %c2_101 = arith.constant 2 : index
    %c0_102 = arith.constant 0 : index
    %c0_103 = arith.constant 0 : index
    %245 = vector.load %arg5[%c2_101, %c0_102, %c0_103] : memref<3x1x384xf32, #tpu.memory_space<vmem>>, vector<1x1x384xf32>
    %246 = vector.shape_cast %245 : vector<1x1x384xf32> to vector<1x384xf32>
    %247 = vector.broadcast %246 : vector<1x384xf32> to vector<16x384xf32>
    %248 = arith.addf %244, %247 : vector<16x384xf32>
    %cst_104 = arith.constant 0.000000e+00 : f32
    %249 = vector.broadcast %cst_104 : f32 to vector<16x384xf32>
    %250 = arith.maximumf %248, %249 : vector<16x384xf32>
    %251 = arith.truncf %250 : vector<16x384xf32> to vector<16x384xbf16>
    %c2_105 = arith.constant 2 : index
    %c0_106 = arith.constant 0 : index
    %c0_107 = arith.constant 0 : index
    %252 = vector.load %arg6[%c2_105, %c0_106, %c0_107] : memref<3x384x384xbf16, #tpu.memory_space<vmem>>, vector<1x384x384xbf16>
    %253 = vector.shape_cast %252 : vector<1x384x384xbf16> to vector<384x384xbf16>
    %cst_108 = arith.constant dense<0.000000e+00> : vector<16x384xf32>
    %254 = tpu.matmul %251, %253, %cst_108 {dimension_numbers = #tpu.dot_dimension_numbers<[1], [0], [0], [1], [0, 0, 1, 1], [], []>} : vector<16x384xbf16>, vector<384x384xbf16>, vector<16x384xf32> -> vector<16x384xf32>
    %c2_109 = arith.constant 2 : index
    %c0_110 = arith.constant 0 : index
    %c0_111 = arith.constant 0 : index
    %255 = vector.load %arg7[%c2_109, %c0_110, %c0_111] : memref<3x1x384xf32, #tpu.memory_space<vmem>>, vector<1x1x384xf32>
    %256 = vector.shape_cast %255 : vector<1x1x384xf32> to vector<1x384xf32>
    %257 = vector.broadcast %256 : vector<1x384xf32> to vector<16x384xf32>
    %258 = arith.addf %254, %257 : vector<16x384xf32>
    %cst_112 = arith.constant 0.000000e+00 : f32
    %259 = vector.broadcast %cst_112 : f32 to vector<16x384xf32>
    %260 = arith.maximumf %258, %259 : vector<16x384xf32>
    %261 = arith.truncf %260 : vector<16x384xf32> to vector<16x384xbf16>
    %c2_113 = arith.constant 2 : index
    %c0_114 = arith.constant 0 : index
    %c0_115 = arith.constant 0 : index
    %262 = vector.load %arg8[%c2_113, %c0_114, %c0_115] : memref<3x384x128xbf16, #tpu.memory_space<vmem>>, vector<1x384x128xbf16>
    %263 = vector.shape_cast %262 : vector<1x384x128xbf16> to vector<384x128xbf16>
    %cst_116 = arith.constant dense<0.000000e+00> : vector<16x128xf32>
    %264 = tpu.matmul %261, %263, %cst_116 {dimension_numbers = #tpu.dot_dimension_numbers<[1], [0], [0], [1], [0, 0, 1, 1], [], []>} : vector<16x384xbf16>, vector<384x128xbf16>, vector<16x128xf32> -> vector<16x128xf32>
    %c2_117 = arith.constant 2 : index
    %c0_118 = arith.constant 0 : index
    %c0_119 = arith.constant 0 : index
    %265 = vector.load %arg9[%c2_117, %c0_118, %c0_119] : memref<3x1x128xf32, #tpu.memory_space<vmem>>, vector<1x1x128xf32>
    %266 = vector.shape_cast %265 : vector<1x1x128xf32> to vector<1x128xf32>
    %267 = vector.broadcast %266 : vector<1x128xf32> to vector<16x128xf32>
    %268 = arith.addf %264, %267 : vector<16x128xf32>
    %269 = arith.mulf %268, %268 : vector<16x128xf32>
    %cst_120 = arith.constant dense<0.000000e+00> : vector<16xf32>
    %270 = vector.multi_reduction <add>, %269, %cst_120 [1] : vector<16x128xf32> to vector<16xf32>
    %271 = vector.shape_cast %270 : vector<16xf32> to vector<16x1xf32>
    %cst_121 = arith.constant 1.000000e-24 : f32
    %272 = vector.broadcast %cst_121 : f32 to vector<16x1xf32>
    %273 = arith.maximumf %271, %272 : vector<16x1xf32>
    %274 = math.rsqrt %273 : vector<16x1xf32>
    %275 = vector.broadcast %274 : vector<16x1xf32> to vector<16x128xf32>
    %276 = arith.mulf %268, %275 : vector<16x128xf32>
    %277 = arith.mulf %0, %0 : vector<16x128xf32>
    %cst_122 = arith.constant dense<0.000000e+00> : vector<16xf32>
    %278 = vector.multi_reduction <add>, %277, %cst_122 [1] : vector<16x128xf32> to vector<16xf32>
    %279 = vector.shape_cast %278 : vector<16xf32> to vector<16x1xf32>
    %cst_123 = arith.constant 1.000000e-24 : f32
    %280 = vector.broadcast %cst_123 : f32 to vector<16x1xf32>
    %281 = arith.maximumf %279, %280 : vector<16x1xf32>
    %282 = math.rsqrt %281 : vector<16x1xf32>
    %283 = vector.broadcast %282 : vector<16x1xf32> to vector<16x128xf32>
    %284 = arith.mulf %0, %283 : vector<16x128xf32>
    %285 = arith.mulf %276, %284 : vector<16x128xf32>
    %cst_124 = arith.constant dense<0.000000e+00> : vector<16xf32>
    %286 = vector.multi_reduction <add>, %285, %cst_124 [1] : vector<16x128xf32> to vector<16xf32>
    %287 = vector.shape_cast %286 : vector<16xf32> to vector<16x1xf32>
    %cst_125 = arith.constant 2.000000e+00 : f32
    %288 = vector.broadcast %cst_125 : f32 to vector<16x1xf32>
    %289 = arith.mulf %288, %287 : vector<16x1xf32>
    %cst_126 = arith.constant 2.000000e+00 : f32
    %290 = vector.broadcast %cst_126 : f32 to vector<16x1xf32>
    %291 = arith.subf %290, %289 : vector<16x1xf32>
    %292 = arith.mulf %291, %10 : vector<16x1xf32>
    %cst_127 = arith.constant dense<0.000000e+00> : vector<1xf32>
    %293 = vector.multi_reduction <add>, %292, %cst_127 [0] : vector<16x1xf32> to vector<1xf32>
    %294 = vector.shape_cast %293 : vector<1xf32> to vector<1x1xf32>
    %295 = vector.shape_cast %294 : vector<1x1xf32> to vector<1x1xf32>
    %296 = vector.broadcast %295 : vector<1x1xf32> to vector<8x128xf32>
    %c0_128 = arith.constant 0 : index
    %c0_129 = arith.constant 0 : index
    %297 = vector.load %arg10[%c0_128, %c0_129] : memref<8x128xf32, #tpu.memory_space<vmem>>, vector<8x128xf32>
    tpu.vector_store %arg10[%c0_128, %c0_129], %296 {strides = array<i32>} : memref<8x128xf32, #tpu.memory_space<vmem>>, vector<8x128xf32>,
    return
  }
}

</mosaic_0001>

<bundles_post_ra>
// kernel: tpu_custom_call.1
= control target key start
LH: loop header
LB: loop body
LE: loop exit
PB: predicated region body
PF: predicated region fallthrough
CT: control target
= control target key end

     0   :  { %15 = vsyncpa [#allocation3], 0  ;;  %s6650_s0 = inlined_call_operand.hbm [shape: bf16[16,128], index: 0, kind: input, shape index: {}]   ;;  %s6651_s1 = inlined_call_operand.hbm [shape: f32[16,128], index: 1, kind: input, shape index: {}]   ;;  %s6652_s2 = inlined_call_operand.hbm [shape: bf16[3,128,384], index: 2, kind: input, shape index: {}]   ;;  %s6653_s3 = inlined_call_operand.hbm [shape: f32[3,1,384], index: 3, kind: input, shape index: {}]   ;;  %s6654_s4 = inlined_call_operand.hbm [shape: f32[3,1,384], index: 4, kind: input, shape index: {}]   ;;  %s6655_s5 = inlined_call_operand.vmem [shape: f32[3,1,384], index: 5, kind: input, shape index: {}]   ;;  %s6656_s6 = inlined_call_operand.hbm [shape: bf16[3,384,384], index: 6, kind: input, shape index: {}]   ;;  %s6657_s7 = inlined_call_operand.hbm [shape: f32[3,1,384], index: 7, kind: input, shape index: {}]   ;;  %s6658_s8 = inlined_call_operand.hbm [shape: bf16[3,384,128], index: 8, kind: input, shape index: {}]   ;;  %s6659_s9 = inlined_call_operand.vmem [shape: f32[3,1,128], index: 9, kind: input, shape index: {}]   ;;  %s6660_s10 = inlined_call_operand.hbm [shape: f32[8,128], index: 10, kind: output, shape index: {}]  }
   0x1   :  { %16 = vsyncpa [#allocation6], 0 }
   0x2   :  { %17 = vsyncpa [#allocation9], 0 }
   0x3   :  { %18 = vsyncpa [#allocation12], 0 }
   0x4   :  { %19 = vsyncpa [#allocation15], 0 }
   0x5   :  { %20 = vsyncpa [#allocation4], 0  ;;  %s6125_s13 = smov [#allocation5]  }
   0x6   :  { %s38_s14 = sshll.u32 %s6125_s13, 4  ;;  %s39_s14 = int_to_ptr.vmem [resolvable:$true] %s38_s14 }
   0x7   :  { %s5941_s15 = scalar_lea.vmem %s39_s14, 256  ;;  %p5946_p1 = scmp.lt.s32.totalorder %s39_s14, %s39_s14 }
   0x8   :  { %p5942_p0 = scmp.ne.s32.totalorder %s39_s14, %s5941_s15  ;;  %p5947_p2 = scmp.lt.s32.totalorder %s5941_s15, %s5941_s15 }
   0xa   :  { %p5948_p3 = por %p5947_p2, %p5946_p1 }
   0xc   :  { %p5949_p4 = pnand %p5948_p3, %p5942_p0 }
   0xe   :  { %5952 = shalt.err (!%p5949_p4)
}
   0xf   :  { %s6126_s16 = smov 128   ;;  %s6127_s17 = smov 8  }
  0x10   :  { %44 = dma.hbm_to_vmem [thread:$0]  %s6651_s1, 256, %s39_s14, [#allocation6], %s6126_s16, %s6126_s16, %s6127_s17  }
  0x11   :  { %s6128_s20 = smov [#allocation8]  }
  0x12   :  { %s62_s21 = sshll.u32 %s6128_s20, 4  ;;  %s63_s21 = int_to_ptr.vmem [resolvable:$true] %s62_s21 }
  0x13   :  { %s5961_s22 = scalar_lea.vmem %s63_s21, 144  ;;  %s5965_s23 = scalar_lea.vmem %s63_s21, 160 }
  0x14   :  { %p5962_p5 = scmp.ne.s32.totalorder %s63_s21, %s5961_s22  ;;  %p5966_p6 = scmp.lt.s32.totalorder %s63_s21, %s63_s21 }
  0x15   :  { %p5967_p7 = scmp.lt.s32.totalorder %s5965_s23, %s5961_s22 }
  0x17   :  { %p5968_p8 = por %p5967_p7, %p5966_p6 }
  0x19   :  { %p5969_p9 = pnand %p5968_p8, %p5962_p5 }
  0x1b   :  { %5972 = shalt.err (!%p5969_p9)
}
  0x1c   :  { %s6129_s24 = smov 48   ;;  %s6130_s25 = smov 3  }
  0x1d   :  { %68 = dma.hbm_to_vmem [thread:$0]  %s6653_s3, 144, %s63_s21, [#allocation9], %s6129_s24, %s6129_s24, %s6130_s25  }
  0x1e   :  { %s6131_s1 = smov [#allocation11]   ;;  %s6132_s29 = smov [#allocation2]  }
  0x1f   :  { %s88_s28 = sshll.u32 %s6131_s1, 4  ;;  %s26_s30 = sshll.u32 %s6132_s29, 4  ;;  %s89_s28 = int_to_ptr.vmem [resolvable:$true] %s88_s28  ;;  %s27_s30 = int_to_ptr.vmem [resolvable:$true] %s26_s30 }
  0x20   :  { %s5981_s11 = scalar_lea.vmem %s89_s28, 27648  ;;  %p5986_p11 = scmp.lt.s32.totalorder %s89_s28, %s89_s28 }
  0x21   :  { %p5982_p10 = scmp.ne.s32.totalorder %s89_s28, %s5981_s11  ;;  %p5987_p12 = scmp.lt.s32.totalorder %s5981_s11, %s5981_s11 }
  0x23   :  { %p5988_p13 = por %p5987_p12, %p5986_p11 }
  0x25   :  { %p5989_p0 = pnand %p5988_p13, %p5982_p10 }
  0x27   :  { %5992 = shalt.err (!%p5989_p0)
}
  0x28   :  { %s6133_s12 = smov 192   ;;  %s6134_s13 = smov 12  }
  0x29   :  { %94 = dma.hbm_to_vmem [thread:$0]  %s6656_s6, 27648, %s89_s28, [#allocation12], %s6133_s12, %s6133_s12, %s6134_s13  }
  0x2a   :  { %s6001_s3 = scalar_lea.vmem %s27_s30, 128  ;;  %p6006_p2 = scmp.lt.s32.totalorder %s27_s30, %s27_s30 }
  0x2b   :  { %p6002_p1 = scmp.ne.s32.totalorder %s27_s30, %s6001_s3  ;;  %p6007_p3 = scmp.lt.s32.totalorder %s6001_s3, %s6001_s3 }
  0x2d   :  { %p6008_p4 = por %p6007_p3, %p6006_p2 }
  0x2f   :  { %p6009_p5 = pnand %p6008_p4, %p6002_p1 }
  0x31   :  { %6012 = shalt.err (!%p6009_p5)
}
  0x32   :  { %s6135_s16 = smov 64   ;;  %s6136_s17 = smov 4  }
  0x33   :  { %32 = dma.hbm_to_vmem [thread:$0]  %s6650_s0, 128, %s27_s30, [#allocation3], %s6135_s16, %s6135_s16, %s6136_s17  }
  0x34   :  { %s6137_s20 = smov [#allocation7]   ;;  %s6138_s22 = smov [#allocation10]  }
  0x35   :  { %s50_s21 = sshll.u32 %s6137_s20, 4  ;;  %s74_s6 = sshll.u32 %s6138_s22, 4  ;;  %s51_s21 = int_to_ptr.vmem [resolvable:$true] %s50_s21  ;;  %s75_s6 = int_to_ptr.vmem [resolvable:$true] %s74_s6 }
  0x36   :  { %s6021_s23 = scalar_lea.vmem %s51_s21, 9216  ;;  %p6026_p7 = scmp.lt.s32.totalorder %s51_s21, %s51_s21 }
  0x37   :  { %p6022_p6 = scmp.ne.s32.totalorder %s51_s21, %s6021_s23  ;;  %p6027_p8 = scmp.lt.s32.totalorder %s6021_s23, %s6021_s23 }
  0x39   :  { %p6028_p9 = por %p6027_p8, %p6026_p7 }
  0x3b   :  { %p6029_p10 = pnand %p6028_p9, %p6022_p6 }
  0x3d   :  { %6032 = shalt.err (!%p6029_p10)
}
  0x3e   :  { %56 = dma.hbm_to_vmem [thread:$0]  %s6652_s2, 9216, %s51_s21, [#allocation6], %s6133_s12, %s6133_s12, %s6134_s13  }
  0x3f   :  { %s6041_s1 = scalar_lea.vmem %s75_s6, 144  ;;  %s6045_s0 = scalar_lea.vmem %s75_s6, 160 }
  0x40   :  { %p6042_p11 = scmp.ne.s32.totalorder %s75_s6, %s6041_s1  ;;  %p6046_p12 = scmp.lt.s32.totalorder %s75_s6, %s75_s6 }
  0x41   :  { %p6047_p13 = scmp.lt.s32.totalorder %s6045_s0, %s6041_s1 }
  0x43   :  { %p6048_p0 = por %p6047_p13, %p6046_p12 }
  0x45   :  { %p6049_p1 = pnand %p6048_p0, %p6042_p11 }
  0x47   :  { %6052 = shalt.err (!%p6049_p1)
}
  0x48   :  { %80 = dma.hbm_to_vmem [thread:$0]  %s6654_s4, 144, %s75_s6, [#allocation9], %s6129_s24, %s6129_s24, %s6130_s25  }
  0x49   :  { %s6139_s30 = smov [#allocation13]   ;;  %s6140_s14 = smov [#allocation14]  }
  0x4a   :  { %s100_s11 = sshll.u32 %s6139_s30, 4  ;;  %s112_s15 = sshll.u32 %s6140_s14, 4  ;;  %s101_s11 = int_to_ptr.vmem [resolvable:$true] %s100_s11  ;;  %s113_s15 = int_to_ptr.vmem [resolvable:$true] %s112_s15 }
  0x4b   :  { %s6061_s2 = scalar_lea.vmem %s101_s11, 144  ;;  %s6065_s12 = scalar_lea.vmem %s101_s11, 160 }
  0x4c   :  { %p6062_p2 = scmp.ne.s32.totalorder %s101_s11, %s6061_s2  ;;  %p6066_p3 = scmp.lt.s32.totalorder %s101_s11, %s101_s11 }
  0x4d   :  { %p6067_p4 = scmp.lt.s32.totalorder %s6065_s12, %s6061_s2 }
  0x4f   :  { %p6068_p5 = por %p6067_p4, %p6066_p3 }
  0x51   :  { %p6069_p6 = pnand %p6068_p5, %p6062_p2 }
  0x53   :  { %6072 = shalt.err (!%p6069_p6)
}
  0x54   :  { %106 = dma.hbm_to_vmem [thread:$0]  %s6657_s7, 144, %s101_s11, [#allocation12], %s6129_s24, %s6129_s24, %s6130_s25  }
  0x55   :  { %s6081_s4 = scalar_lea.vmem %s113_s15, 9216  ;;  %p6086_p8 = scmp.lt.s32.totalorder %s113_s15, %s113_s15 }
  0x56   :  { %p6082_p7 = scmp.ne.s32.totalorder %s113_s15, %s6081_s4  ;;  %p6087_p9 = scmp.lt.s32.totalorder %s6081_s4, %s6081_s4 }
  0x58   :  { %p6088_p10 = por %p6087_p9, %p6086_p8 }
  0x5a   :  { %p6089_p11 = pnand %p6088_p10, %p6082_p7 }
  0x5c   :  { %6092 = shalt.err (!%p6089_p11)
}
  0x5d   :  { %118 = dma.hbm_to_vmem [thread:$0]  %s6658_s8, 9216, %s113_s15, [#allocation15], %s6135_s16, %s6135_s16, %s6136_s17  }
  0x5e   :  { %6113 = dma.done.wait [#allocation3], 128  }
  0x5f   :  { %6114 = vsyncadd [#allocation3], 4294967168 }
  0x60   :  { %6115 = dma.done.wait [#allocation6], 9472  }
  0x61   :  { %6116 = vsyncadd [#allocation6], 4294957824 }
  0x62   :  { %6117 = dma.done.wait [#allocation9], 288  }
  0x63   :  { %6118 = vsyncadd [#allocation9], 4294967008 }
  0x64   :  { %6119 = dma.done.wait [#allocation12], 27792  }
  0x65   :  { %6120 = vsyncadd [#allocation12], 4294939504 }
  0x66   :  { %6121 = dma.done.wait [#allocation15], 9216  }
  0x67   :  { %6122 = vsyncadd [#allocation15], 4294958080  ;;  %v6141_v0 = vmov 0.0   ;;  %vm6142_vm0 = vmmov 0   ;;  %v6143_v1 = vmov 0   ;;  %v5464_v27 = vld [vmem:[#allocation2] sm:$0xff]  }
  0x68   :  { %5232 = vmatprep.subr.bf16.mxu1 %v6141_v0  ;;  %5248 = vmatprep.mubr.msk.bf16.mxu1 %vm6142_vm0, %v6141_v0  ;;  %v5432_v2 = vld [vmem:[#allocation7 + $0xac] ss:$12 sps:$4 sm:$0xff]   ;;  %v5434_v3 = vld [vmem:[#allocation7 + $0xb0] ss:$12 sps:$4 sm:$0xff]   ;;  %v5435_v4 = vld [vmem:[#allocation7 + $0xa8] ss:$12 sps:$4 sm:$0xff]  }
  0x69   :  { %389 = vmatprep.mubr.bf16.mxu0 %v6143_v1  ;;  %357 = vmatprep.subr.bf16.mxu0 %v5432_v2  ;;  %v5436_v5 = vld [vmem:[#allocation7 + $0x94] ss:$12 sps:$4 sm:$0xff]   ;;  %v5438_v6 = vld [vmem:[#allocation7 + $0x98] ss:$12 sps:$4 sm:$0xff]   ;;  %v5439_v7 = vld [vmem:[#allocation7 + $0x90] ss:$12 sps:$4 sm:$0xff]  }
  0x6a   :  { %5233 = vmatpush3.bf16.msra.mxu1 %v5434_v3  ;;  %358 = vmatpush1.bf16.msra.mxu0 %v5435_v4  ;;  %v5440_v8 = vld [vmem:[#allocation7 + $0x7c] ss:$12 sps:$4 sm:$0xff]   ;;  %v5442_v9 = vld [vmem:[#allocation7 + $0x80] ss:$12 sps:$4 sm:$0xff]   ;;  %v5443_v10 = vld [vmem:[#allocation7 + $0x78] ss:$12 sps:$4 sm:$0xff]  }
  0x6b   :  { %5234 = vmatprep.subr.bf16.mxu1 %v6141_v0  ;;  %359 = vmatprep.subr.bf16.mxu0 %v5436_v5  ;;  %v5444_v11 = vld [vmem:[#allocation7 + $0x64] ss:$12 sps:$4 sm:$0xff]   ;;  %v5446_v12 = vld [vmem:[#allocation7 + $0x68] ss:$12 sps:$4 sm:$0xff]   ;;  %v5447_v13 = vld [vmem:[#allocation7 + $0x60] ss:$12 sps:$4 sm:$0xff]  }
  0x6c   :  { %v5448_v14 = vld [vmem:[#allocation7 + $0x4c] ss:$12 sps:$4 sm:$0xff]   ;;  %v5450_v15 = vld [vmem:[#allocation7 + $0x50] ss:$12 sps:$4 sm:$0xff]   ;;  %v5451_v16 = vld [vmem:[#allocation7 + $0x48] ss:$12 sps:$4 sm:$0xff]  }
  0x6d   :  { %v5452_v17 = vld [vmem:[#allocation7 + $0x34] ss:$12 sps:$4 sm:$0xff]   ;;  %v5454_v18 = vld [vmem:[#allocation7 + $0x38] ss:$12 sps:$4 sm:$0xff]   ;;  %v5455_v19 = vld [vmem:[#allocation7 + $0x30] ss:$12 sps:$4 sm:$0xff]  }
  0x6e   :  { %5235 = vmatpush3.bf16.msra.mxu1 %v5438_v6  ;;  %360 = vmatpush1.bf16.msra.mxu0 %v5439_v7  ;;  %v5456_v20 = vld [vmem:[#allocation7 + $0x1c] ss:$12 sps:$4 sm:$0xff]   ;;  %v5458_v21 = vld [vmem:[#allocation7 + $0x20] ss:$12 sps:$4 sm:$0xff]   ;;  %v5459_v22 = vld [vmem:[#allocation7 + $0x18] ss:$12 sps:$4 sm:$0xff]  }
  0x6f   :  { %5236 = vmatprep.subr.bf16.mxu1 %v6141_v0  ;;  %361 = vmatprep.subr.bf16.mxu0 %v5440_v8  ;;  %v5460_v23 = vld [vmem:[#allocation7 + $0x4] ss:$12 sps:$4 sm:$0xff]   ;;  %v5462_v24 = vld [vmem:[#allocation7 + $0x8] ss:$12 sps:$4 sm:$0xff]   ;;  %v5463_v25 = vld [vmem:[#allocation7] ss:$12 sps:$4 sm:$0xff]  }
  0x70   :  { %v5467_v26 = vld [vmem:[#allocation11 + $0xac] ss:$12 sps:$4 sm:$0xff]   ;;  %v5465_v28 = vld [vmem:[#allocation11 + $0xa8] ss:$12 sps:$4 sm:$0xff]   ;;  %v5468_v30 = vld [vmem:[#allocation11 + $0x90] ss:$12 sps:$4 sm:$0xff]  }
  0x71   :  { %v5470_v29 = vld [vmem:[#allocation11 + $0x94] ss:$12 sps:$4 sm:$0xff]   ;;  %v5473_v31 = vld [vmem:[#allocation11 + $0x7c] ss:$12 sps:$4 sm:$0xff]   ;;  %v5471_v32 = vld [vmem:[#allocation11 + $0x78] ss:$12 sps:$4 sm:$0xff]  }
  0x72   :  { %5237 = vmatpush3.bf16.msra.mxu1 %v5442_v9  ;;  %362 = vmatpush1.bf16.msra.mxu0 %v5443_v10  ;;  %v5476_v33 = vld [vmem:[#allocation11 + $0x64] ss:$12 sps:$4 sm:$0xff]   ;;  %v5474_v34 = vld [vmem:[#allocation11 + $0x60] ss:$12 sps:$4 sm:$0xff]   ;;  %v5477_v36 = vld [vmem:[#allocation11 + $0x48] ss:$12 sps:$4 sm:$0xff]  }
  0x73   :  { %5238 = vmatprep.subr.bf16.mxu1 %v6141_v0  ;;  %363 = vmatprep.subr.bf16.mxu0 %v5444_v11  ;;  %v5479_v35 = vld [vmem:[#allocation11 + $0x4c] ss:$12 sps:$4 sm:$0xff]   ;;  %v5482_v37 = vld [vmem:[#allocation11 + $0x34] ss:$12 sps:$4 sm:$0xff]   ;;  %v5480_v38 = vld [vmem:[#allocation11 + $0x30] ss:$12 sps:$4 sm:$0xff]  }
  0x74   :  { %v5485_v39 = vld [vmem:[#allocation11 + $0x1c] ss:$12 sps:$4 sm:$0xff]   ;;  %v5483_v40 = vld [vmem:[#allocation11 + $0x18] ss:$12 sps:$4 sm:$0xff]   ;;  %v5486_v43 = vld [vmem:[#allocation11] ss:$12 sps:$4 sm:$0xff]  }
  0x75   :  { %v5488_v41 = vld [vmem:[#allocation11 + $0x4] ss:$12 sps:$4 sm:$0xff]   ;;  %v5491_v42 = vld [vmem:[#allocation11 + $0x22c] ss:$12 sps:$4 sm:$0xff]   ;;  %v5489_v44 = vld [vmem:[#allocation11 + $0x228] ss:$12 sps:$4 sm:$0xff]  }
  0x76   :  { %5239 = vmatpush3.bf16.msra.mxu1 %v5446_v12  ;;  %364 = vmatpush1.bf16.msra.mxu0 %v5447_v13  ;;  %v5494_v45 = vld [vmem:[#allocation11 + $0x16c] ss:$12 sps:$4 sm:$0xff]   ;;  %v5492_v46 = vld [vmem:[#allocation11 + $0x168] ss:$12 sps:$4 sm:$0xff]   ;;  %v5495_v47 = vld [vmem:[#allocation11 + $0x210] ss:$12 sps:$4 sm:$0xff]  }
  0x77   :  { %5240 = vmatprep.subr.bf16.mxu1 %v6141_v0  ;;  %365 = vmatprep.subr.bf16.mxu0 %v5448_v14  ;;  %v5497_v48 = vld [vmem:[#allocation11 + $0x214] ss:$12 sps:$4 sm:$0xff]   ;;  %v5503_v50 = vld [vmem:[#allocation11 + $0x1fc] ss:$12 sps:$4 sm:$0xff]   ;;  %v5501_v52 = vld [vmem:[#allocation11 + $0x1f8] ss:$12 sps:$4 sm:$0xff]   ;;  %v208_v14 = vlaneseq }
  0x78   :  { %v5500_v49 = vld [vmem:[#allocation11 + $0x154] ss:$12 sps:$4 sm:$0xff]   ;;  %v5498_v51 = vld [vmem:[#allocation11 + $0x150] ss:$12 sps:$4 sm:$0xff]   ;;  %v5504_v55 = vld [vmem:[#allocation11 + $0x138] ss:$12 sps:$4 sm:$0xff]  }
  0x79   :  { %v5506_v53 = vld [vmem:[#allocation11 + $0x13c] ss:$12 sps:$4 sm:$0xff]   ;;  %v5509_v54 = vld [vmem:[#allocation11 + $0x1e4] ss:$12 sps:$4 sm:$0xff]   ;;  %v5507_v56 = vld [vmem:[#allocation11 + $0x1e0] ss:$12 sps:$4 sm:$0xff]  }
  0x7a   :  { %5241 = vmatpush3.bf16.msra.mxu1 %v5450_v15  ;;  %366 = vmatpush1.bf16.msra.mxu0 %v5451_v16  ;;  %v5512_v57 = vld [vmem:[#allocation11 + $0x124] ss:$12 sps:$4 sm:$0xff]   ;;  %v5515_v58 = vld [vmem:[#allocation11 + $0x1cc] ss:$12 sps:$4 sm:$0xff]   ;;  %v5513_v60 = vld [vmem:[#allocation11 + $0x1c8] ss:$12 sps:$4 sm:$0xff]  }
  0x7b   :  { %5242 = vmatprep.subr.bf16.mxu1 %v6141_v0  ;;  %367 = vmatprep.subr.bf16.mxu0 %v5452_v17  ;;  %v5510_v59 = vld [vmem:[#allocation11 + $0x120] ss:$12 sps:$4 sm:$0xff]   ;;  %v5516_v63 = vld [vmem:[#allocation11 + $0x108] ss:$12 sps:$4 sm:$0xff]   ;;  %v5519_v2 = vld [vmem:[#allocation11 + $0x1b0] ss:$12 sps:$4 sm:$0xff]  }
  0x7c   :  { %v5518_v61 = vld [vmem:[#allocation11 + $0x10c] ss:$12 sps:$4 sm:$0xff]   ;;  %v5521_v62 = vld [vmem:[#allocation11 + $0x1b4] ss:$12 sps:$4 sm:$0xff]   ;;  %v5527_v4 = vld [vmem:[#allocation11 + $0x19c] ss:$12 sps:$4 sm:$0xff]  }
  0x7d   :  { %v5524_v3 = vld [vmem:[#allocation11 + $0xf4] ss:$12 sps:$4 sm:$0xff]   ;;  %v5522_v5 = vld [vmem:[#allocation11 + $0xf0] ss:$12 sps:$4 sm:$0xff]   ;;  %v5525_v6 = vld [vmem:[#allocation11 + $0x198] ss:$12 sps:$4 sm:$0xff]  }
  0x7e   :  { %5243 = vmatpush3.bf16.msra.mxu1 %v5454_v18  ;;  %368 = vmatpush1.bf16.msra.mxu0 %v5455_v19  ;;  %v5530_v7 = vld [vmem:[#allocation11 + $0xdc] ss:$12 sps:$4 sm:$0xff]   ;;  %v5533_v8 = vld [vmem:[#allocation11 + $0x184] ss:$12 sps:$4 sm:$0xff]   ;;  %v5531_v10 = vld [vmem:[#allocation11 + $0x180] ss:$12 sps:$4 sm:$0xff]  }
  0x7f   :  { %5244 = vmatprep.subr.bf16.mxu1 %v6141_v0  ;;  %369 = vmatprep.subr.bf16.mxu0 %v5456_v20  ;;  %v5528_v9 = vld [vmem:[#allocation11 + $0xd8] ss:$12 sps:$4 sm:$0xff]   ;;  %v5537_v12 = vld [vmem:[#allocation11 + $0x170] ss:$12 sps:$4 sm:$0xff]   ;;  %v5534_v13 = vld [vmem:[#allocation11 + $0xc0] ss:$12 sps:$4 sm:$0xff]  }
  0x80   :  { %v5536_v11 = vld [vmem:[#allocation11 + $0xc4] ss:$12 sps:$4 sm:$0xff]   ;;  %v209_v15 = vshrl.u32 %v208_v14, 7  ;;  %v206_v17 = vld [vmem:[#allocation8] sm:$0x7] }
  0x82   :  { %5245 = vmatpush3.bf16.msra.mxu1 %v5458_v21  ;;  %370 = vmatpush1.bf16.msra.mxu0 %v5459_v22  ;;  %v6252_v16 = vsub.s32 2, %v209_v15  ;;  %v6254_v18 = vsub.s32 0, %v209_v15 }
  0x83   :  { %5246 = vmatprep.subr.bf16.mxu1 %v6141_v0  ;;  %371 = vmatprep.subr.bf16.mxu0 %v5460_v23 }
  0x84   :  { %v219_v19 = vrot.slane %v206_v17, %v6252_v16  ;;  %v211_v20 = vrot.slane %v206_v17, %v6254_v18 }
  0x86   :  { %5247 = vmatpush3.bf16.msra.mxu1 %v5462_v24  ;;  %372 = vmatpush1.bf16.msra.mxu0 %v5463_v25 }
  0x87   :  { %1185 = vmatprep.subr.bf16.mxu0 %v5467_v26  ;;  %1228 = vmatprep.subr.bf16.mxu1 %v5491_v42  ;;  %v6262_v26 = vsub.s32 1, %v209_v15 }
  0x89   :  { %5249 = vmatmul.mubr.bf16.vlgmr.msra.gmra.mxu1 %v5464_v27  ;;  %390 = vmatmul.mubr.bf16.vlgmr.msra.gmra.mxu0 %v5464_v27 }
  0x8a   :  { %1260 = vmatprep.mubr.bf16.mxu1 %v6143_v1  ;;  %1186 = vmatpush1.bf16.msra.mxu0 %v5465_v28 }
  0x8b   :  { %1187 = vmatprep.subr.bf16.mxu0 %v5470_v29  ;;  %1229 = vmatpush1.bf16.msra.mxu1 %v5489_v44 }
  0x8c   :  { %1230 = vmatprep.subr.bf16.mxu1 %v5497_v48 }
  0x8e   :  { %1188 = vmatpush1.bf16.msra.mxu0 %v5468_v30 }
  0x8f   :  { %1189 = vmatprep.subr.bf16.mxu0 %v5473_v31  ;;  %1231 = vmatpush1.bf16.msra.mxu1 %v5495_v47 }
  0x90   :  { %1232 = vmatprep.subr.bf16.mxu1 %v5503_v50 }
  0x92   :  { %1190 = vmatpush1.bf16.msra.mxu0 %v5471_v32 }
  0x93   :  { %1191 = vmatprep.subr.bf16.mxu0 %v5476_v33  ;;  %1233 = vmatpush1.bf16.msra.mxu1 %v5501_v52 }
  0x94   :  { %1234 = vmatprep.subr.bf16.mxu1 %v5509_v54 }
  0x96   :  { %1192 = vmatpush1.bf16.msra.mxu0 %v5474_v34 }
  0x97   :  { %1193 = vmatprep.subr.bf16.mxu0 %v5479_v35  ;;  %1235 = vmatpush1.bf16.msra.mxu1 %v5507_v56  ;;  %v6273_v35 = vrot.slane %v206_v17, %v6262_v26 }
  0x98   :  { %1236 = vmatprep.subr.bf16.mxu1 %v5515_v58 }
  0x9a   :  { %1194 = vmatpush1.bf16.msra.mxu0 %v5477_v36 }
  0x9b   :  { %1195 = vmatprep.subr.bf16.mxu0 %v5482_v37  ;;  %1237 = vmatpush1.bf16.msra.mxu1 %v5513_v60 }
  0x9c   :  { %1238 = vmatprep.subr.bf16.mxu1 %v5521_v62 }
  0x9e   :  { %1196 = vmatpush1.bf16.msra.mxu0 %v5480_v38 }
  0x9f   :  { %1197 = vmatprep.subr.bf16.mxu0 %v5485_v39  ;;  %1239 = vmatpush1.bf16.msra.mxu1 %v5519_v2 }
  0xa0   :  { %1240 = vmatprep.subr.bf16.mxu1 %v5527_v4 }
  0xa2   :  { %1198 = vmatpush1.bf16.msra.mxu0 %v5483_v40 }
  0xa3   :  { %1199 = vmatprep.subr.bf16.mxu0 %v5488_v41  ;;  %1241 = vmatpush1.bf16.msra.mxu1 %v5525_v6 }
  0xa4   :  { %1242 = vmatprep.subr.bf16.mxu1 %v5533_v8 }
  0xa6   :  { %1200 = vmatpush1.bf16.msra.mxu0 %v5486_v43 }
  0xa7   :  { %1201 = vmatprep.subr.bf16.mxu0 %v5494_v45  ;;  %1243 = vmatpush1.bf16.msra.mxu1 %v5531_v10 }
  0xa8   :  { %5028 = vmatprep.subr.bf16.mxu1 %v5537_v12 }
  0xaa   :  { %1202 = vmatpush2.bf16.msra.mxu0 %v5492_v46 }
  0xab   :  { %1203 = vmatprep.subr.bf16.mxu0 %v5500_v49 }
  0xae   :  { %1204 = vmatpush2.bf16.msra.mxu0 %v5498_v51 }
  0xaf   :  { %1205 = vmatprep.subr.bf16.mxu0 %v5506_v53 }
  0xb2   :  { %1206 = vmatpush2.bf16.msra.mxu0 %v5504_v55 }
  0xb3   :  { %1207 = vmatprep.subr.bf16.mxu0 %v5512_v57 }
  0xb6   :  { %1208 = vmatpush2.bf16.msra.mxu0 %v5510_v59 }
  0xb7   :  { %1209 = vmatprep.subr.bf16.mxu0 %v5518_v61 }
  0xba   :  { %1210 = vmatpush2.bf16.msra.mxu0 %v5516_v63 }
  0xbb   :  { %1211 = vmatprep.subr.bf16.mxu0 %v5524_v3 }
  0xbe   :  { %1212 = vmatpush2.bf16.msra.mxu0 %v5522_v5 }
  0xbf   :  { %1213 = vmatprep.subr.bf16.mxu0 %v5530_v7 }
  0xc2   :  { %1214 = vmatpush2.bf16.msra.mxu0 %v5528_v9 }
  0xc3   :  { %1215 = vmatprep.subr.bf16.mxu0 %v5536_v11 }
  0xc6   :  { %1216 = vmatpush2.bf16.msra.mxu0 %v5534_v13 }
  0xc7   :  { %5252 = vmatprep.subr.bf16.mxu0 %v6141_v0 }
 0x149   :  { %v434_v21 = vpop.f32.mrf.mxu1  ;;  %v391_v23 = vpop.f32.mrf.mxu0 }
 0x14a   :  { %v6258_v22 = vadd.f32 %v434_v21, %v219_v19  ;;  %v6260_v24 = vadd.f32 %v391_v23, %v211_v20 }
 0x14b   :  { %v5250_v25 = vpop.f32.mrf.mxu1  ;;  %v393_v28 = vpop.f32.mrf.mxu0 }
 0x14c   :  { %v515_v27 = vmul.f32 0.0, %v6258_v22  ;;  %v513_v29 = vmul.f32 0.0, %v6260_v24  ;;  %v473_v33 = vmul.f32 %v6258_v22, %v6258_v22  ;;  %v471_v34 = vmul.f32 %v6260_v24, %v6260_v24 }
 0x14d   :  { %v437_v30 = vpop.f32.mrf.mxu1  ;;  %v395_v32 = vpop.f32.mrf.mxu0 }
 0x14e   :  { %v6266_v31 = vadd.f32 %v437_v30, %v219_v19  ;;  %v6275_v36 = vadd.f32 %v395_v32, %v211_v20  ;;  %v545_v38 = vmul.f32 %v515_v27, %v6258_v22  ;;  %v543_v42 = vmul.f32 %v513_v29, %v6260_v24 }
 0x14f   :  { %v5251_v37 = vpop.f32.mrf.mxu1 }
 0x150   :  { %v446_v39 = vmul.f32 0.0, %v6266_v31  ;;  %v533_v40 = vadd.f32 %v515_v27, %v6266_v31  ;;  %v548_v41 = vmul.f32 %v6266_v31, %v6266_v31  ;;  %v444_v43 = vmul.f32 0.0, %v6275_v36 }
 0x151   :  { %v519_v44 = vadd.f32 %v513_v29, %v6275_v36  ;;  %v546_v45 = vmul.f32 %v6275_v36, %v6275_v36  ;;  %v6292_v37 = vadd.f32 %v393_v28, %v6273_v35  ;;  %v397_v28 = vpop.f32.mrf.mxu0 }
 0x152   :  { %v461_v46 = vadd.f32 %v446_v39, %v6258_v22  ;;  %v476_v47 = vmul.f32 %v446_v39, %v6266_v31  ;;  %v534_v48 = vrot.slane %v533_v40, 4  ;;  %v563_v49 = vadd.f32 %v548_v41, %v545_v38 }
 0x153   :  { %v447_v50 = vadd.f32 %v444_v43, %v6260_v24  ;;  %v474_v51 = vmul.f32 %v444_v43, %v6275_v36  ;;  %v520_v52 = vrot.slane %v519_v44, 4  ;;  %v549_v53 = vadd.f32 %v546_v45, %v543_v42 }
 0x154   :  { %v462_v54 = vrot.slane %v461_v46, 4  ;;  %v491_v55 = vadd.f32 %v476_v47, %v473_v33  ;;  %v535_v56 = vadd.f32 %v534_v48, %v533_v40  ;;  %v564_v57 = vrot.slane %v563_v49, 4 }
 0x155   :  { %v448_v58 = vrot.slane %v447_v50, 4  ;;  %v477_v59 = vadd.f32 %v474_v51, %v471_v34  ;;  %v521_v60 = vadd.f32 %v520_v52, %v519_v44  ;;  %v550_v61 = vrot.slane %v549_v53, 4 }
 0x156   :  { %v463_v62 = vadd.f32 %v462_v54, %v461_v46  ;;  %v492_v63 = vrot.slane %v491_v55, 4  ;;  %v536_v2 = vrot.slane %v535_v56, 2  ;;  %v565_v3 = vadd.f32 %v564_v57, %v563_v49 }
 0x157   :  { %v449_v4 = vadd.f32 %v448_v58, %v447_v50  ;;  %v478_v5 = vrot.slane %v477_v59, 4  ;;  %v522_v6 = vrot.slane %v521_v60, 2  ;;  %v551_v7 = vadd.f32 %v550_v61, %v549_v53 }
 0x158   :  { %v464_v8 = vrot.slane %v463_v62, 2  ;;  %v493_v9 = vadd.f32 %v492_v63, %v491_v55  ;;  %v537_v10 = vadd.f32 %v536_v2, %v535_v56  ;;  %v566_v11 = vrot.slane %v565_v3, 2 }
 0x159   :  { %v450_v12 = vrot.slane %v449_v4, 2  ;;  %v479_v13 = vadd.f32 %v478_v5, %v477_v59  ;;  %v523_v14 = vadd.f32 %v522_v6, %v521_v60  ;;  %v552_v15 = vrot.slane %v551_v7, 2 }
 0x15a   :  { %v465_v17 = vadd.f32 %v464_v8, %v463_v62  ;;  %v494_v19 = vrot.slane %v493_v9, 2  ;;  %v538_v20 = vrot.slane %v537_v10, 1  ;;  %v567_v21 = vadd.f32 %v566_v11, %v565_v3 }
 0x15b   :  { %v451_v23 = vadd.f32 %v450_v12, %v449_v4  ;;  %v480_v25 = vrot.slane %v479_v13, 2  ;;  %v524_v27 = vrot.slane %v523_v14, 1  ;;  %v553_v29 = vadd.f32 %v552_v15, %v551_v7 }
 0x15c   :  { %v466_v30 = vrot.slane %v465_v17, 1  ;;  %v495_v32 = vadd.f32 %v494_v19, %v493_v9  ;;  %v539_v33 = vadd.f32 %v538_v20, %v537_v10  ;;  %v568_v34 = vrot.slane %v567_v21, 1 }
 0x15d   :  { %v452_v38 = vrot.slane %v451_v23, 1  ;;  %v481_v39 = vadd.f32 %v480_v25, %v479_v13  ;;  %v525_v46 = vadd.f32 %v524_v27, %v523_v14  ;;  %v554_v47 = vrot.slane %v553_v29, 1 }
 0x15e   :  { %v467_v40 = vadd.f32 %v466_v30, %v465_v17  ;;  %v496_v41 = vrot.slane %v495_v32, 1  ;;  %v6294_v42 = vmul.f32 0.125, %v539_v33  ;;  %v569_v43 = vadd.f32 %v568_v34, %v567_v21 }
 0x15f   :  { %v453_v44 = vadd.f32 %v452_v38, %v451_v23  ;;  %v482_v45 = vrot.slane %v481_v39, 1  ;;  %v514_v57 = vmul.f32 0.0, %v6292_v37  ;;  %v6301_v58 = vmul.f32 0.125, %v525_v46 }
 0x160   :  { %v470_v48 = vmul.f32 0.125, %v467_v40  ;;  %v497_v49 = vadd.f32 %v496_v41, %v495_v32  ;;  %v572_v50 = vmul.f32 0.125, %v569_v43  ;;  %v575_v51 = vmul.f32 %v6294_v42, %v6294_v42 }
 0x161   :  { %v483_v52 = vadd.f32 %v482_v45, %v481_v39  ;;  %v6298_v56 = vmul.f32 0.125, %v453_v44  ;;  %v555_v59 = vadd.f32 %v554_v47, %v553_v29  ;;  %v6304_v62 = vadd.f32 %v397_v28, %v6273_v35 }
 0x162   :  { %v500_v53 = vmul.f32 0.125, %v497_v49  ;;  %v503_v54 = vmul.f32 %v470_v48, %v470_v48  ;;  %v578_v55 = vsub.f32 %v572_v50, %v575_v51  ;;  %v472_v63 = vmul.f32 %v6292_v37, %v6292_v37  ;;  %v6320_v51 = vld [vmem:[#allocation10] sm:$0x7] }
 0x163   :  { %v498_v2 = vmul.f32 0.125, %v483_v52  ;;  %v501_v4 = vmul.f32 %v6298_v56, %v6298_v56  ;;  %v445_v5 = vmul.f32 0.0, %v6304_v62  ;;  %v544_v6 = vmul.f32 %v514_v57, %v6292_v37 }
 0x164   :  { %v506_v60 = vsub.f32 %v500_v53, %v503_v54  ;;  %v581_v61 = vadd.f32 1e-05, %v578_v55  ;;  %v570_v7 = vmul.f32 0.125, %v555_v59  ;;  %v573_v8 = vmul.f32 %v6301_v58, %v6301_v58  ;;  %v6326_v59 = vld [vmem:[%s6655_s5] sm:$0x7] }
 0x165   :  { %v526_v35 = vadd.f32 %v514_v57, %v6304_v62  ;;  %v454_v9 = vadd.f32 %v445_v5, %v6292_v37  ;;  %v475_v10 = vmul.f32 %v445_v5, %v6304_v62  ;;  %v547_v11 = vmul.f32 %v6304_v62, %v6304_v62 }
 0x166   :  { %v509_v3 = vadd.f32 1e-05, %v506_v60  ;;  %5889 = vrsqrt.f32 %v581_v61  ;;  %v504_v13 = vsub.f32 %v498_v2, %v501_v4  ;;  %v576_v19 = vsub.f32 %v570_v7, %v573_v8 }
 0x167   :  { %v527_v12 = vrot.slane %v526_v35, 4  ;;  %v455_v14 = vrot.slane %v454_v9, 4  ;;  %v484_v15 = vadd.f32 %v475_v10, %v472_v63  ;;  %v556_v17 = vadd.f32 %v547_v11, %v544_v6 }
 0x168   :  { %5891 = vrsqrt.f32 %v509_v3  ;;  %v593_v29 = vmul.f32 0.0, %v6294_v42  ;;  %v507_v30 = vadd.f32 1e-05, %v504_v13  ;;  %v590_v38 = vmul.f32 0.0, %v470_v48 }
 0x169   :  { %v528_v20 = vadd.f32 %v527_v12, %v526_v35  ;;  %v456_v21 = vadd.f32 %v455_v14, %v454_v9  ;;  %v485_v23 = vrot.slane %v484_v15, 4  ;;  %v557_v25 = vrot.slane %v556_v17, 4 }
 0x16a   :  { %v579_v39 = vadd.f32 1e-05, %v576_v19  ;;  %v599_v46 = vadd.f32 %v593_v29, %v470_v48  ;;  %5893 = vrsqrt.f32 %v507_v30  ;;  %v602_v28 = vadd.f32 %v590_v38, %v6294_v42  ;;  %v5539_v38 = vld [vmem:[#allocation11 + $0x158] ss:$12 sps:$4 sm:$0xff]  }
 0x16b   :  { %v529_v27 = vrot.slane %v528_v20, 2  ;;  %v457_v32 = vrot.slane %v456_v21, 2  ;;  %v486_v33 = vadd.f32 %v485_v23, %v484_v15  ;;  %v558_v34 = vadd.f32 %v557_v25, %v556_v17 }
 0x16c   :  { %5895 = vrsqrt.f32 %v579_v39  ;;  %v623_v61 = vsub.f32 %v6258_v22, %v599_v46  ;;  %v646_v63 = vrot.slane %v6320_v51, %v6252_v16  ;;  %v626_v6 = vsub.f32 %v6266_v31, %v602_v28 }
 0x16d   :  { %v530_v40 = vadd.f32 %v529_v27, %v528_v20  ;;  %v458_v41 = vadd.f32 %v457_v32, %v456_v21  ;;  %v487_v43 = vrot.slane %v486_v33, 2  ;;  %v559_v44 = vrot.slane %v558_v34, 2 }
 0x16e   :  { %v669_v7 = vrot.slane %v6326_v59, %v6252_v16  ;;  %v588_v29 = vmul.f32 0.0, %v6298_v56  ;;  %v591_v39 = vmul.f32 0.0, %v6301_v58 }
 0x16f   :  { %v531_v45 = vrot.slane %v530_v40, 1  ;;  %v459_v47 = vrot.slane %v458_v41, 1  ;;  %v488_v49 = vadd.f32 %v487_v43, %v486_v33  ;;  %v560_v50 = vadd.f32 %v559_v44, %v558_v34  ;;  %v5538_v33 = vld [vmem:[#allocation11 + $0xb0] ss:$12 sps:$4 sm:$0xff]   ;;  %v5540_v44 = vld [vmem:[#allocation11 + $0x98] ss:$12 sps:$4 sm:$0xff]  }
 0x170   :  { %v597_v46 = vadd.f32 %v591_v39, %v6298_v56  ;;  %v638_v56 = vrot.slane %v6320_v51, %v6254_v18  ;;  %v5561_v39 = vld [vmem:[#allocation14 + $0x78] sm:$0xff]  }
 0x171   :  { %v532_v53 = vadd.f32 %v531_v45, %v530_v40  ;;  %v489_v54 = vrot.slane %v488_v49, 1  ;;  %v561_v55 = vrot.slane %v560_v50, 1  ;;  %v460_v48 = vadd.f32 %v459_v47, %v458_v41 }
 0x172   :  { %v600_v41 = vadd.f32 %v588_v29, %v6301_v58  ;;  %v621_v58 = vsub.f32 %v6260_v24, %v597_v46  ;;  %v642_v24 = vrot.slane %v6320_v51, %v6262_v26  ;;  %v5551_v51 = vld [vmem:[#allocation11 + $0xf8] ss:$12 sps:$4 sm:$0xff]   ;;  %v5555_v29 = vld [vmem:[#allocation11 + $0x20] ss:$12 sps:$4 sm:$0xff]  }
 0x173   :  { %v5890_v52 = vpop.eup %5889  ;;  %v541_v2 = vmul.f32 0.125, %v532_v53  ;;  %v490_v3 = vadd.f32 %v489_v54, %v488_v49  ;;  %v562_v42 = vadd.f32 %v561_v55, %v560_v50  ;;  %v469_v8 = vmul.f32 0.125, %v460_v48  ;;  %v5542_v49 = vld [vmem:[#allocation11 + $0x140] ss:$12 sps:$4 sm:$0xff]   ;;  %v5565_v46 = vld [vmem:[#allocation14 + $0x68] sm:$0xff]  }
 0x174   :  { %v611_v57 = vmul.f32 0.0, %v5890_v52  ;;  %v5543_v53 = vld [vmem:[#allocation11 + $0x80] ss:$12 sps:$4 sm:$0xff]  }
 0x175   :  { %v5892_v60 = vpop.eup %5891  ;;  %v574_v35 = vmul.f32 %v541_v2, %v541_v2  ;;  %v499_v9 = vmul.f32 0.125, %v490_v3  ;;  %v571_v10 = vmul.f32 0.125, %v562_v42  ;;  %v502_v22 = vmul.f32 %v469_v8, %v469_v8 }
 0x176   :  { %v608_v4 = vmul.f32 0.0, %v5892_v60  ;;  %v617_v5 = vadd.f32 %v5892_v60, %v611_v57  ;;  %v592_v45 = vmul.f32 0.0, %v541_v2  ;;  %v589_v50 = vmul.f32 0.0, %v469_v8  ;;  %v5545_v57 = vld [vmem:[#allocation11 + $0x128] ss:$12 sps:$4 sm:$0xff]  }
 0x177   :  { %v577_v15 = vsub.f32 %v571_v10, %v574_v35  ;;  %v505_v17 = vsub.f32 %v499_v9, %v502_v22  ;;  %v5894_v31 = vpop.eup %5893  ;;  %v665_v9 = vrot.slane %v6326_v59, %v6262_v26 }
 0x178   :  { %v620_v11 = vadd.f32 %v5890_v52, %v608_v4  ;;  %v629_v12 = vmul.f32 %v623_v61, %v617_v5  ;;  %v606_v40 = vmul.f32 0.0, %v5894_v31  ;;  %v624_v52 = vsub.f32 %v6275_v36, %v600_v41  ;;  %v5546_v36 = vld [vmem:[#allocation11 + $0x68] ss:$12 sps:$4 sm:$0xff]  }
 0x179   :  { %v580_v21 = vadd.f32 1e-05, %v577_v15  ;;  %v508_v23 = vadd.f32 1e-05, %v505_v17  ;;  %v5896_v27 = vpop.eup %5895  ;;  %v598_v54 = vadd.f32 %v592_v45, %v469_v8  ;;  %v601_v60 = vadd.f32 %v589_v50, %v541_v2  ;;  %v5562_v41 = vld [vmem:[#allocation14 + $0x38] sm:$0xff]   ;;  %v5564_v45 = vld [vmem:[#allocation14 + $0x30] sm:$0xff]  }
 0x17a   :  { %v632_v13 = vmul.f32 %v626_v6, %v620_v11  ;;  %v652_v14 = vmul.f32 %v646_v63, %v629_v12  ;;  %v609_v43 = vmul.f32 0.0, %v5896_v27  ;;  %v618_v47 = vadd.f32 %v5896_v27, %v606_v40  ;;  %v5541_v27 = vld [vmem:[#allocation11 + $0x230] ss:$12 sps:$4 sm:$0xff]   ;;  %v5547_v40 = vld [vmem:[#allocation11 + $0x200] ss:$12 sps:$4 sm:$0xff]  }
 0x17b   :  { %5897 = vrsqrt.f32 %v580_v21  ;;  %v622_v5 = vsub.f32 %v6292_v37, %v598_v54  ;;  %v625_v2 = vsub.f32 %v6304_v62, %v601_v60  ;;  %v661_v11 = vrot.slane %v6326_v59, %v6254_v18  ;;  %v5549_v37 = vld [vmem:[#allocation11 + $0x50] ss:$12 sps:$4 sm:$0xff]   ;;  %v5552_v62 = vld [vmem:[#allocation11 + $0x38] ss:$12 sps:$4 sm:$0xff]   ;;  %v5554_v21 = vld [vmem:[#allocation11 + $0xe0] ss:$12 sps:$4 sm:$0xff]  }
 0x17c   :  { %v655_v19 = vmul.f32 %v646_v63, %v632_v13  ;;  %v675_v20 = vadd.f32 %v669_v7, %v652_v14  ;;  %5899 = vrsqrt.f32 %v508_v23  ;;  %v615_v28 = vadd.f32 %v5894_v31, %v609_v43  ;;  %v5563_v43 = vld [vmem:[#allocation14 + $0x70] sm:$0xff]   ;;  %v5568_v54 = vld [vmem:[#allocation14 + $0x20] sm:$0xff]   ;;  %v5573_v60 = vld [vmem:[#allocation14 + $0x48] sm:$0xff]  }
 0x17d   :  { %v630_v55 = vmul.f32 %v624_v52, %v618_v47  ;;  %v5553_v47 = vld [vmem:[#allocation11 + $0x1d0] ss:$12 sps:$4 sm:$0xff]   ;;  %v5556_v50 = vld [vmem:[#allocation11 + $0x1b8] ss:$12 sps:$4 sm:$0xff]   ;;  %v5559_v52 = vld [vmem:[#allocation11 + $0x1a0] ss:$12 sps:$4 sm:$0xff]  }
 0x17e   :  { %v678_v25 = vadd.f32 %v669_v7, %v655_v19  ;;  %v681_v30 = vmax.f32 %v675_v20, 0.0  ;;  %v627_v3 = vmul.f32 %v621_v58, %v615_v28  ;;  %v5548_v7 = vld [vmem:[#allocation11 + $0x110] ss:$12 sps:$4 sm:$0xff]   ;;  %v5560_v28 = vld [vmem:[#allocation11 + $0x188] ss:$12 sps:$4 sm:$0xff]  }
 0x17f   :  { %v653_v6 = vmul.f32 %v638_v56, %v630_v55  ;;  %v5569_v58 = vld [vmem:[#allocation14 + $0x58] sm:$0xff]  }
 0x180   :  { %v684_v32 = vmax.f32 %v678_v25, 0.0  ;;  %v650_v10 = vmul.f32 %v638_v56, %v627_v3  ;;  %v5570_v55 = vld [vmem:[#allocation14 + $0x18] sm:$0xff]   ;;  %v5578_v56 = vld [vmem:[#allocation14 + $0xb0] sm:$0xff]  }
 0x181   :  { %v676_v13 = vadd.f32 %v661_v11, %v653_v6  ;;  %v5577_v3 = vld [vmem:[#allocation14 + $0xb8] sm:$0xff]   ;;  %v5584_v6 = vld [vmem:[#allocation14 + $0x80] sm:$0xff]  }
 0x182   :  { %v6335_v34 = vpack.c.bf16 %v684_v32, %v681_v30  ;;  %v673_v17 = vadd.f32 %v661_v11, %v650_v10  ;;  %v5557_v32 = vld [vmem:[#allocation11 + $0xc8] ss:$12 sps:$4 sm:$0xff]  }
 0x183   :  { %v682_v20 = vmax.f32 %v676_v13, 0.0 }
 0x184   :  { %1261 = vmatmul.mubr.bf16.vlgmr.msra.gmra.mxu1 %v6335_v34  ;;  %v679_v31 = vmax.f32 %v673_v17, 0.0 }
 0x185   :  { %5029 = vmatpush3.bf16.msra.mxu1 %v5538_v33  ;;  %v5544_v33 = vld [vmem:[#allocation11 + $0x218] ss:$12 sps:$4 sm:$0xff]  }
 0x186   :  { %5030 = vmatprep.subr.bf16.mxu1 %v5539_v38  ;;  %v685_v30 = vpack.c.bf16 %v682_v20, %v679_v31  ;;  %v5558_v38 = vld [vmem:[#allocation11 + $0x8] ss:$12 sps:$4 sm:$0xff]  }
 0x188   :  { %v5898_v48 = vpop.eup %5897 }
 0x189   :  { %5031 = vmatpush3.bf16.msra.mxu1 %v5540_v44  ;;  %v5900_v61 = vpop.eup %5899  ;;  %v610_v63 = vmul.f32 0.0, %v5898_v48  ;;  %v5550_v44 = vld [vmem:[#allocation11 + $0x1e8] ss:$12 sps:$4 sm:$0xff]  }
 0x18a   :  { %5032 = vmatprep.subr.bf16.mxu1 %v5542_v49  ;;  %v607_v42 = vmul.f32 0.0, %v5900_v61  ;;  %v5566_v49 = vld [vmem:[#allocation14 + $0x28] sm:$0xff]  }
 0x18b   :  { %v616_v4 = vadd.f32 %v5900_v61, %v610_v63  ;;  %v5574_v61 = vld [vmem:[#allocation14 + $0x8] sm:$0xff]   ;;  %v5576_v63 = vld [vmem:[#allocation14] sm:$0xff]  }
 0x18c   :  { %v619_v8 = vadd.f32 %v5898_v48, %v607_v42  ;;  %v5572_v48 = vld [vmem:[#allocation14 + $0x10] sm:$0xff]   ;;  %v5579_v42 = vld [vmem:[#allocation14 + $0xa8] sm:$0xff]  }
 0x18d   :  { %5033 = vmatpush3.bf16.msra.mxu1 %v5543_v53  ;;  %v628_v35 = vmul.f32 %v622_v5, %v616_v4  ;;  %v5567_v53 = vld [vmem:[#allocation14 + $0x60] sm:$0xff]   ;;  %v5581_v4 = vld [vmem:[#allocation14 + $0x98] sm:$0xff]   ;;  %v5582_v5 = vld [vmem:[#allocation14 + $0x90] sm:$0xff]  }
 0x18e   :  { %5034 = vmatprep.subr.bf16.mxu1 %v5545_v57  ;;  %v631_v12 = vmul.f32 %v625_v2, %v619_v8  ;;  %v5571_v57 = vld [vmem:[#allocation14 + $0x50] sm:$0xff]  }
 0x18f   :  { %v651_v22 = vmul.f32 %v642_v24, %v628_v35  ;;  %v784_v8 = vld [vmem:[#allocation13] sm:$0x7] }
 0x190   :  { %v654_v14 = vmul.f32 %v642_v24, %v631_v12  ;;  %v5583_v24 = vld [vmem:[#allocation14 + $0x88] sm:$0xff]   ;;  %v793_v2 = vrot.slane %v784_v8, %v6262_v26 }
 0x191   :  { %5035 = vmatpush3.bf16.msra.mxu1 %v5546_v36  ;;  %v674_v15 = vadd.f32 %v665_v9, %v651_v22  ;;  %v5580_v36 = vld [vmem:[#allocation14 + $0xa0] sm:$0xff]  }
 0x192   :  { %5036 = vmatprep.subr.bf16.mxu1 %v5548_v7  ;;  %v677_v19 = vadd.f32 %v665_v9, %v654_v14  ;;  %v789_v9 = vrot.slane %v784_v8, %v6254_v18 }
 0x193   :  { %v680_v23 = vmax.f32 %v674_v15, 0.0 }
 0x194   :  { %v683_v25 = vmax.f32 %v677_v19, 0.0 }
 0x195   :  { %5037 = vmatpush3.bf16.msra.mxu1 %v5549_v37 }
 0x196   :  { %5038 = vmatprep.subr.bf16.mxu1 %v5551_v51  ;;  %v686_v59 = vpack.c.bf16 %v683_v25, %v680_v23 }
 0x198   :  { %1217 = vmatprep.mubr.bf16.mxu0 %v686_v59  ;;  %1303 = vmatprep.mubr.bf16.mxu1 %v686_v59 }
 0x199   :  { %5039 = vmatpush3.bf16.msra.mxu1 %v5552_v62  ;;  %1218 = vmatmul.mubr.bf16.vlgmr.msra.gmra.mxu0 %v685_v30 }
 0x19a   :  { %5040 = vmatprep.subr.bf16.mxu1 %v5554_v21  ;;  %5253 = vmatpush3.bf16.msra.mxu0 %v5541_v27 }
 0x19b   :  { %5254 = vmatprep.subr.bf16.mxu0 %v6141_v0  ;;  %5268 = vmatprep.mubr.msk.bf16.mxu0 %vm6142_vm0, %v6141_v0 }
 0x19d   :  { %5041 = vmatpush3.bf16.msra.mxu1 %v5555_v29 }
 0x19e   :  { %5042 = vmatprep.subr.bf16.mxu1 %v5557_v32  ;;  %5255 = vmatpush3.bf16.msra.mxu0 %v5544_v33 }
 0x19f   :  { %5256 = vmatprep.subr.bf16.mxu0 %v6141_v0 }
 0x1a1   :  { %5043 = vmatpush3.bf16.msra.mxu1 %v5558_v38 }
 0x1a2   :  { %5059 = vmatprep.subr.bf16.mxu1 %v5561_v39  ;;  %5257 = vmatpush3.bf16.msra.mxu0 %v5547_v40  ;;  %v797_v40 = vrot.slane %v784_v8, %v6252_v16  ;;  %v5608_v8 = vld [vmem:[#allocation7 + $0xf8] ss:$12 sps:$4 sm:$0xff]  }
 0x1a3   :  { %5258 = vmatprep.subr.bf16.mxu0 %v6141_v0 }
 0x1a4   :  { %1304 = vmatmul.mubr.bf16.vlgmr.msra.gmra.mxu1 %v685_v30 }
 0x1a5   :  { %5060 = vmatpush3.bf16.msra.mxu1 %v5562_v41 }
 0x1a6   :  { %5061 = vmatprep.subr.bf16.mxu1 %v5563_v43  ;;  %5259 = vmatpush3.bf16.msra.mxu0 %v5550_v44 }
 0x1a7   :  { %5260 = vmatprep.subr.bf16.mxu0 %v6141_v0 }
 0x1a9   :  { %5062 = vmatpush3.bf16.msra.mxu1 %v5564_v45 }
 0x1aa   :  { %5063 = vmatprep.subr.bf16.mxu1 %v5565_v46  ;;  %5261 = vmatpush3.bf16.msra.mxu0 %v5553_v47 }
 0x1ab   :  { %5262 = vmatprep.subr.bf16.mxu0 %v6141_v0 }
 0x1ad   :  { %5064 = vmatpush3.bf16.msra.mxu1 %v5566_v49 }
 0x1ae   :  { %5263 = vmatpush3.bf16.msra.mxu0 %v5556_v50  ;;  %5065 = vmatprep.subr.bf16.mxu1 %v5567_v53 }
 0x1af   :  { %5264 = vmatprep.subr.bf16.mxu0 %v6141_v0 }
 0x1b1   :  { %5066 = vmatpush3.bf16.msra.mxu1 %v5568_v54 }
 0x1b2   :  { %5265 = vmatpush3.bf16.msra.mxu0 %v5559_v52  ;;  %5067 = vmatprep.subr.bf16.mxu1 %v5569_v58  ;;  %v5585_v58 = vld [vmem:[#allocation7 + $0x168] ss:$12 sps:$4 sm:$0xff]  }
 0x1b3   :  { %5266 = vmatprep.subr.bf16.mxu0 %v6141_v0 }
 0x1b5   :  { %5068 = vmatpush3.bf16.msra.mxu1 %v5570_v55  ;;  %v5587_v55 = vld [vmem:[#allocation7 + $0x16c] ss:$12 sps:$4 sm:$0xff]  }
 0x1b6   :  { %5267 = vmatpush3.bf16.msra.mxu0 %v5560_v28  ;;  %5069 = vmatprep.subr.bf16.mxu1 %v5571_v57  ;;  %v5588_v57 = vld [vmem:[#allocation7 + $0x170] ss:$12 sps:$4 sm:$0xff]  }
 0x1b7   :  { %5272 = vmatprep.subr.bf16.mxu0 %v6141_v0 }
 0x1b9   :  { %5269 = vmatmul.mubr.bf16.vlgmr.msra.gmra.mxu0 %v6335_v34  ;;  %5070 = vmatpush3.bf16.msra.mxu1 %v5572_v48  ;;  %v5575_v34 = vld [vmem:[#allocation14 + $0x40] sm:$0xff]  }
 0x1ba   :  { %5288 = vmatprep.mubr.msk.bf16.mxu0 %vm6142_vm0, %v6141_v0  ;;  %5071 = vmatprep.subr.bf16.mxu1 %v5573_v60  ;;  %v5589_v48 = vld [vmem:[#allocation7 + $0x150] ss:$12 sps:$4 sm:$0xff]   ;;  %v5591_v60 = vld [vmem:[#allocation7 + $0x154] ss:$12 sps:$4 sm:$0xff]  }
 0x1bb   :  { %5273 = vmatpush3.bf16.msra.mxu0 %v5577_v3  ;;  %v5596_v3 = vld [vmem:[#allocation7 + $0x140] ss:$12 sps:$4 sm:$0xff]  }
 0x1bc   :  { %5274 = vmatprep.subr.bf16.mxu0 %v6141_v0 }
 0x1bd   :  { %5072 = vmatpush3.bf16.msra.mxu1 %v5574_v61  ;;  %v5592_v61 = vld [vmem:[#allocation7 + $0x158] ss:$12 sps:$4 sm:$0xff]  }
 0x1be   :  { %5073 = vmatprep.subr.bf16.mxu1 %v5575_v34  ;;  %v5595_v34 = vld [vmem:[#allocation7 + $0x13c] ss:$12 sps:$4 sm:$0xff]  }
 0x1bf   :  { %5275 = vmatpush3.bf16.msra.mxu0 %v5578_v56  ;;  %v5599_v56 = vld [vmem:[#allocation7 + $0x124] ss:$12 sps:$4 sm:$0xff]  }
 0x1c0   :  { %5276 = vmatprep.subr.bf16.mxu0 %v6141_v0 }
 0x1c1   :  { %5074 = vmatpush3.bf16.msra.mxu1 %v5576_v63  ;;  %v5593_v63 = vld [vmem:[#allocation7 + $0x138] ss:$12 sps:$4 sm:$0xff]  }
 0x1c2   :  { %1823 = vmatprep.subr.bf16.mxu1 %v5587_v55  ;;  %v5649_v55 = vld [vmem:[#allocation11 + $0x454] ss:$12 sps:$4 sm:$0xff]  }
 0x1c3   :  { %5277 = vmatpush3.bf16.msra.mxu0 %v5579_v42  ;;  %v5597_v42 = vld [vmem:[#allocation7 + $0x120] ss:$12 sps:$4 sm:$0xff]  }
 0x1c4   :  { %5278 = vmatprep.subr.bf16.mxu0 %v6141_v0 }
 0x1c7   :  { %5279 = vmatpush3.bf16.msra.mxu0 %v5580_v36  ;;  %v5600_v36 = vld [vmem:[#allocation7 + $0x128] ss:$12 sps:$4 sm:$0xff]  }
 0x1c8   :  { %5280 = vmatprep.subr.bf16.mxu0 %v6141_v0 }
 0x1cb   :  { %5281 = vmatpush3.bf16.msra.mxu0 %v5581_v4  ;;  %v5603_v4 = vld [vmem:[#allocation7 + $0x10c] ss:$12 sps:$4 sm:$0xff]  }
 0x1cc   :  { %5282 = vmatprep.subr.bf16.mxu0 %v6141_v0 }
 0x1cf   :  { %5283 = vmatpush3.bf16.msra.mxu0 %v5582_v5  ;;  %v5601_v5 = vld [vmem:[#allocation7 + $0x108] ss:$12 sps:$4 sm:$0xff]  }
 0x1d0   :  { %5284 = vmatprep.subr.bf16.mxu0 %v6141_v0 }
 0x1d3   :  { %5285 = vmatpush3.bf16.msra.mxu0 %v5583_v24  ;;  %v5604_v24 = vld [vmem:[#allocation7 + $0x110] ss:$12 sps:$4 sm:$0xff]  }
 0x1d4   :  { %5286 = vmatprep.subr.bf16.mxu0 %v6141_v0 }
 0x1d7   :  { %5287 = vmatpush3.bf16.msra.mxu0 %v5584_v6  ;;  %v5607_v6 = vld [vmem:[#allocation7 + $0xf4] ss:$12 sps:$4 sm:$0xff]  }
 0x1d8   :  { %5292 = vmatprep.subr.bf16.mxu0 %v6141_v0 }
 0x244   :  { %v1262_v7 = vpop.f32.mrf.mxu1 }
 0x246   :  { %v1264_v35 = vpop.f32.mrf.mxu1 }
 0x248   :  { %v1266_v22 = vpop.f32.mrf.mxu1 }
 0x24a   :  { %v1268_v20 = vpop.f32.mrf.mxu1 }
 0x259   :  { %v1219_v10 = vpop.f32.mrf.mxu0 }
 0x25a   :  { %v1220_v37 = vadd.f32 %v1219_v10, %v789_v9  ;;  %v5615_v10 = vld [vmem:[#allocation7 + $0xc4] ss:$12 sps:$4 sm:$0xff]  }
 0x25b   :  { %v1221_v11 = vpop.f32.mrf.mxu0 }
 0x25c   :  { %v1222_v12 = vadd.f32 %v1221_v11, %v793_v2  ;;  %v1263_v62 = vadd.f32 %v1262_v7, %v1220_v37  ;;  %v5605_v7 = vld [vmem:[#allocation7 + $0xf0] ss:$12 sps:$4 sm:$0xff]   ;;  %v5613_v11 = vld [vmem:[#allocation7 + $0xc0] ss:$12 sps:$4 sm:$0xff]  }
 0x25d   :  { %v1223_v13 = vpop.f32.mrf.mxu0  ;;  %v5619_v37 = vld [vmem:[#allocation11 + $0x2ec] ss:$12 sps:$4 sm:$0xff]  }
 0x25e   :  { %v1224_v51 = vadd.f32 %v1223_v13, %v789_v9  ;;  %v1265_v15 = vadd.f32 %v1264_v35, %v1222_v12  ;;  %v1353_v59 = vmax.f32 %v1263_v62, 0.0  ;;  %v5611_v35 = vld [vmem:[#allocation7 + $0xdc] ss:$12 sps:$4 sm:$0xff]   ;;  %v5612_v9 = vld [vmem:[#allocation7 + $0xe0] ss:$12 sps:$4 sm:$0xff]  }
 0x25f   :  { %v1225_v14 = vpop.f32.mrf.mxu0  ;;  %v5616_v12 = vld [vmem:[#allocation7 + $0xc8] ss:$12 sps:$4 sm:$0xff]  }
 0x260   :  { %v1267_v17 = vadd.f32 %v1266_v22, %v1224_v51  ;;  %v1226_v19 = vadd.f32 %v1225_v14, %v793_v2  ;;  %v1354_v25 = vmax.f32 %v1265_v15, 0.0  ;;  %v5609_v2 = vld [vmem:[#allocation7 + $0xd8] ss:$12 sps:$4 sm:$0xff]  }
 0x262   :  { %v1269_v21 = vadd.f32 %v1268_v20, %v1226_v19  ;;  %v1356_v23 = vmax.f32 %v1267_v17, 0.0  ;;  %v4748_v19 = vld [vmem:[%s6659_s9] ss:$0 sm:$0xff] }
 0x264   :  { %v1357_v31 = vmax.f32 %v1269_v21, 0.0  ;;  %v1359_v29 = vpack.c.bf16 %v1356_v23, %v1353_v59  ;;  %v5044_v30 = vpop.f32.mrf.mxu1 }
 0x266   :  { %v1360_v27 = vpack.c.bf16 %v1357_v31, %v1354_v25  ;;  %v5045_v32 = vpop.f32.mrf.mxu1 }
 0x267   :  { %v5046_v39 = vadd.f32 %v5045_v32, %v5044_v30  ;;  %v5622_v32 = vld [vmem:[#allocation11 + $0x2d4] ss:$12 sps:$4 sm:$0xff]  }
 0x268   :  { %1593 = vmatprep.mubr.bf16.mxu1 %v1360_v27  ;;  %v5047_v33 = vpop.f32.mrf.mxu1 }
 0x269   :  { %1594 = vmatmul.mubr.bf16.vlgmr.msra.gmra.mxu1 %v1359_v29  ;;  %v1306_v43 = vadd.f32 %v5046_v39, %v797_v40  ;;  %v5617_v29 = vld [vmem:[#allocation11 + $0x2e8] ss:$12 sps:$4 sm:$0xff]   ;;  %v5623_v39 = vld [vmem:[#allocation11 + $0x2b8] ss:$12 sps:$4 sm:$0xff]  }
 0x26a   :  { %1855 = vmatprep.mubr.bf16.mxu1 %v6143_v1  ;;  %v5048_v38 = vpop.f32.mrf.mxu1  ;;  %1824 = vmatpush1.bf16.msra.mxu1 %v5585_v58  ;;  %v5644_v58 = vld [vmem:[#allocation11 + $0x3a8] ss:$12 sps:$4 sm:$0xff]  }
 0x26b   :  { %v5049_v41 = vadd.f32 %v5048_v38, %v5047_v33  ;;  %1825 = vmatprep.subr.bf16.mxu1 %v5591_v60  ;;  %v5620_v33 = vld [vmem:[#allocation11 + $0x2d0] ss:$12 sps:$4 sm:$0xff]  }
 0x26c   :  { %v5625_v38 = vld [vmem:[#allocation11 + $0x2bc] ss:$12 sps:$4 sm:$0xff]  }
 0x26d   :  { %v1309_v45 = vadd.f32 %v5049_v41, %v797_v40  ;;  %v5628_v40 = vld [vmem:[#allocation11 + $0x2a4] ss:$12 sps:$4 sm:$0xff]   ;;  %v5626_v41 = vld [vmem:[#allocation11 + $0x2a0] ss:$12 sps:$4 sm:$0xff]   ;;  %v5655_v60 = vld [vmem:[#allocation11 + $0x43c] ss:$12 sps:$4 sm:$0xff]  }
 0x26e   :  { %1826 = vmatpush1.bf16.msra.mxu1 %v5589_v48  ;;  %v5652_v48 = vld [vmem:[#allocation11 + $0x394] ss:$12 sps:$4 sm:$0xff]  }
 0x26f   :  { %1827 = vmatprep.subr.bf16.mxu1 %v5595_v34  ;;  %v5653_v34 = vld [vmem:[#allocation11 + $0x438] ss:$12 sps:$4 sm:$0xff]  }
 0x272   :  { %1828 = vmatpush1.bf16.msra.mxu1 %v5593_v63  ;;  %v5658_v63 = vld [vmem:[#allocation11 + $0x37c] ss:$12 sps:$4 sm:$0xff]  }
 0x273   :  { %1829 = vmatprep.subr.bf16.mxu1 %v5599_v56  ;;  %v5656_v56 = vld [vmem:[#allocation11 + $0x378] ss:$12 sps:$4 sm:$0xff]  }
 0x276   :  { %1830 = vmatpush1.bf16.msra.mxu1 %v5597_v42  ;;  %v5659_v42 = vld [vmem:[#allocation11 + $0x420] ss:$12 sps:$4 sm:$0xff]  }
 0x277   :  { %1831 = vmatprep.subr.bf16.mxu1 %v5603_v4  ;;  %v5667_v4 = vld [vmem:[#allocation11 + $0x40c] ss:$12 sps:$4 sm:$0xff]  }
 0x279   :  { %v1346_v44 = vpop.f32.mrf.mxu0 }
 0x27a   :  { %v1347_v47 = vadd.f32 %v1346_v44, %v1306_v43  ;;  %1832 = vmatpush1.bf16.msra.mxu1 %v5601_v5  ;;  %v5631_v43 = vld [vmem:[#allocation11 + $0x28c] ss:$12 sps:$4 sm:$0xff]   ;;  %v5629_v44 = vld [vmem:[#allocation11 + $0x288] ss:$12 sps:$4 sm:$0xff]  }
 0x27b   :  { %v5270_v46 = vpop.f32.mrf.mxu0  ;;  %1833 = vmatprep.subr.bf16.mxu1 %v5607_v6  ;;  %v5662_v5 = vld [vmem:[#allocation11 + $0x360] ss:$12 sps:$4 sm:$0xff]  }
 0x27c   :  { %v1355_v28 = vmax.f32 %v1347_v47, 0.0  ;;  %v5632_v46 = vld [vmem:[#allocation11 + $0x270] ss:$12 sps:$4 sm:$0xff]   ;;  %v5670_v6 = vld [vmem:[#allocation11 + $0x34c] ss:$12 sps:$4 sm:$0xff]  }
 0x27d   :  { %v1349_v49 = vpop.f32.mrf.mxu0  ;;  %v5637_v47 = vld [vmem:[#allocation11 + $0x25c] ss:$12 sps:$4 sm:$0xff]  }
 0x27e   :  { %v1350_v50 = vadd.f32 %v1349_v49, %v1309_v45  ;;  %1834 = vmatpush1.bf16.msra.mxu1 %v5605_v7  ;;  %v5634_v45 = vld [vmem:[#allocation11 + $0x274] ss:$12 sps:$4 sm:$0xff]   ;;  %v5635_v49 = vld [vmem:[#allocation11 + $0x258] ss:$12 sps:$4 sm:$0xff]  }
 0x27f   :  { %v5271_v52 = vpop.f32.mrf.mxu0  ;;  %1835 = vmatprep.subr.bf16.mxu1 %v5611_v35  ;;  %v5673_v7 = vld [vmem:[#allocation11 + $0x3f4] ss:$12 sps:$4 sm:$0xff]  }
 0x280   :  { %v1358_v53 = vmax.f32 %v1350_v50, 0.0  ;;  %v5640_v50 = vld [vmem:[#allocation11 + $0x244] ss:$12 sps:$4 sm:$0xff]   ;;  %v5638_v52 = vld [vmem:[#allocation11 + $0x240] ss:$12 sps:$4 sm:$0xff]  }
 0x281   :  { %v5676_v35 = vld [vmem:[#allocation11 + $0x334] ss:$12 sps:$4 sm:$0xff]  }
 0x282   :  { %v1361_v54 = vpack.c.bf16 %v1358_v53, %v1355_v28  ;;  %1836 = vmatpush1.bf16.msra.mxu1 %v5609_v2  ;;  %v5643_v28 = vld [vmem:[#allocation11 + $0x46c] ss:$12 sps:$4 sm:$0xff]   ;;  %v5641_v53 = vld [vmem:[#allocation11 + $0x468] ss:$12 sps:$4 sm:$0xff]   ;;  %v5671_v2 = vld [vmem:[#allocation11 + $0x3f0] ss:$12 sps:$4 sm:$0xff]  }
 0x283   :  { %1837 = vmatprep.subr.bf16.mxu1 %v5615_v10  ;;  %v5674_v10 = vld [vmem:[#allocation11 + $0x330] ss:$12 sps:$4 sm:$0xff]  }
 0x284   :  { %5289 = vmatmul.mubr.bf16.vlgmr.msra.gmra.mxu0 %v1361_v54  ;;  %v5646_v54 = vld [vmem:[#allocation11 + $0x3ac] ss:$12 sps:$4 sm:$0xff]  }
 0x285   :  { %5308 = vmatprep.mubr.msk.bf16.mxu0 %vm6142_vm0, %v6141_v0  ;;  %5293 = vmatpush3.bf16.msra.mxu0 %v5588_v57  ;;  %v5647_v57 = vld [vmem:[#allocation11 + $0x450] ss:$12 sps:$4 sm:$0xff]  }
 0x286   :  { %5294 = vmatprep.subr.bf16.mxu0 %v6141_v0  ;;  %1838 = vmatpush1.bf16.msra.mxu1 %v5613_v11  ;;  %v5677_v11 = vld [vmem:[#allocation11 + $0x3d8] ss:$12 sps:$4 sm:$0xff]  }
 0x287   :  { %2655 = vmatprep.subr.bf16.mxu1 %v5619_v37  ;;  %v5685_v37 = vld [vmem:[#allocation11 + $0x3c4] ss:$12 sps:$4 sm:$0xff]  }
 0x289   :  { %5295 = vmatpush3.bf16.msra.mxu0 %v5592_v61  ;;  %v5650_v61 = vld [vmem:[#allocation11 + $0x390] ss:$12 sps:$4 sm:$0xff]  }
 0x28a   :  { %5296 = vmatprep.subr.bf16.mxu0 %v6141_v0 }
 0x28d   :  { %5297 = vmatpush3.bf16.msra.mxu0 %v5596_v3  ;;  %v5661_v3 = vld [vmem:[#allocation11 + $0x424] ss:$12 sps:$4 sm:$0xff]  }
 0x28e   :  { %5298 = vmatprep.subr.bf16.mxu0 %v6141_v0 }
 0x291   :  { %5299 = vmatpush3.bf16.msra.mxu0 %v5600_v36  ;;  %v5664_v36 = vld [vmem:[#allocation11 + $0x364] ss:$12 sps:$4 sm:$0xff]  }
 0x292   :  { %5300 = vmatprep.subr.bf16.mxu0 %v6141_v0 }
 0x295   :  { %5301 = vmatpush3.bf16.msra.mxu0 %v5604_v24  ;;  %v5665_v24 = vld [vmem:[#allocation11 + $0x408] ss:$12 sps:$4 sm:$0xff]  }
 0x296   :  { %5302 = vmatprep.subr.bf16.mxu0 %v6141_v0 }
 0x299   :  { %5303 = vmatpush3.bf16.msra.mxu0 %v5608_v8  ;;  %v5668_v8 = vld [vmem:[#allocation11 + $0x348] ss:$12 sps:$4 sm:$0xff]  }
 0x29a   :  { %5304 = vmatprep.subr.bf16.mxu0 %v6141_v0 }
 0x29d   :  { %5305 = vmatpush3.bf16.msra.mxu0 %v5612_v9  ;;  %v5679_v9 = vld [vmem:[#allocation11 + $0x3dc] ss:$12 sps:$4 sm:$0xff]  }
 0x29e   :  { %5306 = vmatprep.subr.bf16.mxu0 %v6141_v0 }
 0x2a1   :  { %5307 = vmatpush3.bf16.msra.mxu0 %v5616_v12  ;;  %v5682_v12 = vld [vmem:[#allocation11 + $0x31c] ss:$12 sps:$4 sm:$0xff]  }
 0x2a2   :  { %2698 = vmatprep.subr.bf16.mxu0 %v5643_v28 }
 0x329   :  { %v5075_v22 = vpop.f32.mrf.mxu1 }
 0x32b   :  { %v5076_v13 = vpop.f32.mrf.mxu1 }
 0x32c   :  { %v5077_v15 = vadd.f32 %v5076_v13, %v5075_v22  ;;  %v5680_v22 = vld [vmem:[#allocation11 + $0x318] ss:$12 sps:$4 sm:$0xff]   ;;  %v5683_v13 = vld [vmem:[#allocation11 + $0x3c0] ss:$12 sps:$4 sm:$0xff]  }
 0x32d   :  { %v5078_v51 = vpop.f32.mrf.mxu1 }
 0x32e   :  { %v1596_v21 = vadd.f32 %v5077_v15, %v4748_v19  ;;  %v5686_v15 = vld [vmem:[#allocation11 + $0x300] ss:$12 sps:$4 sm:$0xff]  }
 0x32f   :  { %v5079_v14 = vpop.f32.mrf.mxu1 }
 0x330   :  { %v5080_v17 = vadd.f32 %v5079_v14, %v5078_v51  ;;  %v5688_v51 = vld [vmem:[#allocation11 + $0x304] ss:$12 sps:$4 sm:$0xff]  }
 0x331   :  { %v5689_v14 = vld [vmem:[#allocation11 + $0x3b0] ss:$12 sps:$4 sm:$0xff]  }
 0x332   :  { %v1599_v23 = vadd.f32 %v5080_v17, %v4748_v19  ;;  %v1678_v17 = vld [vmem:[#allocation8 + $0x3] sm:$0x7] }
 0x333   :  { %v1683_v19 = vrot.slane %v1678_v17, %v6254_v18 }
 0x344   :  { %v1636_v62 = vpop.f32.mrf.mxu0 }
 0x345   :  { %v1637_v31 = vadd.f32 %v1636_v62, %v1596_v21  ;;  %v1691_v62 = vrot.slane %v1678_v17, %v6252_v16 }
 0x346   :  { %v5290_v20 = vpop.f32.mrf.mxu0 }
 0x348   :  { %v1639_v25 = vpop.f32.mrf.mxu0 }
 0x349   :  { %v1640_v59 = vadd.f32 %v1639_v25, %v1599_v23 }
 0x34a   :  { %v5291_v27 = vpop.f32.mrf.mxu0 }
 0x34b   :  { %v1643_v30 = vpack.c.bf16 %v1640_v59, %v1637_v31 }
 0x34d   :  { %1856 = vmatmul.mubr.bf16.vlgmr.msra.gmra.mxu1 %v1643_v30  ;;  %5309 = vmatmul.mubr.bf16.vlgmr.msra.gmra.mxu0 %v1643_v30 }
 0x34e   :  { %2656 = vmatpush1.bf16.msra.mxu1 %v5617_v29  ;;  %2730 = vmatprep.mubr.bf16.mxu0 %v6143_v1 }
 0x34f   :  { %2657 = vmatprep.subr.bf16.mxu1 %v5622_v32  ;;  %2699 = vmatpush1.bf16.msra.mxu0 %v5641_v53 }
 0x350   :  { %2700 = vmatprep.subr.bf16.mxu0 %v5649_v55 }
 0x352   :  { %2658 = vmatpush1.bf16.msra.mxu1 %v5620_v33 }
 0x353   :  { %2659 = vmatprep.subr.bf16.mxu1 %v5625_v38  ;;  %2701 = vmatpush1.bf16.msra.mxu0 %v5647_v57 }
 0x354   :  { %2702 = vmatprep.subr.bf16.mxu0 %v5655_v60 }
 0x356   :  { %2660 = vmatpush1.bf16.msra.mxu1 %v5623_v39 }
 0x357   :  { %2661 = vmatprep.subr.bf16.mxu1 %v5628_v40  ;;  %2703 = vmatpush1.bf16.msra.mxu0 %v5653_v34 }
 0x358   :  { %2704 = vmatprep.subr.bf16.mxu0 %v5661_v3 }
 0x35a   :  { %2662 = vmatpush1.bf16.msra.mxu1 %v5626_v41  ;;  %v6408_v41 = vrot.slane %v1678_v17, %v6262_v26 }
 0x35b   :  { %2663 = vmatprep.subr.bf16.mxu1 %v5631_v43  ;;  %2705 = vmatpush1.bf16.msra.mxu0 %v5659_v42 }
 0x35c   :  { %2706 = vmatprep.subr.bf16.mxu0 %v5667_v4 }
 0x35e   :  { %2664 = vmatpush1.bf16.msra.mxu1 %v5629_v44 }
 0x35f   :  { %2665 = vmatprep.subr.bf16.mxu1 %v5634_v45  ;;  %2707 = vmatpush1.bf16.msra.mxu0 %v5665_v24 }
 0x360   :  { %2708 = vmatprep.subr.bf16.mxu0 %v5673_v7 }
 0x362   :  { %2666 = vmatpush1.bf16.msra.mxu1 %v5632_v46 }
 0x363   :  { %2667 = vmatprep.subr.bf16.mxu1 %v5637_v47  ;;  %2709 = vmatpush1.bf16.msra.mxu0 %v5671_v2 }
 0x364   :  { %2710 = vmatprep.subr.bf16.mxu0 %v5679_v9 }
 0x366   :  { %2668 = vmatpush1.bf16.msra.mxu1 %v5635_v49 }
 0x367   :  { %2669 = vmatprep.subr.bf16.mxu1 %v5640_v50  ;;  %2711 = vmatpush1.bf16.msra.mxu0 %v5677_v11 }
 0x368   :  { %2712 = vmatprep.subr.bf16.mxu0 %v5685_v37 }
 0x36a   :  { %2670 = vmatpush1.bf16.msra.mxu1 %v5638_v52 }
 0x36b   :  { %2671 = vmatprep.subr.bf16.mxu1 %v5646_v54  ;;  %2713 = vmatpush1.bf16.msra.mxu0 %v5683_v13 }
 0x36c   :  { %5099 = vmatprep.subr.bf16.mxu0 %v5689_v14 }
 0x36e   :  { %2672 = vmatpush2.bf16.msra.mxu1 %v5644_v58 }
 0x36f   :  { %2673 = vmatprep.subr.bf16.mxu1 %v5652_v48 }
 0x372   :  { %2674 = vmatpush2.bf16.msra.mxu1 %v5650_v61 }
 0x373   :  { %2675 = vmatprep.subr.bf16.mxu1 %v5658_v63 }
 0x376   :  { %2676 = vmatpush2.bf16.msra.mxu1 %v5656_v56 }
 0x377   :  { %2677 = vmatprep.subr.bf16.mxu1 %v5664_v36 }
 0x37a   :  { %2678 = vmatpush2.bf16.msra.mxu1 %v5662_v5 }
 0x37b   :  { %2679 = vmatprep.subr.bf16.mxu1 %v5670_v6 }
 0x37e   :  { %2680 = vmatpush2.bf16.msra.mxu1 %v5668_v8 }
 0x37f   :  { %2681 = vmatprep.subr.bf16.mxu1 %v5676_v35 }
 0x382   :  { %2682 = vmatpush2.bf16.msra.mxu1 %v5674_v10 }
 0x383   :  { %2683 = vmatprep.subr.bf16.mxu1 %v5682_v12 }
 0x386   :  { %2684 = vmatpush2.bf16.msra.mxu1 %v5680_v22 }
 0x387   :  { %2685 = vmatprep.subr.bf16.mxu1 %v5688_v51 }
 0x38a   :  { %2686 = vmatpush2.bf16.msra.mxu1 %v5686_v15 }
 0x38b   :  { %5312 = vmatprep.subr.bf16.mxu1 %v6141_v0 }
 0x40d   :  { %v1857_v20 = vpop.f32.mrf.mxu1  ;;  %v1900_v21 = vpop.f32.mrf.mxu0 }
 0x40e   :  { %v6394_v23 = vadd.f32 %v1857_v20, %v1683_v19  ;;  %v6396_v25 = vadd.f32 %v1900_v21, %v1691_v62 }
 0x40f   :  { %v1859_v31 = vpop.f32.mrf.mxu1  ;;  %v5310_v59 = vpop.f32.mrf.mxu0 }
 0x410   :  { %v1979_v27 = vmul.f32 0.0, %v6394_v23  ;;  %v1981_v29 = vmul.f32 0.0, %v6396_v25  ;;  %v1937_v39 = vmul.f32 %v6394_v23, %v6394_v23  ;;  %v1939_v49 = vmul.f32 %v6396_v25, %v6396_v25 }
 0x411   :  { %v1861_v30 = vpop.f32.mrf.mxu1  ;;  %v1903_v32 = vpop.f32.mrf.mxu0 }
 0x412   :  { %v6400_v33 = vadd.f32 %v1861_v30, %v1683_v19  ;;  %v6402_v38 = vadd.f32 %v1903_v32, %v1691_v62  ;;  %v2009_v40 = vmul.f32 %v1979_v27, %v6394_v23  ;;  %v2011_v50 = vmul.f32 %v1981_v29, %v6396_v25 }
 0x413   :  { %v5311_v43 = vpop.f32.mrf.mxu0  ;;  %v6426_v30 = vadd.f32 %v1859_v31, %v6408_v41 }
 0x414   :  { %v1910_v44 = vmul.f32 0.0, %v6400_v33  ;;  %v1985_v45 = vadd.f32 %v1979_v27, %v6400_v33  ;;  %v2012_v46 = vmul.f32 %v6400_v33, %v6400_v33  ;;  %v1912_v47 = vmul.f32 0.0, %v6402_v38 }
 0x415   :  { %v1999_v52 = vadd.f32 %v1981_v29, %v6402_v38  ;;  %v2014_v28 = vmul.f32 %v6402_v38, %v6402_v38 }
 0x416   :  { %v1913_v53 = vadd.f32 %v1910_v44, %v6394_v23  ;;  %v1940_v54 = vmul.f32 %v1910_v44, %v6400_v33  ;;  %v1986_v58 = vrot.slane %v1985_v45, 4  ;;  %v2015_v55 = vadd.f32 %v2012_v46, %v2009_v40  ;;  %v1863_v46 = vpop.f32.mrf.mxu1 }
 0x417   :  { %v1927_v57 = vadd.f32 %v1912_v47, %v6396_v25  ;;  %v1942_v48 = vmul.f32 %v1912_v47, %v6402_v38  ;;  %v2000_v60 = vrot.slane %v1999_v52, 4  ;;  %v2029_v61 = vadd.f32 %v2014_v28, %v2011_v50 }
 0x418   :  { %v1914_v34 = vrot.slane %v1913_v53, 4  ;;  %v1943_v63 = vadd.f32 %v1940_v54, %v1937_v39  ;;  %v1987_v3 = vadd.f32 %v1986_v58, %v1985_v45  ;;  %v2016_v56 = vrot.slane %v2015_v55, 4 }
 0x419   :  { %v1928_v42 = vrot.slane %v1927_v57, 4  ;;  %v1957_v36 = vadd.f32 %v1942_v48, %v1939_v49  ;;  %v2001_v4 = vadd.f32 %v2000_v60, %v1999_v52  ;;  %v2030_v5 = vrot.slane %v2029_v61, 4 }
 0x41a   :  { %v1915_v24 = vadd.f32 %v1914_v34, %v1913_v53  ;;  %v1944_v6 = vrot.slane %v1943_v63, 4  ;;  %v1988_v7 = vrot.slane %v1987_v3, 2  ;;  %v2017_v8 = vadd.f32 %v2016_v56, %v2015_v55 }
 0x41b   :  { %v1929_v2 = vadd.f32 %v1928_v42, %v1927_v57  ;;  %v1958_v35 = vrot.slane %v1957_v36, 4  ;;  %v2002_v9 = vrot.slane %v2001_v4, 2  ;;  %v2031_v10 = vadd.f32 %v2030_v5, %v2029_v61 }
 0x41c   :  { %v1916_v11 = vrot.slane %v1915_v24, 2  ;;  %v1945_v12 = vadd.f32 %v1944_v6, %v1943_v63  ;;  %v1989_v37 = vadd.f32 %v1988_v7, %v1987_v3  ;;  %v2018_v22 = vrot.slane %v2017_v8, 2 }
 0x41d   :  { %v1930_v13 = vrot.slane %v1929_v2, 2  ;;  %v1959_v51 = vadd.f32 %v1958_v35, %v1957_v36  ;;  %v2003_v14 = vadd.f32 %v2002_v9, %v2001_v4  ;;  %v2032_v15 = vrot.slane %v2031_v10, 2 }
 0x41e   :  { %v1917_v17 = vadd.f32 %v1916_v11, %v1915_v24  ;;  %v1946_v19 = vrot.slane %v1945_v12, 2  ;;  %v1990_v62 = vrot.slane %v1989_v37, 1  ;;  %v2019_v20 = vadd.f32 %v2018_v22, %v2017_v8 }
 0x41f   :  { %v1931_v21 = vadd.f32 %v1930_v13, %v1929_v2  ;;  %v1960_v59 = vrot.slane %v1959_v51, 2  ;;  %v2004_v27 = vrot.slane %v2003_v14, 1  ;;  %v2033_v29 = vadd.f32 %v2032_v15, %v2031_v10 }
 0x420   :  { %v1918_v32 = vrot.slane %v1917_v17, 1  ;;  %v1947_v39 = vadd.f32 %v1946_v19, %v1945_v12  ;;  %v1991_v50 = vadd.f32 %v1990_v62, %v1989_v37  ;;  %v2020_v52 = vrot.slane %v2019_v20, 1 }
 0x421   :  { %v1932_v40 = vrot.slane %v1931_v21, 1  ;;  %v1961_v43 = vadd.f32 %v1960_v59, %v1959_v51  ;;  %v2005_v44 = vadd.f32 %v2004_v27, %v2003_v14  ;;  %v2034_v45 = vrot.slane %v2033_v29, 1 }
 0x422   :  { %v1919_v47 = vadd.f32 %v1918_v32, %v1917_v17  ;;  %v1948_v49 = vrot.slane %v1947_v39, 1  ;;  %v6433_v57 = vadd.f32 %v1863_v46, %v6408_v41  ;;  %v1980_v63 = vmul.f32 0.0, %v6426_v30 }
 0x423   :  { %v1933_v28 = vadd.f32 %v1932_v40, %v1931_v21  ;;  %v1962_v53 = vrot.slane %v1961_v43, 1  ;;  %v6428_v54 = vmul.f32 0.125, %v2005_v44  ;;  %v2035_v58 = vadd.f32 %v2034_v45, %v2033_v29 }
 0x424   :  { %v6430_v55 = vmul.f32 0.125, %v1919_v47  ;;  %v1949_v31 = vadd.f32 %v1948_v49, %v1947_v39  ;;  %v2021_v3 = vadd.f32 %v2020_v52, %v2019_v20  ;;  %v6438_v56 = vmul.f32 0.125, %v1991_v50 }
 0x425   :  { %v1936_v48 = vmul.f32 0.125, %v1933_v28  ;;  %v1963_v60 = vadd.f32 %v1962_v53, %v1961_v43  ;;  %v2038_v61 = vmul.f32 0.125, %v2035_v58  ;;  %v2041_v34 = vmul.f32 %v6428_v54, %v6428_v54 }
 0x426   :  { %v1964_v5 = vmul.f32 0.125, %v1949_v31  ;;  %v1911_v24 = vmul.f32 0.0, %v6433_v57  ;;  %v1967_v41 = vmul.f32 %v6430_v55, %v6430_v55  ;;  %v1992_v8 = vadd.f32 %v1980_v63, %v6433_v57 }
 0x427   :  { %v1966_v42 = vmul.f32 0.125, %v1963_v60  ;;  %v1969_v36 = vmul.f32 %v1936_v48, %v1936_v48  ;;  %v2044_v4 = vsub.f32 %v2038_v61, %v2041_v34  ;;  %v1938_v2 = vmul.f32 %v6426_v30, %v6426_v30 }
 0x428   :  { %v2036_v35 = vmul.f32 0.125, %v2021_v3  ;;  %v1920_v9 = vadd.f32 %v1911_v24, %v6426_v30  ;;  %v2039_v10 = vmul.f32 %v6438_v56, %v6438_v56  ;;  %v1941_v12 = vmul.f32 %v1911_v24, %v6433_v57 }
 0x429   :  { %v1972_v6 = vsub.f32 %v1966_v42, %v1969_v36  ;;  %v2047_v7 = vadd.f32 1e-05, %v2044_v4  ;;  %v2010_v37 = vmul.f32 %v1980_v63, %v6426_v30  ;;  %v1993_v13 = vrot.slane %v1992_v8, 4  ;;  %v6454_v63 = vld [vmem:[#allocation10 + $0x3] sm:$0x7] }
 0x42a   :  { %v1921_v22 = vrot.slane %v1920_v9, 4  ;;  %v2013_v51 = vmul.f32 %v6433_v57, %v6433_v57  ;;  %v1970_v14 = vsub.f32 %v1964_v5, %v1967_v41  ;;  %v1950_v15 = vadd.f32 %v1941_v12, %v1938_v2 }
 0x42b   :  { %v1975_v11 = vadd.f32 1e-05, %v1972_v6  ;;  %5901 = vrsqrt.f32 %v2047_v7  ;;  %v1994_v19 = vadd.f32 %v1993_v13, %v1992_v8  ;;  %v2042_v20 = vsub.f32 %v2036_v35, %v2039_v10  ;;  %v6460_v6 = vld [vmem:[%s6655_s5 + $0x3] sm:$0x7] }
 0x42c   :  { %v1922_v17 = vadd.f32 %v1921_v22, %v1920_v9  ;;  %v2022_v62 = vadd.f32 %v2013_v51, %v2010_v37  ;;  %v1951_v21 = vrot.slane %v1950_v15, 4  ;;  %v1973_v32 = vadd.f32 1e-05, %v1970_v14 }
 0x42d   :  { %5903 = vrsqrt.f32 %v1975_v11  ;;  %v1995_v27 = vrot.slane %v1994_v19, 2  ;;  %v2045_v45 = vadd.f32 1e-05, %v2042_v20  ;;  %v2059_v47 = vmul.f32 0.0, %v6428_v54 }
 0x42e   :  { %v1923_v59 = vrot.slane %v1922_v17, 2  ;;  %v2023_v29 = vrot.slane %v2022_v62, 4  ;;  %v1952_v39 = vadd.f32 %v1951_v21, %v1950_v15  ;;  %5905 = vrsqrt.f32 %v1973_v32 }
 0x42f   :  { %v1996_v43 = vadd.f32 %v1995_v27, %v1994_v19  ;;  %v2056_v28 = vmul.f32 0.0, %v1936_v48  ;;  %5907 = vrsqrt.f32 %v2045_v45  ;;  %v2065_v34 = vadd.f32 %v2059_v47, %v1936_v48 }
 0x430   :  { %v1924_v40 = vadd.f32 %v1923_v59, %v1922_v17  ;;  %v2024_v44 = vadd.f32 %v2023_v29, %v2022_v62  ;;  %v1953_v46 = vrot.slane %v1952_v39, 2  ;;  %v2113_v48 = vrot.slane %v6454_v63, %v6252_v16 }
 0x431   :  { %v1997_v50 = vrot.slane %v1996_v43, 1  ;;  %v2068_v5 = vadd.f32 %v2056_v28, %v6428_v54  ;;  %v2089_v12 = vsub.f32 %v6396_v25, %v2065_v34  ;;  %v2137_v37 = vrot.slane %v6460_v6, %v6252_v16 }
 0x432   :  { %v1925_v49 = vrot.slane %v1924_v40, 1  ;;  %v2025_v52 = vrot.slane %v2024_v44, 2  ;;  %v1954_v53 = vadd.f32 %v1953_v46, %v1952_v39  ;;  %v2054_v25 = vmul.f32 0.0, %v6430_v55 }
 0x433   :  { %v1998_v58 = vadd.f32 %v1997_v50, %v1996_v43  ;;  %v2092_v22 = vsub.f32 %v6402_v38, %v2068_v5  ;;  %v2057_v38 = vmul.f32 0.0, %v6438_v56 }
 0x434   :  { %v2026_v31 = vadd.f32 %v2025_v52, %v2024_v44  ;;  %v1926_v60 = vadd.f32 %v1925_v49, %v1924_v40  ;;  %v1955_v61 = vrot.slane %v1954_v53, 1  ;;  %v5690_v44 = vld [vmem:[#allocation11 + $0x2f0] ss:$12 sps:$4 sm:$0xff]   ;;  %v2066_v45 = vadd.f32 %v2054_v25, %v6438_v56  ;;  %v5691_v49 = vld [vmem:[#allocation11 + $0x398] ss:$12 sps:$4 sm:$0xff]  }
 0x435   :  { %v2007_v4 = vmul.f32 0.125, %v1998_v58  ;;  %v2063_v52 = vadd.f32 %v2057_v38, %v6430_v55  ;;  %v5693_v58 = vld [vmem:[#allocation11 + $0x2d8] ss:$12 sps:$4 sm:$0xff]   ;;  %v5709_v38 = vld [vmem:[#allocation11 + $0x308] ss:$12 sps:$4 sm:$0xff]  }
 0x436   :  { %v2027_v42 = vrot.slane %v2026_v31, 1  ;;  %v1935_v36 = vmul.f32 0.125, %v1926_v60  ;;  %v1956_v24 = vadd.f32 %v1955_v61, %v1954_v53  ;;  %v5694_v61 = vld [vmem:[#allocation11 + $0x380] ss:$12 sps:$4 sm:$0xff]  }
 0x437   :  { %v2040_v35 = vmul.f32 %v2007_v4, %v2007_v4  ;;  %v2058_v53 = vmul.f32 0.0, %v2007_v4  ;;  %v2087_v56 = vsub.f32 %v6394_v23, %v2063_v52  ;;  %v5716_v52 = vld [vmem:[#allocation14 + $0xf0] sm:$0xff]  }
 0x438   :  { %v5902_v3 = vpop.eup %5901  ;;  %v2028_v8 = vadd.f32 %v2027_v42, %v2026_v31  ;;  %v1968_v2 = vmul.f32 %v1935_v36, %v1935_v36  ;;  %v1965_v9 = vmul.f32 0.125, %v1956_v24  ;;  %v2055_v50 = vmul.f32 0.0, %v1935_v36  ;;  %v5696_v24 = vld [vmem:[#allocation11 + $0x2c0] ss:$12 sps:$4 sm:$0xff]  }
 0x439   :  { %v2077_v41 = vmul.f32 0.0, %v5902_v3  ;;  %v2090_v31 = vsub.f32 %v6400_v33, %v2066_v45  ;;  %v2064_v5 = vadd.f32 %v2058_v53, %v1935_v36  ;;  %v2109_v36 = vrot.slane %v6454_v63, %v6262_v26  ;;  %v5713_v45 = vld [vmem:[#allocation14 + $0x138] sm:$0xff]   ;;  %v5717_v53 = vld [vmem:[#allocation14 + $0x128] sm:$0xff]  }
 0x43a   :  { %v5904_v7 = vpop.eup %5903  ;;  %v2037_v54 = vmul.f32 0.125, %v2028_v8  ;;  %v1971_v14 = vsub.f32 %v1965_v9, %v1968_v2  ;;  %v2067_v34 = vadd.f32 %v2055_v50, %v2007_v4  ;;  %v2105_v8 = vrot.slane %v6454_v63, %v6254_v18  ;;  %v5715_v50 = vld [vmem:[#allocation14 + $0x130] sm:$0xff]  }
 0x43b   :  { %v2074_v10 = vmul.f32 0.0, %v5904_v7  ;;  %v2083_v11 = vadd.f32 %v5904_v7, %v2077_v41  ;;  %v5906_v27 = vpop.eup %5905  ;;  %v2088_v23 = vsub.f32 %v6426_v30, %v2064_v5  ;;  %v5702_v30 = vld [vmem:[#allocation11 + $0x290] ss:$12 sps:$4 sm:$0xff]  }
 0x43c   :  { %v2043_v15 = vsub.f32 %v2037_v54, %v2040_v35  ;;  %v1974_v62 = vadd.f32 1e-05, %v1971_v14  ;;  %v5908_v32 = vpop.eup %5907  ;;  %v2072_v43 = vmul.f32 0.0, %v5906_v27  ;;  %v2091_v35 = vsub.f32 %v6433_v57, %v2067_v34  ;;  %v5712_v34 = vld [vmem:[#allocation11 + $0x3c8] ss:$12 sps:$4 sm:$0xff]   ;;  %v5723_v5 = vld [vmem:[#allocation14 + $0x110] sm:$0xff]  }
 0x43d   :  { %v2086_v13 = vadd.f32 %v5902_v3, %v2074_v10  ;;  %v2095_v51 = vmul.f32 %v2089_v12, %v2083_v11  ;;  %v2075_v47 = vmul.f32 0.0, %v5908_v32  ;;  %v5699_v10 = vld [vmem:[#allocation11 + $0x2a8] ss:$12 sps:$4 sm:$0xff]   ;;  %v2129_v54 = vrot.slane %v6460_v6, %v6254_v18 }
 0x43e   :  { %v2046_v20 = vadd.f32 1e-05, %v2043_v15  ;;  %5909 = vrsqrt.f32 %v1974_v62  ;;  %v2084_v28 = vadd.f32 %v5908_v32, %v2072_v43  ;;  %v2133_v57 = vrot.slane %v6460_v6, %v6262_v26  ;;  %v5706_v6 = vld [vmem:[#allocation11 + $0x320] ss:$12 sps:$4 sm:$0xff]   ;;  %v5711_v43 = vld [vmem:[#allocation11 + $0x248] ss:$12 sps:$4 sm:$0xff]  }
 0x43f   :  { %v2098_v17 = vmul.f32 %v2092_v22, %v2086_v13  ;;  %v2119_v19 = vmul.f32 %v2113_v48, %v2095_v51  ;;  %v2081_v60 = vadd.f32 %v5906_v27, %v2075_v47  ;;  %v5705_v27 = vld [vmem:[#allocation11 + $0x278] ss:$12 sps:$4 sm:$0xff]  }
 0x440   :  { %5911 = vrsqrt.f32 %v2046_v20  ;;  %v2096_v3 = vmul.f32 %v2090_v31, %v2084_v28  ;;  %v5714_v47 = vld [vmem:[#allocation14 + $0xf8] sm:$0xff]   ;;  %v5704_v28 = vld [vmem:[#allocation11 + $0x410] ss:$12 sps:$4 sm:$0xff]  }
 0x441   :  { %v2122_v21 = vmul.f32 %v2113_v48, %v2098_v17  ;;  %v2143_v59 = vadd.f32 %v2137_v37, %v2119_v19  ;;  %v2093_v55 = vmul.f32 %v2087_v56, %v2081_v60  ;;  %v5697_v48 = vld [vmem:[#allocation11 + $0x368] ss:$12 sps:$4 sm:$0xff]   ;;  %v5703_v17 = vld [vmem:[#allocation11 + $0x338] ss:$12 sps:$4 sm:$0xff]  }
 0x442   :  { %v2120_v4 = vmul.f32 %v2105_v8, %v2096_v3  ;;  %v5707_v31 = vld [vmem:[#allocation11 + $0x3f8] ss:$12 sps:$4 sm:$0xff]   ;;  %v5719_v60 = vld [vmem:[#allocation14 + $0x120] sm:$0xff]  }
 0x443   :  { %v2146_v29 = vadd.f32 %v2137_v37, %v2122_v21  ;;  %v2149_v39 = vmax.f32 %v2143_v59, 0.0  ;;  %v2117_v12 = vmul.f32 %v2105_v8, %v2093_v55  ;;  %v5700_v37 = vld [vmem:[#allocation11 + $0x350] ss:$12 sps:$4 sm:$0xff]   ;;  %v5721_v3 = vld [vmem:[#allocation14 + $0x118] sm:$0xff]  }
 0x444   :  { %v2144_v51 = vadd.f32 %v2129_v54, %v2120_v4  ;;  %v5720_v56 = vld [vmem:[#allocation14 + $0xe0] sm:$0xff]   ;;  %v5734_v4 = vld [vmem:[#allocation14 + $0x150] sm:$0xff]  }
 0x445   :  { %v2152_v40 = vmax.f32 %v2146_v29, 0.0  ;;  %v2141_v63 = vadd.f32 %v2129_v54, %v2117_v12  ;;  %v5692_v29 = vld [vmem:[#allocation11 + $0x470] ss:$12 sps:$4 sm:$0xff]  }
 0x446   :  { %v2150_v20 = vmax.f32 %v2144_v51, 0.0  ;;  %v5727_v55 = vld [vmem:[#allocation14 + $0x100] sm:$0xff]  }
 0x447   :  { %v6471_v46 = vpack.c.bf16 %v2152_v40, %v2149_v39  ;;  %v2147_v59 = vmax.f32 %v2141_v63, 0.0  ;;  %v5708_v39 = vld [vmem:[#allocation11 + $0x260] ss:$12 sps:$4 sm:$0xff]   ;;  %v5695_v40 = vld [vmem:[#allocation11 + $0x458] ss:$12 sps:$4 sm:$0xff]  }
 0x448   :  { %v5728_v8 = vld [vmem:[#allocation14 + $0xc0] sm:$0xff]  }
 0x449   :  { %2731 = vmatmul.mubr.bf16.vlgmr.msra.gmra.mxu0 %v6471_v46  ;;  %v2153_v32 = vpack.c.bf16 %v2150_v20, %v2147_v59 }
 0x44a   :  { %5100 = vmatpush3.bf16.msra.mxu0 %v5690_v44  ;;  %v5698_v44 = vld [vmem:[#allocation11 + $0x440] ss:$12 sps:$4 sm:$0xff]  }
 0x44b   :  { %5101 = vmatprep.subr.bf16.mxu0 %v5691_v49  ;;  %v5910_v42 = vpop.eup %5909  ;;  %v5701_v49 = vld [vmem:[#allocation11 + $0x428] ss:$12 sps:$4 sm:$0xff]  }
 0x44c   :  { %v2073_v7 = vmul.f32 0.0, %v5910_v42 }
 0x44d   :  { %v5912_v41 = vpop.eup %5911 }
 0x44e   :  { %5102 = vmatpush3.bf16.msra.mxu0 %v5693_v58  ;;  %v2076_v33 = vmul.f32 0.0, %v5912_v41  ;;  %v2085_v2 = vadd.f32 %v5912_v41, %v2073_v7  ;;  %v5718_v58 = vld [vmem:[#allocation14 + $0xe8] sm:$0xff]  }
 0x44f   :  { %5103 = vmatprep.subr.bf16.mxu0 %v5694_v61  ;;  %v5710_v61 = vld [vmem:[#allocation11 + $0x3e0] ss:$12 sps:$4 sm:$0xff]   ;;  %v5725_v41 = vld [vmem:[#allocation14 + $0x108] sm:$0xff]  }
 0x450   :  { %v2082_v9 = vadd.f32 %v5910_v42, %v2076_v33  ;;  %v2097_v11 = vmul.f32 %v2091_v35, %v2085_v2  ;;  %v5722_v42 = vld [vmem:[#allocation14 + $0xd8] sm:$0xff]   ;;  %v5726_v7 = vld [vmem:[#allocation14 + $0xc8] sm:$0xff]   ;;  %v5732_v2 = vld [vmem:[#allocation14 + $0x160] sm:$0xff]  }
 0x451   :  { %v5731_v33 = vld [vmem:[#allocation14 + $0x168] sm:$0xff]   ;;  %v5733_v35 = vld [vmem:[#allocation14 + $0x158] sm:$0xff]  }
 0x452   :  { %5104 = vmatpush3.bf16.msra.mxu0 %v5696_v24  ;;  %v2094_v22 = vmul.f32 %v2088_v23, %v2082_v9  ;;  %v2121_v13 = vmul.f32 %v2109_v36, %v2097_v11  ;;  %v5724_v24 = vld [vmem:[#allocation14 + $0xd0] sm:$0xff]   ;;  %v5735_v9 = vld [vmem:[#allocation14 + $0x148] sm:$0xff]   ;;  %v5736_v23 = vld [vmem:[#allocation14 + $0x140] sm:$0xff]  }
 0x453   :  { %5105 = vmatprep.subr.bf16.mxu0 %v5697_v48  ;;  %v5730_v48 = vld [vmem:[#allocation14 + $0x170] sm:$0xff]  }
 0x454   :  { %v2118_v14 = vmul.f32 %v2109_v36, %v2094_v22  ;;  %v2145_v15 = vadd.f32 %v2133_v57, %v2121_v13 }
 0x456   :  { %5106 = vmatpush3.bf16.msra.mxu0 %v5699_v10  ;;  %v2142_v19 = vadd.f32 %v2133_v57, %v2118_v14  ;;  %v2151_v62 = vmax.f32 %v2145_v15, 0.0  ;;  %v2254_v10 = vld [vmem:[#allocation13 + $0x3] sm:$0x7] }
 0x457   :  { %5107 = vmatprep.subr.bf16.mxu0 %v5700_v37  ;;  %v2263_v11 = vrot.slane %v2254_v10, %v6262_v26  ;;  %v2259_v54 = vrot.slane %v2254_v10, %v6254_v18 }
 0x458   :  { %v2148_v21 = vmax.f32 %v2142_v19, 0.0 }
 0x45a   :  { %5108 = vmatpush3.bf16.msra.mxu0 %v5702_v30  ;;  %v2154_v25 = vpack.c.bf16 %v2151_v62, %v2148_v21 }
 0x45b   :  { %5109 = vmatprep.subr.bf16.mxu0 %v5703_v17 }
 0x45c   :  { %2687 = vmatprep.mubr.bf16.mxu1 %v2154_v25  ;;  %2773 = vmatprep.mubr.bf16.mxu0 %v2154_v25 }
 0x45d   :  { %2688 = vmatmul.mubr.bf16.vlgmr.msra.gmra.mxu1 %v2153_v32 }
 0x45e   :  { %5110 = vmatpush3.bf16.msra.mxu0 %v5705_v27  ;;  %5313 = vmatpush3.bf16.msra.mxu1 %v5692_v29 }
 0x45f   :  { %5111 = vmatprep.subr.bf16.mxu0 %v5706_v6  ;;  %5314 = vmatprep.subr.bf16.mxu1 %v6141_v0 }
 0x460   :  { %5328 = vmatprep.mubr.msk.bf16.mxu1 %vm6142_vm0, %v6141_v0 }
 0x462   :  { %5112 = vmatpush3.bf16.msra.mxu0 %v5708_v39  ;;  %5315 = vmatpush3.bf16.msra.mxu1 %v5695_v40 }
 0x463   :  { %5113 = vmatprep.subr.bf16.mxu0 %v5709_v38  ;;  %5316 = vmatprep.subr.bf16.mxu1 %v6141_v0 }
 0x466   :  { %5114 = vmatpush3.bf16.msra.mxu0 %v5711_v43  ;;  %5317 = vmatpush3.bf16.msra.mxu1 %v5698_v44 }
 0x467   :  { %5130 = vmatprep.subr.bf16.mxu0 %v5713_v45  ;;  %5318 = vmatprep.subr.bf16.mxu1 %v6141_v0  ;;  %v2267_v45 = vrot.slane %v2254_v10, %v6252_v16  ;;  %v5760_v10 = vld [vmem:[#allocation7 + $0x1b8] ss:$12 sps:$4 sm:$0xff]  }
 0x469   :  { %2774 = vmatmul.mubr.bf16.vlgmr.msra.gmra.mxu0 %v2153_v32 }
 0x46a   :  { %5131 = vmatpush3.bf16.msra.mxu0 %v5714_v47  ;;  %5319 = vmatpush3.bf16.msra.mxu1 %v5701_v49 }
 0x46b   :  { %5132 = vmatprep.subr.bf16.mxu0 %v5715_v50  ;;  %5320 = vmatprep.subr.bf16.mxu1 %v6141_v0 }
 0x46e   :  { %5133 = vmatpush3.bf16.msra.mxu0 %v5716_v52  ;;  %5321 = vmatpush3.bf16.msra.mxu1 %v5704_v28 }
 0x46f   :  { %5134 = vmatprep.subr.bf16.mxu0 %v5717_v53  ;;  %5322 = vmatprep.subr.bf16.mxu1 %v6141_v0 }
 0x472   :  { %5135 = vmatpush3.bf16.msra.mxu0 %v5718_v58  ;;  %5323 = vmatpush3.bf16.msra.mxu1 %v5707_v31 }
 0x473   :  { %5136 = vmatprep.subr.bf16.mxu0 %v5719_v60  ;;  %5324 = vmatprep.subr.bf16.mxu1 %v6141_v0 }
 0x476   :  { %5325 = vmatpush3.bf16.msra.mxu1 %v5710_v61  ;;  %5137 = vmatpush3.bf16.msra.mxu0 %v5720_v56 }
 0x477   :  { %5326 = vmatprep.subr.bf16.mxu1 %v6141_v0  ;;  %5138 = vmatprep.subr.bf16.mxu0 %v5721_v3  ;;  %v5739_v3 = vld [vmem:[#allocation7 + $0x22c] ss:$12 sps:$4 sm:$0xff]  }
 0x47a   :  { %5327 = vmatpush3.bf16.msra.mxu1 %v5712_v34  ;;  %5139 = vmatpush3.bf16.msra.mxu0 %v5722_v42  ;;  %v5737_v42 = vld [vmem:[#allocation7 + $0x228] ss:$12 sps:$4 sm:$0xff]  }
 0x47b   :  { %5332 = vmatprep.subr.bf16.mxu1 %v6141_v0  ;;  %5140 = vmatprep.subr.bf16.mxu0 %v5723_v5  ;;  %v5740_v5 = vld [vmem:[#allocation7 + $0x230] ss:$12 sps:$4 sm:$0xff]  }
 0x47d   :  { %5329 = vmatmul.mubr.bf16.vlgmr.msra.gmra.mxu1 %v6471_v46  ;;  %v5729_v46 = vld [vmem:[#allocation14 + $0x178] sm:$0xff]  }
 0x47e   :  { %5348 = vmatprep.mubr.msk.bf16.mxu1 %vm6142_vm0, %v6141_v0  ;;  %5141 = vmatpush3.bf16.msra.mxu0 %v5724_v24  ;;  %v5743_v24 = vld [vmem:[#allocation7 + $0x214] ss:$12 sps:$4 sm:$0xff]  }
 0x47f   :  { %5142 = vmatprep.subr.bf16.mxu0 %v5725_v41  ;;  %5333 = vmatpush3.bf16.msra.mxu1 %v5729_v46  ;;  %v5741_v41 = vld [vmem:[#allocation7 + $0x210] ss:$12 sps:$4 sm:$0xff]   ;;  %v5748_v46 = vld [vmem:[#allocation7 + $0x200] ss:$12 sps:$4 sm:$0xff]  }
 0x480   :  { %5334 = vmatprep.subr.bf16.mxu1 %v6141_v0 }
 0x482   :  { %5143 = vmatpush3.bf16.msra.mxu0 %v5726_v7  ;;  %v5744_v7 = vld [vmem:[#allocation7 + $0x218] ss:$12 sps:$4 sm:$0xff]  }
 0x483   :  { %5144 = vmatprep.subr.bf16.mxu0 %v5727_v55  ;;  %5335 = vmatpush3.bf16.msra.mxu1 %v5730_v48  ;;  %v5747_v55 = vld [vmem:[#allocation7 + $0x1fc] ss:$12 sps:$4 sm:$0xff]   ;;  %v5751_v48 = vld [vmem:[#allocation7 + $0x1e4] ss:$12 sps:$4 sm:$0xff]  }
 0x484   :  { %5336 = vmatprep.subr.bf16.mxu1 %v6141_v0 }
 0x486   :  { %5145 = vmatpush3.bf16.msra.mxu0 %v5728_v8  ;;  %v5745_v8 = vld [vmem:[#allocation7 + $0x1f8] ss:$12 sps:$4 sm:$0xff]  }
 0x487   :  { %5337 = vmatpush3.bf16.msra.mxu1 %v5731_v33  ;;  %3295 = vmatprep.subr.bf16.mxu0 %v5739_v3  ;;  %v5749_v33 = vld [vmem:[#allocation7 + $0x1e0] ss:$12 sps:$4 sm:$0xff]   ;;  %v5801_v3 = vld [vmem:[#allocation11 + $0x694] ss:$12 sps:$4 sm:$0xff]  }
 0x488   :  { %5338 = vmatprep.subr.bf16.mxu1 %v6141_v0 }
 0x48b   :  { %5339 = vmatpush3.bf16.msra.mxu1 %v5732_v2  ;;  %v5752_v2 = vld [vmem:[#allocation7 + $0x1e8] ss:$12 sps:$4 sm:$0xff]  }
 0x48c   :  { %5340 = vmatprep.subr.bf16.mxu1 %v6141_v0 }
 0x48f   :  { %5341 = vmatpush3.bf16.msra.mxu1 %v5733_v35  ;;  %v5755_v35 = vld [vmem:[#allocation7 + $0x1cc] ss:$12 sps:$4 sm:$0xff]  }
 0x490   :  { %5342 = vmatprep.subr.bf16.mxu1 %v6141_v0 }
 0x493   :  { %5343 = vmatpush3.bf16.msra.mxu1 %v5734_v4  ;;  %v5753_v4 = vld [vmem:[#allocation7 + $0x1c8] ss:$12 sps:$4 sm:$0xff]  }
 0x494   :  { %5344 = vmatprep.subr.bf16.mxu1 %v6141_v0 }
 0x497   :  { %5345 = vmatpush3.bf16.msra.mxu1 %v5735_v9  ;;  %v5756_v9 = vld [vmem:[#allocation7 + $0x1d0] ss:$12 sps:$4 sm:$0xff]  }
 0x498   :  { %5346 = vmatprep.subr.bf16.mxu1 %v6141_v0 }
 0x49b   :  { %5347 = vmatpush3.bf16.msra.mxu1 %v5736_v23  ;;  %v5759_v23 = vld [vmem:[#allocation7 + $0x1b4] ss:$12 sps:$4 sm:$0xff]  }
 0x49c   :  { %5352 = vmatprep.subr.bf16.mxu1 %v6141_v0 }
 0x509   :  { %v2732_v36 = vpop.f32.mrf.mxu0 }
 0x50b   :  { %v2734_v12 = vpop.f32.mrf.mxu0 }
 0x50d   :  { %v2736_v51 = vpop.f32.mrf.mxu0 }
 0x50f   :  { %v2738_v20 = vpop.f32.mrf.mxu0 }
 0x51d   :  { %v2689_v37 = vpop.f32.mrf.mxu1 }
 0x51e   :  { %v2690_v13 = vadd.f32 %v2689_v37, %v2259_v54  ;;  %v5765_v37 = vld [vmem:[#allocation7 + $0x180] ss:$12 sps:$4 sm:$0xff]  }
 0x51f   :  { %v2691_v22 = vpop.f32.mrf.mxu1 }
 0x520   :  { %v2692_v57 = vadd.f32 %v2691_v22, %v2263_v11  ;;  %v2733_v62 = vadd.f32 %v2732_v36, %v2690_v13  ;;  %v5757_v36 = vld [vmem:[#allocation7 + $0x1b0] ss:$12 sps:$4 sm:$0xff]   ;;  %v5771_v13 = vld [vmem:[#allocation11 + $0x52c] ss:$12 sps:$4 sm:$0xff]  }
 0x521   :  { %v2693_v14 = vpop.f32.mrf.mxu1  ;;  %v5767_v22 = vld [vmem:[#allocation7 + $0x184] ss:$12 sps:$4 sm:$0xff]  }
 0x522   :  { %v2694_v30 = vadd.f32 %v2693_v14, %v2259_v54  ;;  %v2735_v63 = vadd.f32 %v2734_v12, %v2692_v57  ;;  %v2823_v29 = vmax.f32 %v2733_v62, 0.0  ;;  %v5761_v12 = vld [vmem:[#allocation7 + $0x198] ss:$12 sps:$4 sm:$0xff]   ;;  %v5764_v54 = vld [vmem:[#allocation7 + $0x1a0] ss:$12 sps:$4 sm:$0xff]  }
 0x523   :  { %v2695_v15 = vpop.f32.mrf.mxu1  ;;  %v5768_v57 = vld [vmem:[#allocation7 + $0x188] ss:$12 sps:$4 sm:$0xff]  }
 0x524   :  { %v2737_v17 = vadd.f32 %v2736_v51, %v2694_v30  ;;  %v2696_v19 = vadd.f32 %v2695_v15, %v2263_v11  ;;  %v2824_v27 = vmax.f32 %v2735_v63, 0.0  ;;  %v5763_v11 = vld [vmem:[#allocation7 + $0x19c] ss:$12 sps:$4 sm:$0xff]  }
 0x526   :  { %v2739_v21 = vadd.f32 %v2738_v20, %v2696_v19  ;;  %v2826_v59 = vmax.f32 %v2737_v17, 0.0  ;;  %v4871_v19 = vld [vmem:[%s6659_s9 + $0x1] ss:$0 sm:$0xff] }
 0x528   :  { %v2827_v25 = vmax.f32 %v2739_v21, 0.0  ;;  %v2829_v32 = vpack.c.bf16 %v2826_v59, %v2823_v29 }
 0x529   :  { %v5115_v39 = vpop.f32.mrf.mxu0 }
 0x52a   :  { %v2830_v6 = vpack.c.bf16 %v2827_v25, %v2824_v27 }
 0x52b   :  { %v5116_v40 = vpop.f32.mrf.mxu0 }
 0x52c   :  { %3065 = vmatprep.mubr.bf16.mxu0 %v2830_v6  ;;  %v5117_v44 = vadd.f32 %v5116_v40, %v5115_v39  ;;  %v5774_v40 = vld [vmem:[#allocation11 + $0x514] ss:$12 sps:$4 sm:$0xff]  }
 0x52d   :  { %3066 = vmatmul.mubr.bf16.vlgmr.msra.gmra.mxu0 %v2829_v32  ;;  %v5118_v38 = vpop.f32.mrf.mxu0  ;;  %v5769_v32 = vld [vmem:[#allocation11 + $0x528] ss:$12 sps:$4 sm:$0xff]  }
 0x52e   :  { %3327 = vmatprep.mubr.bf16.mxu0 %v6143_v1  ;;  %v2776_v49 = vadd.f32 %v5117_v44, %v2267_v45  ;;  %3296 = vmatpush1.bf16.msra.mxu0 %v5737_v42  ;;  %v5775_v44 = vld [vmem:[#allocation11 + $0x4f8] ss:$12 sps:$4 sm:$0xff]   ;;  %v5799_v42 = vld [vmem:[#allocation11 + $0x690] ss:$12 sps:$4 sm:$0xff]  }
 0x52f   :  { %v5119_v43 = vpop.f32.mrf.mxu0  ;;  %3297 = vmatprep.subr.bf16.mxu0 %v5743_v24  ;;  %v5807_v24 = vld [vmem:[#allocation11 + $0x67c] ss:$12 sps:$4 sm:$0xff]  }
 0x530   :  { %v5120_v47 = vadd.f32 %v5119_v43, %v5118_v38  ;;  %v5772_v38 = vld [vmem:[#allocation11 + $0x510] ss:$12 sps:$4 sm:$0xff]  }
 0x531   :  { %v5777_v43 = vld [vmem:[#allocation11 + $0x4fc] ss:$12 sps:$4 sm:$0xff]  }
 0x532   :  { %v2779_v52 = vadd.f32 %v5120_v47, %v2267_v45  ;;  %3298 = vmatpush1.bf16.msra.mxu0 %v5741_v41  ;;  %v5780_v45 = vld [vmem:[#allocation11 + $0x4e4] ss:$12 sps:$4 sm:$0xff]   ;;  %v5778_v47 = vld [vmem:[#allocation11 + $0x4e0] ss:$12 sps:$4 sm:$0xff]  }
 0x533   :  { %3299 = vmatprep.subr.bf16.mxu0 %v5747_v55  ;;  %v5802_v41 = vld [vmem:[#allocation11 + $0x5d0] ss:$12 sps:$4 sm:$0xff]  }
 0x534   :  { %v5810_v55 = vld [vmem:[#allocation11 + $0x5bc] ss:$12 sps:$4 sm:$0xff]  }
 0x536   :  { %3300 = vmatpush1.bf16.msra.mxu0 %v5745_v8  ;;  %v5813_v8 = vld [vmem:[#allocation11 + $0x664] ss:$12 sps:$4 sm:$0xff]  }
 0x537   :  { %3301 = vmatprep.subr.bf16.mxu0 %v5751_v48  ;;  %v5811_v48 = vld [vmem:[#allocation11 + $0x660] ss:$12 sps:$4 sm:$0xff]  }
 0x53a   :  { %3302 = vmatpush1.bf16.msra.mxu0 %v5749_v33  ;;  %v5816_v33 = vld [vmem:[#allocation11 + $0x5a4] ss:$12 sps:$4 sm:$0xff]  }
 0x53b   :  { %3303 = vmatprep.subr.bf16.mxu0 %v5755_v35  ;;  %v5814_v35 = vld [vmem:[#allocation11 + $0x5a0] ss:$12 sps:$4 sm:$0xff]  }
 0x53d   :  { %v2816_v50 = vpop.f32.mrf.mxu1 }
 0x53e   :  { %v2817_v53 = vadd.f32 %v2816_v50, %v2776_v49  ;;  %3304 = vmatpush1.bf16.msra.mxu0 %v5753_v4  ;;  %v5783_v49 = vld [vmem:[#allocation11 + $0x4cc] ss:$12 sps:$4 sm:$0xff]   ;;  %v5781_v50 = vld [vmem:[#allocation11 + $0x4c8] ss:$12 sps:$4 sm:$0xff]  }
 0x53f   :  { %v5330_v28 = vpop.f32.mrf.mxu1  ;;  %3305 = vmatprep.subr.bf16.mxu0 %v5759_v23  ;;  %v5817_v4 = vld [vmem:[#allocation11 + $0x648] ss:$12 sps:$4 sm:$0xff]  }
 0x540   :  { %v2825_v61 = vmax.f32 %v2817_v53, 0.0  ;;  %v5784_v28 = vld [vmem:[#allocation11 + $0x4b0] ss:$12 sps:$4 sm:$0xff]   ;;  %v5787_v53 = vld [vmem:[#allocation11 + $0x498] ss:$12 sps:$4 sm:$0xff]  }
 0x541   :  { %v2819_v58 = vpop.f32.mrf.mxu1  ;;  %v5825_v23 = vld [vmem:[#allocation11 + $0x634] ss:$12 sps:$4 sm:$0xff]  }
 0x542   :  { %v2820_v31 = vadd.f32 %v2819_v58, %v2779_v52  ;;  %3306 = vmatpush1.bf16.msra.mxu0 %v5757_v36  ;;  %v5786_v52 = vld [vmem:[#allocation11 + $0x4b4] ss:$12 sps:$4 sm:$0xff]   ;;  %v5792_v58 = vld [vmem:[#allocation11 + $0x484] ss:$12 sps:$4 sm:$0xff]  }
 0x543   :  { %v5331_v60 = vpop.f32.mrf.mxu1  ;;  %3307 = vmatprep.subr.bf16.mxu0 %v5763_v11  ;;  %v5820_v36 = vld [vmem:[#allocation11 + $0x588] ss:$12 sps:$4 sm:$0xff]  }
 0x544   :  { %v2828_v34 = vmax.f32 %v2820_v31, 0.0  ;;  %v5790_v31 = vld [vmem:[#allocation11 + $0x480] ss:$12 sps:$4 sm:$0xff]  }
 0x545   :  { %v5795_v60 = vld [vmem:[#allocation11 + $0x6ac] ss:$12 sps:$4 sm:$0xff]   ;;  %v5828_v11 = vld [vmem:[#allocation11 + $0x574] ss:$12 sps:$4 sm:$0xff]  }
 0x546   :  { %v2831_v56 = vpack.c.bf16 %v2828_v34, %v2825_v61  ;;  %3308 = vmatpush1.bf16.msra.mxu0 %v5761_v12  ;;  %v5793_v61 = vld [vmem:[#allocation11 + $0x6a8] ss:$12 sps:$4 sm:$0xff]   ;;  %v5798_v34 = vld [vmem:[#allocation11 + $0x5ec] ss:$12 sps:$4 sm:$0xff]  }
 0x547   :  { %3309 = vmatprep.subr.bf16.mxu0 %v5767_v22  ;;  %v5831_v12 = vld [vmem:[#allocation11 + $0x61c] ss:$12 sps:$4 sm:$0xff]  }
 0x548   :  { %5349 = vmatmul.mubr.bf16.vlgmr.msra.gmra.mxu1 %v2831_v56  ;;  %v5796_v56 = vld [vmem:[#allocation11 + $0x5e8] ss:$12 sps:$4 sm:$0xff]  }
 0x549   :  { %5368 = vmatprep.mubr.msk.bf16.mxu1 %vm6142_vm0, %v6141_v0  ;;  %5353 = vmatpush3.bf16.msra.mxu1 %v5740_v5  ;;  %v5804_v5 = vld [vmem:[#allocation11 + $0x5d4] ss:$12 sps:$4 sm:$0xff]   ;;  %v5834_v22 = vld [vmem:[#allocation11 + $0x55c] ss:$12 sps:$4 sm:$0xff]  }
 0x54a   :  { %5354 = vmatprep.subr.bf16.mxu1 %v6141_v0  ;;  %3310 = vmatpush1.bf16.msra.mxu0 %v5765_v37  ;;  %v5829_v37 = vld [vmem:[#allocation11 + $0x618] ss:$12 sps:$4 sm:$0xff]  }
 0x54b   :  { %4127 = vmatprep.subr.bf16.mxu0 %v5771_v13  ;;  %v5832_v13 = vld [vmem:[#allocation11 + $0x558] ss:$12 sps:$4 sm:$0xff]  }
 0x54d   :  { %5355 = vmatpush3.bf16.msra.mxu1 %v5744_v7  ;;  %v5805_v7 = vld [vmem:[#allocation11 + $0x678] ss:$12 sps:$4 sm:$0xff]  }
 0x54e   :  { %5356 = vmatprep.subr.bf16.mxu1 %v6141_v0 }
 0x551   :  { %5357 = vmatpush3.bf16.msra.mxu1 %v5748_v46  ;;  %v5808_v46 = vld [vmem:[#allocation11 + $0x5b8] ss:$12 sps:$4 sm:$0xff]  }
 0x552   :  { %5358 = vmatprep.subr.bf16.mxu1 %v6141_v0 }
 0x555   :  { %5359 = vmatpush3.bf16.msra.mxu1 %v5752_v2  ;;  %v5819_v2 = vld [vmem:[#allocation11 + $0x64c] ss:$12 sps:$4 sm:$0xff]  }
 0x556   :  { %5360 = vmatprep.subr.bf16.mxu1 %v6141_v0 }
 0x559   :  { %5361 = vmatpush3.bf16.msra.mxu1 %v5756_v9  ;;  %v5822_v9 = vld [vmem:[#allocation11 + $0x58c] ss:$12 sps:$4 sm:$0xff]  }
 0x55a   :  { %5362 = vmatprep.subr.bf16.mxu1 %v6141_v0 }
 0x55d   :  { %5363 = vmatpush3.bf16.msra.mxu1 %v5760_v10  ;;  %v5823_v10 = vld [vmem:[#allocation11 + $0x630] ss:$12 sps:$4 sm:$0xff]  }
 0x55e   :  { %5364 = vmatprep.subr.bf16.mxu1 %v6141_v0 }
 0x561   :  { %5365 = vmatpush3.bf16.msra.mxu1 %v5764_v54  ;;  %v5826_v54 = vld [vmem:[#allocation11 + $0x570] ss:$12 sps:$4 sm:$0xff]  }
 0x562   :  { %5366 = vmatprep.subr.bf16.mxu1 %v6141_v0 }
 0x565   :  { %5367 = vmatpush3.bf16.msra.mxu1 %v5768_v57  ;;  %v5837_v57 = vld [vmem:[#allocation11 + $0x604] ss:$12 sps:$4 sm:$0xff]  }
 0x566   :  { %4170 = vmatprep.subr.bf16.mxu1 %v5795_v60 }
 0x5ed   :  { %v5146_v51 = vpop.f32.mrf.mxu0 }
 0x5ef   :  { %v5147_v14 = vpop.f32.mrf.mxu0 }
 0x5f0   :  { %v5148_v63 = vadd.f32 %v5147_v14, %v5146_v51  ;;  %v5835_v51 = vld [vmem:[#allocation11 + $0x600] ss:$12 sps:$4 sm:$0xff]   ;;  %v5840_v14 = vld [vmem:[#allocation11 + $0x544] ss:$12 sps:$4 sm:$0xff]  }
 0x5f1   :  { %v5149_v30 = vpop.f32.mrf.mxu0 }
 0x5f2   :  { %v3068_v21 = vadd.f32 %v5148_v63, %v4871_v19  ;;  %v3150_v63 = vld [vmem:[#allocation8 + $0x6] sm:$0x7] }
 0x5f3   :  { %v5150_v15 = vpop.f32.mrf.mxu0 }
 0x5f4   :  { %v5151_v17 = vadd.f32 %v5150_v15, %v5149_v30  ;;  %v5841_v30 = vld [vmem:[#allocation11 + $0x5f0] ss:$12 sps:$4 sm:$0xff]   ;;  %v5838_v15 = vld [vmem:[#allocation11 + $0x540] ss:$12 sps:$4 sm:$0xff]  }
 0x5f6   :  { %v3071_v59 = vadd.f32 %v5151_v17, %v4871_v19  ;;  %v3155_v17 = vrot.slane %v3150_v63, %v6254_v18  ;;  %v3163_v19 = vrot.slane %v3150_v63, %v6252_v16 }
 0x608   :  { %v3108_v62 = vpop.f32.mrf.mxu1 }
 0x609   :  { %v3109_v25 = vadd.f32 %v3108_v62, %v3068_v21 }
 0x60a   :  { %v5350_v20 = vpop.f32.mrf.mxu1 }
 0x60c   :  { %v3111_v27 = vpop.f32.mrf.mxu1 }
 0x60d   :  { %v3112_v29 = vadd.f32 %v3111_v27, %v3071_v59 }
 0x60e   :  { %v5351_v6 = vpop.f32.mrf.mxu1 }
 0x60f   :  { %v3115_v39 = vpack.c.bf16 %v3112_v29, %v3109_v25 }
 0x611   :  { %3328 = vmatmul.mubr.bf16.vlgmr.msra.gmra.mxu0 %v3115_v39  ;;  %5369 = vmatmul.mubr.bf16.vlgmr.msra.gmra.mxu1 %v3115_v39 }
 0x612   :  { %4128 = vmatpush1.bf16.msra.mxu0 %v5769_v32  ;;  %4202 = vmatprep.mubr.bf16.mxu1 %v6143_v1  ;;  %v5789_v1 = vld [vmem:[#allocation11 + $0x49c] ss:$12 sps:$4 sm:$0xff]  }
 0x613   :  { %4129 = vmatprep.subr.bf16.mxu0 %v5774_v40  ;;  %4171 = vmatpush1.bf16.msra.mxu1 %v5793_v61 }
 0x614   :  { %4172 = vmatprep.subr.bf16.mxu1 %v5801_v3 }
 0x616   :  { %4130 = vmatpush1.bf16.msra.mxu0 %v5772_v38 }
 0x617   :  { %4131 = vmatprep.subr.bf16.mxu0 %v5777_v43  ;;  %4173 = vmatpush1.bf16.msra.mxu1 %v5799_v42 }
 0x618   :  { %4174 = vmatprep.subr.bf16.mxu1 %v5807_v24 }
 0x61a   :  { %4132 = vmatpush1.bf16.msra.mxu0 %v5775_v44 }
 0x61b   :  { %4133 = vmatprep.subr.bf16.mxu0 %v5780_v45  ;;  %4175 = vmatpush1.bf16.msra.mxu1 %v5805_v7  ;;  %v6542_v45 = vrot.slane %v3150_v63, %v6262_v26 }
 0x61c   :  { %4176 = vmatprep.subr.bf16.mxu1 %v5813_v8 }
 0x61e   :  { %4134 = vmatpush1.bf16.msra.mxu0 %v5778_v47 }
 0x61f   :  { %4135 = vmatprep.subr.bf16.mxu0 %v5783_v49  ;;  %4177 = vmatpush1.bf16.msra.mxu1 %v5811_v48 }
 0x620   :  { %4178 = vmatprep.subr.bf16.mxu1 %v5819_v2 }
 0x622   :  { %4136 = vmatpush1.bf16.msra.mxu0 %v5781_v50 }
 0x623   :  { %4137 = vmatprep.subr.bf16.mxu0 %v5786_v52  ;;  %4179 = vmatpush1.bf16.msra.mxu1 %v5817_v4 }
 0x624   :  { %4180 = vmatprep.subr.bf16.mxu1 %v5825_v23 }
 0x626   :  { %4138 = vmatpush1.bf16.msra.mxu0 %v5784_v28 }
 0x627   :  { %4139 = vmatprep.subr.bf16.mxu0 %v5789_v1  ;;  %4181 = vmatpush1.bf16.msra.mxu1 %v5823_v10 }
 0x628   :  { %4182 = vmatprep.subr.bf16.mxu1 %v5831_v12 }
 0x62a   :  { %4140 = vmatpush1.bf16.msra.mxu0 %v5787_v53 }
 0x62b   :  { %4141 = vmatprep.subr.bf16.mxu0 %v5792_v58  ;;  %4183 = vmatpush1.bf16.msra.mxu1 %v5829_v37 }
 0x62c   :  { %4184 = vmatprep.subr.bf16.mxu1 %v5837_v57 }
 0x62e   :  { %4142 = vmatpush1.bf16.msra.mxu0 %v5790_v31 }
 0x62f   :  { %4143 = vmatprep.subr.bf16.mxu0 %v5798_v34  ;;  %4185 = vmatpush1.bf16.msra.mxu1 %v5835_v51 }
 0x630   :  { %5170 = vmatprep.subr.bf16.mxu1 %v5841_v30 }
 0x632   :  { %4144 = vmatpush2.bf16.msra.mxu0 %v5796_v56 }
 0x633   :  { %4145 = vmatprep.subr.bf16.mxu0 %v5804_v5 }
 0x636   :  { %4146 = vmatpush2.bf16.msra.mxu0 %v5802_v41 }
 0x637   :  { %4147 = vmatprep.subr.bf16.mxu0 %v5810_v55 }
 0x63a   :  { %4148 = vmatpush2.bf16.msra.mxu0 %v5808_v46 }
 0x63b   :  { %4149 = vmatprep.subr.bf16.mxu0 %v5816_v33 }
 0x63e   :  { %4150 = vmatpush2.bf16.msra.mxu0 %v5814_v35 }
 0x63f   :  { %4151 = vmatprep.subr.bf16.mxu0 %v5822_v9 }
 0x642   :  { %4152 = vmatpush2.bf16.msra.mxu0 %v5820_v36 }
 0x643   :  { %4153 = vmatprep.subr.bf16.mxu0 %v5828_v11 }
 0x646   :  { %4154 = vmatpush2.bf16.msra.mxu0 %v5826_v54 }
 0x647   :  { %4155 = vmatprep.subr.bf16.mxu0 %v5834_v22 }
 0x64a   :  { %4156 = vmatpush2.bf16.msra.mxu0 %v5832_v13 }
 0x64b   :  { %4157 = vmatprep.subr.bf16.mxu0 %v5840_v14 }
 0x64e   :  { %4158 = vmatpush2.bf16.msra.mxu0 %v5838_v15 }
 0x64f   :  { %5372 = vmatprep.subr.bf16.mxu0 %v6141_v0 }
 0x6d1   :  { %v3329_v62 = vpop.f32.mrf.mxu0  ;;  %v3372_v20 = vpop.f32.mrf.mxu1 }
 0x6d2   :  { %v6528_v21 = vadd.f32 %v3329_v62, %v3155_v17  ;;  %v6530_v59 = vadd.f32 %v3372_v20, %v3163_v19 }
 0x6d3   :  { %v3331_v27 = vpop.f32.mrf.mxu0  ;;  %v5370_v25 = vpop.f32.mrf.mxu1 }
 0x6d4   :  { %v3451_v29 = vmul.f32 0.0, %v6528_v21  ;;  %v3453_v6 = vmul.f32 0.0, %v6530_v59  ;;  %v3409_v43 = vmul.f32 %v6528_v21, %v6528_v21  ;;  %v3411_v1 = vmul.f32 %v6530_v59, %v6530_v59 }
 0x6d5   :  { %v3333_v32 = vpop.f32.mrf.mxu0  ;;  %v3375_v39 = vpop.f32.mrf.mxu1 }
 0x6d6   :  { %v6534_v40 = vadd.f32 %v3333_v32, %v3155_v17  ;;  %v6536_v38 = vadd.f32 %v3375_v39, %v3163_v19  ;;  %v3481_v44 = vmul.f32 %v3451_v29, %v6528_v21  ;;  %v3483_v53 = vmul.f32 %v3453_v6, %v6530_v59 }
 0x6d7   :  { %v5371_v47 = vpop.f32.mrf.mxu1 }
 0x6d8   :  { %v3382_v49 = vmul.f32 0.0, %v6534_v40  ;;  %v3457_v50 = vadd.f32 %v3451_v29, %v6534_v40  ;;  %v3484_v52 = vmul.f32 %v6534_v40, %v6534_v40  ;;  %v3384_v28 = vmul.f32 0.0, %v6536_v38 }
 0x6d9   :  { %v3471_v58 = vadd.f32 %v3453_v6, %v6536_v38  ;;  %v3486_v31 = vmul.f32 %v6536_v38, %v6536_v38  ;;  %v6560_v6 = vadd.f32 %v3331_v27, %v6542_v45 }
 0x6da   :  { %v3385_v60 = vadd.f32 %v3382_v49, %v6528_v21  ;;  %v3412_v61 = vmul.f32 %v3382_v49, %v6534_v40  ;;  %v3458_v34 = vrot.slane %v3457_v50, 4  ;;  %v3487_v56 = vadd.f32 %v3484_v52, %v3481_v44 }
 0x6db   :  { %v3399_v3 = vadd.f32 %v3384_v28, %v6530_v59  ;;  %v3414_v42 = vmul.f32 %v3384_v28, %v6536_v38  ;;  %v3472_v5 = vrot.slane %v3471_v58, 4  ;;  %v3501_v24 = vadd.f32 %v3486_v31, %v3483_v53 }
 0x6dc   :  { %v3386_v41 = vrot.slane %v3385_v60, 4  ;;  %v3415_v7 = vadd.f32 %v3412_v61, %v3409_v43  ;;  %v3459_v55 = vadd.f32 %v3458_v34, %v3457_v50  ;;  %v3488_v8 = vrot.slane %v3487_v56, 4  ;;  %v3335_v50 = vpop.f32.mrf.mxu0 }
 0x6dd   :  { %v3400_v46 = vrot.slane %v3399_v3, 4  ;;  %v3429_v48 = vadd.f32 %v3414_v42, %v3411_v1  ;;  %v3473_v33 = vadd.f32 %v3472_v5, %v3471_v58  ;;  %v3502_v2 = vrot.slane %v3501_v24, 4 }
 0x6de   :  { %v3387_v35 = vadd.f32 %v3386_v41, %v3385_v60  ;;  %v3416_v4 = vrot.slane %v3415_v7, 4  ;;  %v3460_v9 = vrot.slane %v3459_v55, 2  ;;  %v3489_v23 = vadd.f32 %v3488_v8, %v3487_v56 }
 0x6df   :  { %v3401_v36 = vadd.f32 %v3400_v46, %v3399_v3  ;;  %v3430_v10 = vrot.slane %v3429_v48, 4  ;;  %v3474_v11 = vrot.slane %v3473_v33, 2  ;;  %v3503_v12 = vadd.f32 %v3502_v2, %v3501_v24 }
 0x6e0   :  { %v3388_v54 = vrot.slane %v3387_v35, 2  ;;  %v3417_v37 = vadd.f32 %v3416_v4, %v3415_v7  ;;  %v3461_v22 = vadd.f32 %v3460_v9, %v3459_v55  ;;  %v3490_v57 = vrot.slane %v3489_v23, 2 }
 0x6e1   :  { %v3402_v13 = vrot.slane %v3401_v36, 2  ;;  %v3431_v51 = vadd.f32 %v3430_v10, %v3429_v48  ;;  %v3475_v14 = vadd.f32 %v3474_v11, %v3473_v33  ;;  %v3504_v30 = vrot.slane %v3503_v12, 2 }
 0x6e2   :  { %v3389_v15 = vadd.f32 %v3388_v54, %v3387_v35  ;;  %v3418_v63 = vrot.slane %v3417_v37, 2  ;;  %v3462_v17 = vrot.slane %v3461_v22, 1  ;;  %v3491_v19 = vadd.f32 %v3490_v57, %v3489_v23 }
 0x6e3   :  { %v3403_v62 = vadd.f32 %v3402_v13, %v3401_v36  ;;  %v3432_v20 = vrot.slane %v3431_v51, 2  ;;  %v3476_v25 = vrot.slane %v3475_v14, 1  ;;  %v3505_v29 = vadd.f32 %v3504_v30, %v3503_v12 }
 0x6e4   :  { %v3390_v32 = vrot.slane %v3389_v15, 1  ;;  %v3419_v39 = vadd.f32 %v3418_v63, %v3417_v37  ;;  %v3463_v1 = vadd.f32 %v3462_v17, %v3461_v22  ;;  %v3492_v53 = vrot.slane %v3491_v19, 1 }
 0x6e5   :  { %v3404_v43 = vrot.slane %v3403_v62, 1  ;;  %v3433_v44 = vadd.f32 %v3432_v20, %v3431_v51  ;;  %v3477_v47 = vadd.f32 %v3476_v25, %v3475_v14  ;;  %v3506_v49 = vrot.slane %v3505_v29, 1 }
 0x6e6   :  { %v3391_v52 = vadd.f32 %v3390_v32, %v3389_v15  ;;  %v3420_v28 = vrot.slane %v3419_v39, 1  ;;  %v6567_v56 = vadd.f32 %v3335_v50, %v6542_v45  ;;  %v3452_v41 = vmul.f32 0.0, %v6560_v6 }
 0x6e7   :  { %v3405_v58 = vadd.f32 %v3404_v43, %v3403_v62  ;;  %v3434_v31 = vrot.slane %v3433_v44, 1  ;;  %v6562_v60 = vmul.f32 0.125, %v3477_v47  ;;  %v3507_v61 = vadd.f32 %v3506_v49, %v3505_v29 }
 0x6e8   :  { %v6564_v34 = vmul.f32 0.125, %v3391_v52  ;;  %v3421_v27 = vadd.f32 %v3420_v28, %v3419_v39  ;;  %v3493_v7 = vadd.f32 %v3492_v53, %v3491_v19  ;;  %v6572_v55 = vmul.f32 0.125, %v3463_v1 }
 0x6e9   :  { %v3408_v3 = vmul.f32 0.125, %v3405_v58  ;;  %v3435_v42 = vadd.f32 %v3434_v31, %v3433_v44  ;;  %v3510_v5 = vmul.f32 0.125, %v3507_v61  ;;  %v3513_v24 = vmul.f32 %v6562_v60, %v6562_v60 }
 0x6ea   :  { %v3436_v33 = vmul.f32 0.125, %v3421_v27  ;;  %v3383_v2 = vmul.f32 0.0, %v6567_v56  ;;  %v3439_v45 = vmul.f32 %v6564_v34, %v6564_v34  ;;  %v3464_v9 = vadd.f32 %v3452_v41, %v6567_v56 }
 0x6eb   :  { %v3438_v8 = vmul.f32 0.125, %v3435_v42  ;;  %v3441_v46 = vmul.f32 %v3408_v3, %v3408_v3  ;;  %v3516_v48 = vsub.f32 %v3510_v5, %v3513_v24  ;;  %v3410_v23 = vmul.f32 %v6560_v6, %v6560_v6  ;;  %v6588_v24 = vld [vmem:[#allocation10 + $0x6] sm:$0x7] }
 0x6ec   :  { %v3508_v36 = vmul.f32 0.125, %v3493_v7  ;;  %v3392_v10 = vadd.f32 %v3383_v2, %v6560_v6  ;;  %v3511_v11 = vmul.f32 %v6572_v55, %v6572_v55  ;;  %v3413_v54 = vmul.f32 %v3383_v2, %v6567_v56 }
 0x6ed   :  { %v3444_v35 = vsub.f32 %v3438_v8, %v3441_v46  ;;  %v3519_v4 = vadd.f32 1e-05, %v3516_v48  ;;  %v3482_v37 = vmul.f32 %v3452_v41, %v6560_v6  ;;  %v3465_v57 = vrot.slane %v3464_v9, 4 }
 0x6ee   :  { %v3393_v22 = vrot.slane %v3392_v10, 4  ;;  %v3485_v13 = vmul.f32 %v6567_v56, %v6567_v56  ;;  %v3442_v51 = vsub.f32 %v3436_v33, %v3439_v45  ;;  %v3422_v14 = vadd.f32 %v3413_v54, %v3410_v23  ;;  %v6594_v45 = vld [vmem:[%s6655_s5 + $0x6] sm:$0x7] }
 0x6ef   :  { %v3447_v12 = vadd.f32 1e-05, %v3444_v35  ;;  %5913 = vrsqrt.f32 %v3519_v4  ;;  %v3466_v15 = vadd.f32 %v3465_v57, %v3464_v9  ;;  %v3514_v17 = vsub.f32 %v3508_v36, %v3511_v11 }
 0x6f0   :  { %v3394_v30 = vadd.f32 %v3393_v22, %v3392_v10  ;;  %v3494_v63 = vadd.f32 %v3485_v13, %v3482_v37  ;;  %v3423_v19 = vrot.slane %v3422_v14, 4  ;;  %v3445_v29 = vadd.f32 1e-05, %v3442_v51 }
 0x6f1   :  { %5915 = vrsqrt.f32 %v3447_v12  ;;  %v3467_v20 = vrot.slane %v3466_v15, 2  ;;  %v3517_v47 = vadd.f32 1e-05, %v3514_v17  ;;  %v3531_v50 = vmul.f32 0.0, %v6562_v60 }
 0x6f2   :  { %v3395_v62 = vrot.slane %v3394_v30, 2  ;;  %v3495_v25 = vrot.slane %v3494_v63, 4  ;;  %v3424_v32 = vadd.f32 %v3423_v19, %v3422_v14  ;;  %5917 = vrsqrt.f32 %v3445_v29 }
 0x6f3   :  { %v3468_v43 = vadd.f32 %v3467_v20, %v3466_v15  ;;  %v3528_v53 = vmul.f32 0.0, %v3408_v3  ;;  %5919 = vrsqrt.f32 %v3517_v47  ;;  %v3537_v5 = vadd.f32 %v3531_v50, %v3408_v3  ;;  %v5843_v50 = vld [vmem:[#allocation11 + $0x5d8] ss:$12 sps:$4 sm:$0xff]  }
 0x6f4   :  { %v3396_v39 = vadd.f32 %v3395_v62, %v3394_v30  ;;  %v3496_v44 = vadd.f32 %v3495_v25, %v3494_v63  ;;  %v3425_v49 = vrot.slane %v3424_v32, 2  ;;  %v3585_v3 = vrot.slane %v6588_v24, %v6252_v16 }
 0x6f5   :  { %v3469_v28 = vrot.slane %v3468_v43, 1  ;;  %v3540_v48 = vadd.f32 %v3528_v53, %v6562_v60  ;;  %v3561_v12 = vsub.f32 %v6530_v59, %v3537_v5  ;;  %v3609_v54 = vrot.slane %v6594_v45, %v6252_v16 }
 0x6f6   :  { %v3397_v52 = vrot.slane %v3396_v39, 1  ;;  %v3497_v1 = vrot.slane %v3496_v44, 2  ;;  %v3426_v58 = vadd.f32 %v3425_v49, %v3424_v32  ;;  %v3526_v59 = vmul.f32 0.0, %v6564_v34 }
 0x6f7   :  { %v3470_v31 = vadd.f32 %v3469_v28, %v3468_v43  ;;  %v3564_v37 = vsub.f32 %v6536_v38, %v3540_v48  ;;  %v3529_v38 = vmul.f32 0.0, %v6572_v55  ;;  %v5842_v43 = vld [vmem:[#allocation11 + $0x530] ss:$12 sps:$4 sm:$0xff]   ;;  %v5848_v48 = vld [vmem:[#allocation11 + $0x500] ss:$12 sps:$4 sm:$0xff]  }
 0x6f8   :  { %v3498_v61 = vadd.f32 %v3497_v1, %v3496_v44  ;;  %v3398_v27 = vadd.f32 %v3397_v52, %v3396_v39  ;;  %v3427_v42 = vrot.slane %v3426_v58, 1  ;;  %v3538_v44 = vadd.f32 %v3526_v59, %v6572_v55  ;;  %v5844_v59 = vld [vmem:[#allocation11 + $0x6b0] ss:$12 sps:$4 sm:$0xff]  }
 0x6f9   :  { %v3479_v46 = vmul.f32 0.125, %v3470_v31  ;;  %v3535_v28 = vadd.f32 %v3529_v38, %v6564_v34  ;;  %v5863_v38 = vld [vmem:[#allocation11 + $0x488] ss:$12 sps:$4 sm:$0xff]  }
 0x6fa   :  { %v3499_v7 = vrot.slane %v3498_v61, 1  ;;  %v3407_v8 = vmul.f32 0.125, %v3398_v27  ;;  %v3428_v33 = vadd.f32 %v3427_v42, %v3426_v58  ;;  %v5845_v58 = vld [vmem:[#allocation11 + $0x518] ss:$12 sps:$4 sm:$0xff]   ;;  %v3562_v31 = vsub.f32 %v6534_v40, %v3538_v44  ;;  %v5846_v27 = vld [vmem:[#allocation11 + $0x5c0] ss:$12 sps:$4 sm:$0xff]  }
 0x6fb   :  { %v3512_v23 = vmul.f32 %v3479_v46, %v3479_v46  ;;  %v3530_v53 = vmul.f32 0.0, %v3479_v46  ;;  %v3559_v55 = vsub.f32 %v6528_v21, %v3535_v28  ;;  %v5866_v44 = vld [vmem:[#allocation14 + $0x1b8] sm:$0xff]   ;;  %v5856_v28 = vld [vmem:[#allocation11 + $0x650] ss:$12 sps:$4 sm:$0xff]  }
 0x6fc   :  { %v5914_v41 = vpop.eup %5913  ;;  %v3500_v4 = vadd.f32 %v3499_v7, %v3498_v61  ;;  %v3440_v9 = vmul.f32 %v3407_v8, %v3407_v8  ;;  %v3437_v36 = vmul.f32 0.125, %v3428_v33  ;;  %v3527_v52 = vmul.f32 0.0, %v3407_v8 }
 0x6fd   :  { %v3549_v2 = vmul.f32 0.0, %v5914_v41  ;;  %v3536_v7 = vadd.f32 %v3530_v53, %v3407_v8  ;;  %v3581_v8 = vrot.slane %v6588_v24, %v6262_v26  ;;  %v5870_v53 = vld [vmem:[#allocation14 + $0x1a8] sm:$0xff]  }
 0x6fe   :  { %v5916_v35 = vpop.eup %5915  ;;  %v3509_v60 = vmul.f32 0.125, %v3500_v4  ;;  %v3443_v13 = vsub.f32 %v3437_v36, %v3440_v9  ;;  %v3539_v42 = vadd.f32 %v3527_v52, %v3479_v46  ;;  %v5849_v4 = vld [vmem:[#allocation11 + $0x5a8] ss:$12 sps:$4 sm:$0xff]   ;;  %v5868_v52 = vld [vmem:[#allocation14 + $0x1b0] sm:$0xff]  }
 0x6ff   :  { %v3546_v10 = vmul.f32 0.0, %v5916_v35  ;;  %v3555_v11 = vadd.f32 %v5916_v35, %v3549_v2  ;;  %v5918_v62 = vpop.eup %5917  ;;  %v3577_v35 = vrot.slane %v6588_v24, %v6254_v18  ;;  %v3560_v21 = vsub.f32 %v6560_v6, %v3536_v7  ;;  %v5851_v36 = vld [vmem:[#allocation11 + $0x4e8] ss:$12 sps:$4 sm:$0xff]   ;;  %v5854_v6 = vld [vmem:[#allocation11 + $0x4d0] ss:$12 sps:$4 sm:$0xff]  }
 0x700   :  { %v3515_v51 = vsub.f32 %v3509_v60, %v3512_v23  ;;  %v3446_v15 = vadd.f32 1e-05, %v3443_v13  ;;  %v5920_v25 = vpop.eup %5919  ;;  %v3544_v39 = vmul.f32 0.0, %v5918_v62  ;;  %v3563_v9 = vsub.f32 %v6567_v56, %v3539_v42  ;;  %v5852_v60 = vld [vmem:[#allocation11 + $0x590] ss:$12 sps:$4 sm:$0xff]  }
 0x701   :  { %v3558_v22 = vadd.f32 %v5914_v41, %v3546_v10  ;;  %v3567_v57 = vmul.f32 %v3561_v12, %v3555_v11  ;;  %v3547_v49 = vmul.f32 0.0, %v5920_v25  ;;  %v3601_v12 = vrot.slane %v6594_v45, %v6254_v18  ;;  %v5872_v42 = vld [vmem:[#allocation14 + $0x1a0] sm:$0xff]   ;;  %v5876_v7 = vld [vmem:[#allocation14 + $0x190] sm:$0xff]  }
 0x702   :  { %v3518_v63 = vadd.f32 1e-05, %v3515_v51  ;;  %5921 = vrsqrt.f32 %v3446_v15  ;;  %v3556_v1 = vadd.f32 %v5920_v25, %v3544_v39  ;;  %v3605_v56 = vrot.slane %v6594_v45, %v6262_v26  ;;  %v5855_v51 = vld [vmem:[#allocation11 + $0x578] ss:$12 sps:$4 sm:$0xff]   ;;  %v5858_v45 = vld [vmem:[#allocation11 + $0x560] ss:$12 sps:$4 sm:$0xff]  }
 0x703   :  { %v3570_v14 = vmul.f32 %v3564_v37, %v3558_v22  ;;  %v3591_v30 = vmul.f32 %v3585_v3, %v3567_v57  ;;  %v3553_v61 = vadd.f32 %v5918_v62, %v3547_v49  ;;  %v5860_v25 = vld [vmem:[#allocation11 + $0x4a0] ss:$12 sps:$4 sm:$0xff]   ;;  %v5853_v49 = vld [vmem:[#allocation11 + $0x668] ss:$12 sps:$4 sm:$0xff]  }
 0x704   :  { %5923 = vrsqrt.f32 %v3518_v63  ;;  %v3568_v5 = vmul.f32 %v3562_v31, %v3556_v1  ;;  %v5850_v39 = vld [vmem:[#allocation11 + $0x680] ss:$12 sps:$4 sm:$0xff]   ;;  %v5869_v1 = vld [vmem:[#allocation14 + $0x1e8] sm:$0xff]  }
 0x705   :  { %v3594_v17 = vmul.f32 %v3585_v3, %v3570_v14  ;;  %v3615_v19 = vadd.f32 %v3609_v54, %v3591_v30  ;;  %v3565_v34 = vmul.f32 %v3559_v55, %v3553_v61  ;;  %v5871_v31 = vld [vmem:[#allocation14 + $0x1e0] sm:$0xff]   ;;  %v5873_v55 = vld [vmem:[#allocation14 + $0x1d8] sm:$0xff]  }
 0x706   :  { %v3592_v46 = vmul.f32 %v3577_v35, %v3568_v5  ;;  %v5862_v61 = vld [vmem:[#allocation11 + $0x620] ss:$12 sps:$4 sm:$0xff]  }
 0x707   :  { %v3618_v20 = vadd.f32 %v3609_v54, %v3594_v17  ;;  %v3621_v29 = vmax.f32 %v3615_v19, 0.0  ;;  %v3589_v11 = vmul.f32 %v3577_v35, %v3565_v34  ;;  %v5857_v19 = vld [vmem:[#allocation11 + $0x4b8] ss:$12 sps:$4 sm:$0xff]   ;;  %v5880_v34 = vld [vmem:[#allocation14 + $0x180] sm:$0xff]  }
 0x708   :  { %v3616_v22 = vadd.f32 %v3601_v12, %v3592_v46  ;;  %v5874_v5 = vld [vmem:[#allocation14 + $0x198] sm:$0xff]   ;;  %v5882_v35 = vld [vmem:[#allocation14 + $0x230] sm:$0xff]   ;;  %v5887_v46 = vld [vmem:[#allocation14 + $0x208] sm:$0xff]  }
 0x709   :  { %v3624_v32 = vmax.f32 %v3618_v20, 0.0  ;;  %v3613_v24 = vadd.f32 %v3601_v12, %v3589_v11 }
 0x70a   :  { %v3622_v15 = vmax.f32 %v3616_v22, 0.0 }
 0x70b   :  { %v6605_v47 = vpack.c.bf16 %v3624_v32, %v3621_v29  ;;  %v3619_v17 = vmax.f32 %v3613_v24, 0.0  ;;  %v5847_v29 = vld [vmem:[#allocation11 + $0x698] ss:$12 sps:$4 sm:$0xff]   ;;  %v5861_v32 = vld [vmem:[#allocation11 + $0x548] ss:$12 sps:$4 sm:$0xff]  }
 0x70d   :  { %4203 = vmatmul.mubr.bf16.vlgmr.msra.gmra.mxu1 %v6605_v47  ;;  %v3625_v20 = vpack.c.bf16 %v3622_v15, %v3619_v17 }
 0x70e   :  { %5171 = vmatpush3.bf16.msra.mxu1 %v5842_v43  ;;  %v5865_v43 = vld [vmem:[#allocation14 + $0x1f8] sm:$0xff]  }
 0x70f   :  { %5172 = vmatprep.subr.bf16.mxu1 %v5843_v50  ;;  %v5922_v41 = vpop.eup %5921  ;;  %v5867_v50 = vld [vmem:[#allocation14 + $0x1f0] sm:$0xff]  }
 0x710   :  { %v3545_v2 = vmul.f32 0.0, %v5922_v41 }
 0x711   :  { %v5924_v33 = vpop.eup %5923 }
 0x712   :  { %5173 = vmatpush3.bf16.msra.mxu1 %v5845_v58  ;;  %v3548_v40 = vmul.f32 0.0, %v5924_v33  ;;  %v3557_v3 = vadd.f32 %v5924_v33, %v3545_v2  ;;  %v5859_v58 = vld [vmem:[#allocation11 + $0x638] ss:$12 sps:$4 sm:$0xff]   ;;  %v5879_v2 = vld [vmem:[#allocation14 + $0x1c0] sm:$0xff]  }
 0x713   :  { %5174 = vmatprep.subr.bf16.mxu1 %v5846_v27  ;;  %v5864_v27 = vld [vmem:[#allocation11 + $0x608] ss:$12 sps:$4 sm:$0xff]  }
 0x714   :  { %v3554_v23 = vadd.f32 %v5922_v41, %v3548_v40  ;;  %v3569_v10 = vmul.f32 %v3563_v9, %v3557_v3  ;;  %v5875_v41 = vld [vmem:[#allocation14 + $0x1d0] sm:$0xff]   ;;  %v5878_v33 = vld [vmem:[#allocation14 + $0x188] sm:$0xff]   ;;  %v5884_v40 = vld [vmem:[#allocation14 + $0x220] sm:$0xff]  }
 0x715   :  { %v5885_v3 = vld [vmem:[#allocation14 + $0x218] sm:$0xff]   ;;  %v5886_v9 = vld [vmem:[#allocation14 + $0x210] sm:$0xff]  }
 0x716   :  { %5175 = vmatpush3.bf16.msra.mxu1 %v5848_v48  ;;  %v3566_v54 = vmul.f32 %v3560_v21, %v3554_v23  ;;  %v3593_v37 = vmul.f32 %v3581_v8, %v3569_v10  ;;  %v5877_v48 = vld [vmem:[#allocation14 + $0x1c8] sm:$0xff]   ;;  %v5888_v23 = vld [vmem:[#allocation14 + $0x200] sm:$0xff]  }
 0x717   :  { %5176 = vmatprep.subr.bf16.mxu1 %v5849_v4  ;;  %v5883_v4 = vld [vmem:[#allocation14 + $0x228] sm:$0xff]  }
 0x718   :  { %v3590_v57 = vmul.f32 %v3581_v8, %v3566_v54  ;;  %v3617_v13 = vadd.f32 %v3605_v56, %v3593_v37  ;;  %v3726_v8 = vld [vmem:[#allocation13 + $0x6] sm:$0x7] }
 0x719   :  { %v3731_v11 = vrot.slane %v3726_v8, %v6254_v18 }
 0x71a   :  { %5177 = vmatpush3.bf16.msra.mxu1 %v5851_v36  ;;  %v3614_v14 = vadd.f32 %v3605_v56, %v3590_v57  ;;  %v3623_v30 = vmax.f32 %v3617_v13, 0.0  ;;  %v3735_v36 = vrot.slane %v3726_v8, %v6262_v26 }
 0x71b   :  { %5178 = vmatprep.subr.bf16.mxu1 %v5852_v60 }
 0x71c   :  { %v3620_v63 = vmax.f32 %v3614_v14, 0.0 }
 0x71e   :  { %5179 = vmatpush3.bf16.msra.mxu1 %v5854_v6  ;;  %v3626_v62 = vpack.c.bf16 %v3623_v30, %v3620_v63 }
 0x71f   :  { %5180 = vmatprep.subr.bf16.mxu1 %v5855_v51 }
 0x720   :  { %4159 = vmatprep.mubr.bf16.mxu0 %v3626_v62  ;;  %4245 = vmatprep.mubr.bf16.mxu1 %v3626_v62 }
 0x721   :  { %4160 = vmatmul.mubr.bf16.vlgmr.msra.gmra.mxu0 %v3625_v20 }
 0x722   :  { %5181 = vmatpush3.bf16.msra.mxu1 %v5857_v19  ;;  %5373 = vmatpush3.bf16.msra.mxu0 %v5844_v59 }
 0x723   :  { %5182 = vmatprep.subr.bf16.mxu1 %v5858_v45  ;;  %5374 = vmatprep.subr.bf16.mxu0 %v6141_v0 }
 0x724   :  { %5388 = vmatprep.mubr.msk.bf16.mxu0 %vm6142_vm0, %v6141_v0 }
 0x726   :  { %5183 = vmatpush3.bf16.msra.mxu1 %v5860_v25  ;;  %5375 = vmatpush3.bf16.msra.mxu0 %v5847_v29  ;;  %v3739_v29 = vrot.slane %v3726_v8, %v6252_v16 }
 0x727   :  { %5184 = vmatprep.subr.bf16.mxu1 %v5861_v32  ;;  %5376 = vmatprep.subr.bf16.mxu0 %v6141_v0 }
 0x72a   :  { %5185 = vmatpush3.bf16.msra.mxu1 %v5863_v38  ;;  %5377 = vmatpush3.bf16.msra.mxu0 %v5850_v39 }
 0x72b   :  { %5201 = vmatprep.subr.bf16.mxu1 %v5865_v43  ;;  %5378 = vmatprep.subr.bf16.mxu0 %v6141_v0 }
 0x72d   :  { %4246 = vmatmul.mubr.bf16.vlgmr.msra.gmra.mxu1 %v3625_v20 }
 0x72e   :  { %5202 = vmatpush3.bf16.msra.mxu1 %v5866_v44  ;;  %5379 = vmatpush3.bf16.msra.mxu0 %v5853_v49 }
 0x72f   :  { %5203 = vmatprep.subr.bf16.mxu1 %v5867_v50  ;;  %5380 = vmatprep.subr.bf16.mxu0 %v6141_v0 }
 0x732   :  { %5204 = vmatpush3.bf16.msra.mxu1 %v5868_v52  ;;  %5381 = vmatpush3.bf16.msra.mxu0 %v5856_v28 }
 0x733   :  { %5205 = vmatprep.subr.bf16.mxu1 %v5869_v1  ;;  %5382 = vmatprep.subr.bf16.mxu0 %v6141_v0 }
 0x736   :  { %5206 = vmatpush3.bf16.msra.mxu1 %v5870_v53  ;;  %5383 = vmatpush3.bf16.msra.mxu0 %v5859_v58 }
 0x737   :  { %5207 = vmatprep.subr.bf16.mxu1 %v5871_v31  ;;  %5384 = vmatprep.subr.bf16.mxu0 %v6141_v0  ;;  %v146_v31 = vld [vmem:[#allocation5] sm:$0xff] }
 0x73a   :  { %5385 = vmatpush3.bf16.msra.mxu0 %v5862_v61  ;;  %5208 = vmatpush3.bf16.msra.mxu1 %v5872_v42  ;;  %v4599_v61 = vmul.f32 %v146_v31, %v146_v31 }
 0x73b   :  { %5386 = vmatprep.subr.bf16.mxu0 %v6141_v0  ;;  %5209 = vmatprep.subr.bf16.mxu1 %v5873_v55 }
 0x73c   :  { %4601 = vadd.xlane.f32.xlu1 %v4599_v61 }
 0x73e   :  { %5387 = vmatpush3.bf16.msra.mxu0 %v5864_v27  ;;  %5210 = vmatpush3.bf16.msra.mxu1 %v5874_v5  ;;  %v147_v27 = vld [vmem:[#allocation5 + $0x8] sm:$0xff] }
 0x73f   :  { %5392 = vmatprep.subr.bf16.mxu0 %v6141_v0  ;;  %5211 = vmatprep.subr.bf16.mxu1 %v5875_v41  ;;  %v4600_v42 = vmul.f32 %v147_v27, %v147_v27 }
 0x741   :  { %5389 = vmatmul.mubr.bf16.vlgmr.msra.gmra.mxu0 %v6605_v47  ;;  %v5881_v47 = vld [vmem:[#allocation14 + $0x238] sm:$0xff]   ;;  %4603 = vadd.xlane.f32.xlu1 %v4600_v42 }
 0x742   :  { %5408 = vmatprep.mubr.msk.bf16.mxu0 %vm6142_vm0, %v6141_v0  ;;  %5212 = vmatpush3.bf16.msra.mxu1 %v5876_v7 }
 0x743   :  { %5213 = vmatprep.subr.bf16.mxu1 %v5877_v48  ;;  %5393 = vmatpush3.bf16.msra.mxu0 %v5881_v47  ;;  %v4994_v48 = vld [vmem:[%s6659_s9 + $0x2] ss:$0 sm:$0xff]  ;;  %s6144_s9 = smov [#allocation16]  }
 0x744   :  { %5394 = vmatprep.subr.bf16.mxu0 %v6141_v0  ;;  %s4637_s26 = sshll.u32 %s6144_s9, 4  ;;  %s4638_s26 = int_to_ptr.vmem [resolvable:$true] %s4637_s26 }
 0x745   :  { %s6093_s27 = scalar_lea.vmem %s4638_s26, 128  ;;  %p6098_p13 = scmp.lt.s32.totalorder %s4638_s26, %s4638_s26 }
 0x746   :  { %5214 = vmatpush3.bf16.msra.mxu1 %v5878_v33  ;;  %p6094_p12 = scmp.ne.s32.totalorder %s4638_s26, %s6093_s27  ;;  %p6099_p0 = scmp.lt.s32.totalorder %s6093_s27, %s6093_s27 }
 0x747   :  { %5215 = vmatprep.subr.bf16.mxu1 %v5879_v2  ;;  %5395 = vmatpush3.bf16.msra.mxu0 %v5882_v35 }
 0x748   :  { %5396 = vmatprep.subr.bf16.mxu0 %v6141_v0  ;;  %p6100_p1 = por %p6099_p0, %p6098_p13 }
 0x74a   :  { %5216 = vmatpush3.bf16.msra.mxu1 %v5880_v34  ;;  %p6101_p2 = pnand %p6100_p1, %p6094_p12 }
 0x74b   :  { %5397 = vmatpush3.bf16.msra.mxu0 %v5883_v4 }
 0x74c   :  { %5398 = vmatprep.subr.bf16.mxu0 %v6141_v0 }
 0x74f   :  { %5399 = vmatpush3.bf16.msra.mxu0 %v5884_v40 }
 0x750   :  { %5400 = vmatprep.subr.bf16.mxu0 %v6141_v0 }
 0x753   :  { %5401 = vmatpush3.bf16.msra.mxu0 %v5885_v3 }
 0x754   :  { %5402 = vmatprep.subr.bf16.mxu0 %v6141_v0 }
 0x757   :  { %5403 = vmatpush3.bf16.msra.mxu0 %v5886_v9 }
 0x758   :  { %5404 = vmatprep.subr.bf16.mxu0 %v6141_v0 }
 0x75b   :  { %5405 = vmatpush3.bf16.msra.mxu0 %v5887_v46 }
 0x75c   :  { %5406 = vmatprep.subr.bf16.mxu0 %v6141_v0 }
 0x75f   :  { %5407 = vmatpush3.bf16.msra.mxu0 %v5888_v23 }
 0x7cd   :  { %v4204_v21 = vpop.f32.mrf.mxu1 }
 0x7cf   :  { %v4206_v10 = vpop.f32.mrf.mxu1 }
 0x7d1   :  { %v4208_v37 = vpop.f32.mrf.mxu1 }
 0x7d3   :  { %v4210_v14 = vpop.f32.mrf.mxu1 }
 0x7e1   :  { %v4161_v12 = vpop.f32.mrf.mxu0 }
 0x7e2   :  { %v4162_v56 = vadd.f32 %v4161_v12, %v3731_v11 }
 0x7e3   :  { %v4163_v60 = vpop.f32.mrf.mxu0 }
 0x7e4   :  { %v4164_v54 = vadd.f32 %v4163_v60, %v3735_v36  ;;  %v4205_v51 = vadd.f32 %v4204_v21, %v4162_v56  ;;  %v4602_v21 = vpop.xlane.xlu1 %4601 }
 0x7e5   :  { %v4165_v22 = vpop.f32.mrf.mxu0  ;;  %v4605_v8 = vmax.f32 %v4602_v21, 1e-24 }
 0x7e6   :  { %v4166_v57 = vadd.f32 %v4165_v22, %v3731_v11  ;;  %v4207_v13 = vadd.f32 %v4206_v10, %v4164_v54  ;;  %v4295_v17 = vmax.f32 %v4205_v51, 0.0 }
 0x7e7   :  { %v4167_v6 = vpop.f32.mrf.mxu0  ;;  %5925 = vrsqrt.f32 %v4605_v8 }
 0x7e8   :  { %v4209_v24 = vadd.f32 %v4208_v37, %v4166_v57  ;;  %v4168_v0 = vadd.f32 %v4167_v6, %v3735_v36  ;;  %v4296_v63 = vmax.f32 %v4207_v13, 0.0  ;;  %v4604_v36 = vpop.xlane.xlu1 %4603 }
 0x7e9   :  { %v4606_v10 = vmax.f32 %v4604_v36, 1e-24 }
 0x7ea   :  { %v4211_v30 = vadd.f32 %v4210_v14, %v4168_v0  ;;  %v4298_v15 = vmax.f32 %v4209_v24, 0.0 }
 0x7eb   :  { %5927 = vrsqrt.f32 %v4606_v10 }
 0x7ec   :  { %v4299_v26 = vmax.f32 %v4211_v30, 0.0  ;;  %v4301_v18 = vpack.c.bf16 %v4298_v15, %v4295_v17 }
 0x7ed   :  { %v5186_v62 = vpop.f32.mrf.mxu1 }
 0x7ee   :  { %v4302_v19 = vpack.c.bf16 %v4299_v26, %v4296_v63 }
 0x7ef   :  { %v5187_v59 = vpop.f32.mrf.mxu1 }
 0x7f0   :  { %4537 = vmatprep.mubr.bf16.mxu1 %v4302_v19  ;;  %v5188_v25 = vadd.f32 %v5187_v59, %v5186_v62 }
 0x7f1   :  { %4538 = vmatmul.mubr.bf16.vlgmr.msra.gmra.mxu1 %v4301_v18  ;;  %v5189_v45 = vpop.f32.mrf.mxu1 }
 0x7f2   :  { %v4248_v38 = vadd.f32 %v5188_v25, %v3739_v29 }
 0x7f3   :  { %v5190_v20 = vpop.f32.mrf.mxu1 }
 0x7f4   :  { %v5191_v32 = vadd.f32 %v5190_v20, %v5189_v45  ;;  %v5926_v56 = vpop.eup %5925 }
 0x7f5   :  { %v4609_v22 = vmul.f32 %v5926_v56, %v146_v31 }
 0x7f6   :  { %v4251_v43 = vadd.f32 %v5191_v32, %v3739_v29 }
 0x7f8   :  { %v5928_v37 = vpop.eup %5927 }
 0x7f9   :  { %v4610_v24 = vmul.f32 %v5928_v37, %v147_v27 }
 0x801   :  { %v4288_v39 = vpop.f32.mrf.mxu0 }
 0x802   :  { %v4289_v49 = vadd.f32 %v4288_v39, %v4248_v38 }
 0x803   :  { %v5390_v44 = vpop.f32.mrf.mxu0 }
 0x804   :  { %v4297_v1 = vmax.f32 %v4289_v49, 0.0 }
 0x805   :  { %v4291_v50 = vpop.f32.mrf.mxu0 }
 0x806   :  { %v4292_v52 = vadd.f32 %v4291_v50, %v4251_v43 }
 0x807   :  { %v5391_v28 = vpop.f32.mrf.mxu0 }
 0x808   :  { %v4300_v53 = vmax.f32 %v4292_v52, 0.0 }
 0x80a   :  { %v4303_v58 = vpack.c.bf16 %v4300_v53, %v4297_v1 }
 0x80c   :  { %5409 = vmatmul.mubr.bf16.vlgmr.msra.gmra.mxu0 %v4303_v58 }
 0x8b1   :  { %v5217_v16 = vpop.f32.mrf.mxu1 }
 0x8b3   :  { %v5218_v55 = vpop.f32.mrf.mxu1 }
 0x8b4   :  { %v5219_v41 = vadd.f32 %v5218_v55, %v5217_v16 }
 0x8b5   :  { %v5220_v5 = vpop.f32.mrf.mxu1 }
 0x8b6   :  { %v4540_v2 = vadd.f32 %v5219_v41, %v4994_v48 }
 0x8b7   :  { %v5221_v7 = vpop.f32.mrf.mxu1 }
 0x8b8   :  { %v5222_v33 = vadd.f32 %v5221_v7, %v5220_v5 }
 0x8ba   :  { %v4543_v4 = vadd.f32 %v5222_v33, %v4994_v48 }
 0x8cc   :  { %v4580_v34 = vpop.f32.mrf.mxu0 }
 0x8cd   :  { %v4581_v47 = vadd.f32 %v4580_v34, %v4540_v2 }
 0x8ce   :  { %v5410_v35 = vpop.f32.mrf.mxu0 }
 0x8cf   :  { %v4587_v40 = vmul.f32 %v4581_v47, %v4581_v47 }
 0x8d0   :  { %v4583_v3 = vpop.f32.mrf.mxu0 }
 0x8d1   :  { %v4584_v9 = vadd.f32 %v4583_v3, %v4543_v4  ;;  %4589 = vadd.xlane.f32.xlu0 %v4587_v40 }
 0x8d2   :  { %v5411_v46 = vpop.f32.mrf.mxu0 }
 0x8d3   :  { %v4588_v23 = vmul.f32 %v4584_v9, %v4584_v9 }
 0x8d5   :  { %4591 = vadd.xlane.f32.xlu0 %v4588_v23 }
 0x95a   :  { %v4590_v11 = vpop.xlane.xlu0 %4589 }
 0x95b   :  { %v4593_v12 = vmax.f32 %v4590_v11, 1e-24 }
 0x95d   :  { %5929 = vrsqrt.f32 %v4593_v12 }
 0x95e   :  { %v4592_v60 = vpop.xlane.xlu0 %4591 }
 0x95f   :  { %v4594_v54 = vmax.f32 %v4592_v60, 1e-24 }
 0x961   :  { %5931 = vrsqrt.f32 %v4594_v54 }
 0x96a   :  { %v5930_v57 = vpop.eup %5929 }
 0x96b   :  { %v4597_v6 = vmul.f32 %v5930_v57, %v4581_v47 }
 0x96d   :  { %v4611_v13 = vmul.f32 %v4609_v22, %v4597_v6 }
 0x96e   :  { %v5932_v0 = vpop.eup %5931 }
 0x96f   :  { %4613 = vadd.xlane.f32.xlu0 %v4611_v13  ;;  %v4598_v51 = vmul.f32 %v5932_v0, %v4584_v9 }
 0x971   :  { %v4612_v14 = vmul.f32 %v4610_v24, %v4598_v51 }
 0x973   :  { %4615 = vadd.xlane.f32.xlu1 %v4612_v14 }
 0x9f8   :  { %v4614_v30 = vpop.xlane.xlu0 %4613 }
 0x9f9   :  { %v4617_v15 = vmul.f32 2.0, %v4614_v30 }
 0x9fb   :  { %v4619_v17 = vsub.f32 2.0, %v4617_v15 }
 0x9fc   :  { %v4616_v63 = vpop.xlane.xlu1 %4615 }
 0x9fd   :  { %v4618_v26 = vmul.f32 2.0, %v4616_v63 }
 0x9ff   :  { %v4620_v19 = vsub.f32 2.0, %v4618_v26 }
 0xa01   :  { %v4623_v18 = vadd.f32 %v4620_v19, %v4619_v17 }
 0xa03   :  { %v4624_v62 = vrot.slane %v4623_v18, 4 }
 0xa05   :  { %v4625_v59 = vadd.f32 %v4624_v62, %v4623_v18 }
 0xa07   :  { %v4626_v45 = vrot.slane %v4625_v59, 2 }
 0xa09   :  { %v4627_v20 = vadd.f32 %v4626_v45, %v4625_v59 }
 0xa0b   :  { %v4628_v25 = vrot.slane %v4627_v20, 1 }
 0xa0d   :  { %v4629_v29 = vadd.f32 %v4628_v25, %v4627_v20 }
 0xa0f   :  { %4630 = vst [vmem:[#allocation16] sm:$0xff] %v4629_v29 }
 0xa10   :  { %6104 = shalt.err (!%p6101_p2)
}
 0xa11   :  { %4640 = dma.vmem_to_hbm [thread:$0]  %s4638_s26, 128, %s6660_s10, [#allocation4]  }
 0xa12   :  { %6123 = dma.done.wait [#allocation4], 128  }
 0xa13   :  { %6124 = vsyncadd [#allocation4], 4294967168 }
 0xa14   :  { %4644 = vsyncpa [#allocation3], 1 }
 0xa15   :  { %4645 = vsyncpa [#allocation6], 1 }
 0xa16   :  { %4646 = vsyncpa [#allocation9], 1 }
 0xa17   :  { %4647 = vsyncpa [#allocation12], 1 }
 0xa18   :  { %4648 = vsyncpa [#allocation15], 1 }
 0xa19   :  { %4649 = vsyncpa [#allocation4], 1 }

</bundles_post_ra>
